<compile_context>
chip_gen: v5e
topology: v5e:2x2
jax: 0.10.0
libtpu: 0.0.40
codegen_flags: <defaults>
</compile_context>

<pallas_src>
import functools

import jax
import jax.numpy as jnp
from jax.experimental import pallas as pl
from jax.experimental.pallas import tpu as pltpu


_SLAB_N = 256    # lane width of the packed weight slab (max layer output width)
_T_LANES = 128   # lane-padded width of the T-raw / one-hot / action_R blocks
_OUT_W = 3 * _T_LANES  # packed output width: [action_T | action_R | T_raw]
_ROW_ALIGN = 32  # slab row alignment (covers bf16 (16) and int8/fp8 (32) tiling)


def _round_up(x, m):
    return ((x + m - 1) // m) * m


def _weight_layout(state_dim, action_T_dim, action_R_dim):
    """Row layout of the packed (K_total, 256) weight slab.

    All layer outputs that feed elementwise lane logic are padded to 128 lanes;
    the one-hot action_T is 128 lanes wide, so the pw1t block reserves 128 rows
    (rows >= action_T_dim are zero, contributing nothing).
    """
    del action_R_dim  # action_R lanes are padded to 128 at compute time
    entries = [
        # name, K (rows reserved / sliced in-kernel)
        ("fw1", state_dim),
        ("fw2", 256),
        ("fw3", 128),
        ("fw4", 128),
        ("pw1s", state_dim),       # pi layer-1, state part
        ("pw1t", _T_LANES),        # pi layer-1, one-hot part (K padded to 128)
        ("pw2", 256),
        ("pw3", 256),              # 167 -> 256 zero-padded cols
        ("pw4", 256),              # 167 -> 256 zero-padded rows
    ]
    layout = {}
    row = 0
    for name, k in entries:
        layout[name] = (row, k)
        row += _round_up(k, _ROW_ALIGN)
    return layout, _round_up(row, _ROW_ALIGN)


def _pick_tile_b(B):
    """Generation-aware batch tile: keep both v7x TensorCores busy, otherwise
    prefer bigger tiles (fewer grid steps, better MXU fill)."""
    kind = ""
    try:
        kind = jax.devices()[0].device_kind.lower()
    except Exception:  # pragma: no cover - defensive
        pass
    dual_core = "v7" in kind  # v7x: 2 TensorCores per chip
    if dual_core:
        return 256 if B >= 512 else 128
    return 256 if B > 128 else 128


# -----------------------------------------------------------------------------
# Kernel
# -----------------------------------------------------------------------------
def actor_kernel(state_ref, tmask_ref, gumbel_ref, w_ref, b_ref, out_ref,
                 *, layout):
    f32 = jnp.float32
    wdt = w_ref.dtype  # bf16 slab; MXU-native, f32 accumulation
    relu = lambda v: jnp.maximum(v, 0.0)

    def layer(x, name, bias_row, n_out, act, out_dtype):
        r, k = layout[name]
        w = w_ref[r:r + k, 0:n_out]                   # static slab view
        b = b_ref[bias_row:bias_row + 1, 0:n_out]
        y = jnp.dot(x, w, preferred_element_type=f32) + b
        return act(y).astype(out_dtype)

    x = state_ref[...].astype(wdt)                    # (TB, S) bf16

    # ---- f(state) -> T_raw (128-lane padded; pad lanes are tanh(0) = 0) -----
    h = layer(x, "fw1", 0, 256, relu, wdt)
    h = layer(h, "fw2", 1, 128, relu, wdt)
    h = layer(h, "fw3", 2, 128, relu, wdt)
    T_raw = layer(h, "fw4", 3, _T_LANES, jnp.tanh, f32)          # (TB, 128)

    # ---- hard Gumbel-softmax: argmax((T_raw*mask + g)/tau) == argmax(...+g) --
    # padded lanes: mask = 0, gumbel = -1e30 -> can never win the argmax.
    scores = T_raw * tmask_ref[...] + gumbel_ref[...]            # (TB, 128)
    idx = jnp.argmax(scores, axis=-1, keepdims=True)             # (TB, 1)
    lanes = jax.lax.broadcasted_iota(jnp.int32, scores.shape, 1)
    action_T = (lanes == idx).astype(f32)                        # (TB, 128) one-hot

    # ---- pi(concat(state, action_T)) -> action_R ----------------------------
    r1s, k1s = layout["pw1s"]
    r1t, k1t = layout["pw1t"]
    g = (jnp.dot(x, w_ref[r1s:r1s + k1s, :], preferred_element_type=f32)
         + jnp.dot(action_T.astype(wdt), w_ref[r1t:r1t + k1t, :],
                   preferred_element_type=f32)
         + b_ref[4:5, :])
    g = relu(g).astype(wdt)
    g = layer(g, "pw2", 5, 256, relu, wdt)
    g = layer(g, "pw3", 6, 256, relu, wdt)            # padded lanes 167..: stay 0
    action_R = layer(g, "pw4", 7, _T_LANES, jnp.tanh, f32)       # (TB, 128)

    # ---- three 128-lane-aligned unmasked stores ------------------------------
    out_ref[:, 0:_T_LANES] = action_T
    out_ref[:, _T_LANES:2 * _T_LANES] = action_R
    out_ref[:, 2 * _T_LANES:3 * _T_LANES] = T_raw


# -----------------------------------------------------------------------------
# Wrapper
# -----------------------------------------------------------------------------
def actor_forward(state, T_mask, gumbel_noise, gumbel_tau,
                  w_slab, b_slab, layout, dims, *, tile_b=None):
    """Runs the Actor forward pass. Returns (action_T, action_R, T_raw)."""
    del gumbel_tau  # hard one-hot forward value is invariant to tau (argmax only)
    S, T, R = dims
    assert T <= _T_LANES and R <= _T_LANES
    B = state.shape[0]
    if tile_b is None:
        tile_b = _pick_tile_b(B)
    b_pad = _round_up(max(B, 1), tile_b)

    row_pad = b_pad - B
    state_p = jnp.pad(state, ((0, row_pad), (0, 0)))
    # lane-pad mask with 0 and gumbel with -1e30 so padded lanes never win argmax
    mask_p = jnp.pad(T_mask, ((0, row_pad), (0, _T_LANES - T)))
    gum_p = jnp.pad(gumbel_noise, ((0, row_pad), (0, _T_LANES - T)),
                    constant_values=-1e30)

    kernel = functools.partial(actor_kernel, layout=layout)

    packed = pl.pallas_call(
        kernel,
        out_shape=jax.ShapeDtypeStruct((b_pad, _OUT_W), jnp.float32),
        grid=(b_pad // tile_b,),
        in_specs=[
            pl.BlockSpec((tile_b, S), lambda i: (i, 0)),          # state
            pl.BlockSpec((tile_b, _T_LANES), lambda i: (i, 0)),   # T_mask (padded)
            pl.BlockSpec((tile_b, _T_LANES), lambda i: (i, 0)),   # gumbel (padded)
            pl.BlockSpec(w_slab.shape, lambda i: (0, 0)),         # weights (resident)
            pl.BlockSpec(b_slab.shape, lambda i: (0, 0)),         # biases (resident)
        ],
        out_specs=pl.BlockSpec((tile_b, _OUT_W), lambda i: (i, 0)),
        compiler_params=pltpu.CompilerParams(
            dimension_semantics=("parallel",)),
    )(state_p, mask_p, gum_p, w_slab, b_slab)

    action_T = packed[:B, 0:T]
    action_R = packed[:B, _T_LANES:_T_LANES + R]
    T_raw = packed[:B, 2 * _T_LANES:2 * _T_LANES + T]
    return action_T, action_R, T_raw


# -----------------------------------------------------------------------------
# Parameter init (PyTorch Linear-style uniform bounds) + offline packing
# -----------------------------------------------------------------------------
def _linear_params(key, in_dim, out_dim):
    kw, kb = jax.random.split(key)
    bound = 1.0 / (in_dim ** 0.5)
    w = jax.random.uniform(kw, (in_dim, out_dim), jnp.float32, -bound, bound)
    b = jax.random.uniform(kb, (out_dim,), jnp.float32, -bound, bound)
    return w, b


def make_actor_params(key, state_dim, action_T_dim, action_R_dim):
    keys = jax.random.split(key, 8)
    f = [
        _linear_params(keys[0], state_dim, 256),
        _linear_params(keys[1], 256, 128),
        _linear_params(keys[2], 128, 128),
        _linear_params(keys[3], 128, action_T_dim),
    ]
    pi = [
        _linear_params(keys[4], state_dim + action_T_dim, 256),
        _linear_params(keys[5], 256, 256),
        _linear_params(keys[6], 256, 167),
        _linear_params(keys[7], 167, action_R_dim),
    ]
    return {"f": f, "pi": pi}


def pack_actor_params(params, state_dim, action_T_dim, action_R_dim,
                      weight_dtype=jnp.bfloat16):
    """One-time packing: all weights -> one bf16 slab, all biases -> one f32 slab."""
    (fw1, fb1), (fw2, fb2), (fw3, fb3), (fw4, fb4) = params["f"]
    (pw1, pb1), (pw2, pb2), (pw3, pb3), (pw4, pb4) = params["pi"]
    pw1s, pw1t = pw1[:state_dim], pw1[state_dim:]

    layout, k_total = _weight_layout(state_dim, action_T_dim, action_R_dim)
    w_slab = jnp.zeros((k_total, _SLAB_N), jnp.float32)

    def put(slab, name, w):
        r, _ = layout[name]
        kk, nn = w.shape
        return slab.at[r:r + kk, :nn].set(w)

    for name, w in [("fw1", fw1), ("fw2", fw2), ("fw3", fw3), ("fw4", fw4),
                    ("pw1s", pw1s), ("pw1t", pw1t), ("pw2", pw2),
                    ("pw3", pw3), ("pw4", pw4)]:
        w_slab = put(w_slab, name, w)
    w_slab = w_slab.astype(weight_dtype)

    b_slab = jnp.zeros((8, _SLAB_N), jnp.float32)
    for i, b in enumerate([fb1, fb2, fb3, fb4, pb1, pb2, pb3, pb4]):
        b_slab = b_slab.at[i, :b.shape[-1]].set(b.reshape(-1))
    return w_slab, b_slab, layout


# -----------------------------------------------------------------------------
# Pure-JAX reference (f32) for correctness checks
# -----------------------------------------------------------------------------
def _reference_f(params, state):
    (fw1, fb1), (fw2, fb2), (fw3, fb3), (fw4, fb4) = params["f"]
    relu = lambda v: jnp.maximum(v, 0.0)
    h = relu(state @ fw1 + fb1)
    h = relu(h @ fw2 + fb2)
    h = relu(h @ fw3 + fb3)
    return jnp.tanh(h @ fw4 + fb4)


def _reference_pi(params, state, action_T):
    (pw1, pb1), (pw2, pb2), (pw3, pb3), (pw4, pb4) = params["pi"]
    relu = lambda v: jnp.maximum(v, 0.0)
    x = jnp.concatenate([state, action_T], axis=-1)
    h = relu(x @ pw1 + pb1)
    h = relu(h @ pw2 + pb2)
    h = relu(h @ pw3 + pb3)
    return jnp.tanh(h @ pw4 + pb4)


# -----------------------------------------------------------------------------
# Main
# -----------------------------------------------------------------------------
if __name__ == "__main__":
    B = 16
    state_dim = 32
    action_T_dim = 16
    action_R_dim = 24
    gumbel_tau = 1.0
    dims = (state_dim, action_T_dim, action_R_dim)

    root = jax.random.PRNGKey(0)
    k_params, k_state, k_mask, k_gumbel = jax.random.split(root, 4)

    params = make_actor_params(k_params, state_dim, action_T_dim, action_R_dim)
    w_slab, b_slab, layout = pack_actor_params(
        params, state_dim, action_T_dim, action_R_dim)

    state = jax.random.normal(k_state, (B, state_dim), jnp.float32)
    # one-hot style reaction mask (0/1 floats), somewhat sparse
    T_mask = (jax.random.uniform(k_mask, (B, action_T_dim)) > 0.3).astype(jnp.float32)
    # deterministic Gumbel noise (PyTorch samples this inside F.gumbel_softmax)
    gumbel_noise = jax.random.gumbel(k_gumbel, (B, action_T_dim), jnp.float32)

    action_T, action_R, T_raw = actor_forward(
        state, T_mask, gumbel_noise, gumbel_tau, w_slab, b_slab, layout, dims)
    jax.block_until_ready((action_T, action_R, T_raw))

    # ---- sanity checks -------------------------------------------------------
    assert action_T.shape == (B, action_T_dim)
    assert action_R.shape == (B, action_R_dim)
    assert T_raw.shape == (B, action_T_dim)
    assert bool(jnp.all(jnp.isfinite(action_R)))
    # hard gumbel-softmax output must be exactly one-hot per row
    assert bool(jnp.all(jnp.sum(action_T, axis=-1) == 1.0))
    assert bool(jnp.all((action_T == 0.0) | (action_T == 1.0)))
    # tanh outputs bounded
    assert bool(jnp.all(jnp.abs(T_raw) <= 1.0))
    assert bool(jnp.all(jnp.abs(action_R) <= 1.0))

    # ---- numerical parity vs pure-JAX f32 reference (bf16 weights -> loose) --
    T_raw_ref = _reference_f(params, state)
    assert bool(jnp.all(jnp.abs(T_raw - T_raw_ref) < 6e-2))
    # use the kernel's own T_raw to pick the argmax so ties cannot flip
    scores = T_raw * T_mask + gumbel_noise
    act_T_ref = jax.nn.one_hot(jnp.argmax(scores, axis=-1), action_T_dim,
                               dtype=jnp.float32)
    assert bool(jnp.all(action_T == act_T_ref))
    action_R_ref = _reference_pi(params, state, act_T_ref)
    assert bool(jnp.all(jnp.abs(action_R - action_R_ref) < 6e-2))

    print("KERNEL_OK")
</pallas_src>

<mosaic_0001>
module attributes {stable_mosaic.version = 11 : i64} {
  func.func @actor_kernel(%arg0: i32, %arg1: memref<128x32xf32, #tpu.memory_space<vmem>>, %arg2: memref<128x128xf32, #tpu.memory_space<vmem>>, %arg3: memref<128x128xf32, #tpu.memory_space<vmem>>, %arg4: memref<1472x256xbf16, #tpu.memory_space<vmem>>, %arg5: memref<8x256xf32, #tpu.memory_space<vmem>>, %arg6: memref<128x384xf32, #tpu.memory_space<vmem>>) attributes {dimension_semantics = [#tpu.dimension_semantics<parallel>], iteration_bounds = array<i64: 1>, scalar_prefetch = 0 : i64, scratch_operands = 0 : i64, tpu.core_type = #tpu.core_type<tc>, window_params = [{transform_indices = @transform_0, window_bounds = array<i64: 128, 32>}, {transform_indices = @transform_1, window_bounds = array<i64: 128, 128>}, {transform_indices = @transform_2, window_bounds = array<i64: 128, 128>}, {pipeline_mode = #tpu.pipeline_mode<synchronous>, transform_indices = @transform_3, window_bounds = array<i64: 1472, 256>}, {pipeline_mode = #tpu.pipeline_mode<synchronous>, transform_indices = @transform_4, window_bounds = array<i64: 8, 256>}, {transform_indices = @transform_5, window_bounds = array<i64: 128, 384>}]} {
    %c0 = arith.constant 0 : index
    %c0_0 = arith.constant 0 : index
    %0 = vector.load %arg1[%c0, %c0_0] : memref<128x32xf32, #tpu.memory_space<vmem>>, vector<128x32xf32>
    %1 = arith.truncf %0 : vector<128x32xf32> to vector<128x32xbf16>
    %c0_1 = arith.constant 0 : index
    %c0_2 = arith.constant 0 : index
    %2 = vector.load %arg4[%c0_1, %c0_2] : memref<1472x256xbf16, #tpu.memory_space<vmem>>, vector<32x256xbf16>
    %c0_3 = arith.constant 0 : index
    %c0_4 = arith.constant 0 : index
    %3 = vector.load %arg5[%c0_3, %c0_4] : memref<8x256xf32, #tpu.memory_space<vmem>>, vector<1x256xf32>
    %cst = arith.constant dense<0.000000e+00> : vector<128x256xf32>
    %4 = tpu.matmul %1, %2, %cst {dimension_numbers = #tpu.dot_dimension_numbers<[1], [0], [0], [1], [0, 0, 1, 1], [], []>} : vector<128x32xbf16>, vector<32x256xbf16>, vector<128x256xf32> -> vector<128x256xf32>
    %5 = vector.broadcast %3 : vector<1x256xf32> to vector<128x256xf32>
    %6 = arith.addf %4, %5 : vector<128x256xf32>
    %cst_5 = arith.constant 0.000000e+00 : f32
    %7 = vector.broadcast %cst_5 : f32 to vector<128x256xf32>
    %8 = arith.maximumf %6, %7 : vector<128x256xf32>
    %9 = arith.truncf %8 : vector<128x256xf32> to vector<128x256xbf16>
    %c32 = arith.constant 32 : index
    %c0_6 = arith.constant 0 : index
    %10 = vector.load %arg4[%c32, %c0_6] : memref<1472x256xbf16, #tpu.memory_space<vmem>>, vector<256x128xbf16>
    %c1 = arith.constant 1 : index
    %c0_7 = arith.constant 0 : index
    %11 = vector.load %arg5[%c1, %c0_7] : memref<8x256xf32, #tpu.memory_space<vmem>>, vector<1x128xf32>
    %cst_8 = arith.constant dense<0.000000e+00> : vector<128x128xf32>
    %12 = tpu.matmul %9, %10, %cst_8 {dimension_numbers = #tpu.dot_dimension_numbers<[1], [0], [0], [1], [0, 0, 1, 1], [], []>} : vector<128x256xbf16>, vector<256x128xbf16>, vector<128x128xf32> -> vector<128x128xf32>
    %13 = vector.broadcast %11 : vector<1x128xf32> to vector<128x128xf32>
    %14 = arith.addf %12, %13 : vector<128x128xf32>
    %cst_9 = arith.constant 0.000000e+00 : f32
    %15 = vector.broadcast %cst_9 : f32 to vector<128x128xf32>
    %16 = arith.maximumf %14, %15 : vector<128x128xf32>
    %17 = arith.truncf %16 : vector<128x128xf32> to vector<128x128xbf16>
    %c288 = arith.constant 288 : index
    %c0_10 = arith.constant 0 : index
    %18 = vector.load %arg4[%c288, %c0_10] : memref<1472x256xbf16, #tpu.memory_space<vmem>>, vector<128x128xbf16>
    %c2 = arith.constant 2 : index
    %c0_11 = arith.constant 0 : index
    %19 = vector.load %arg5[%c2, %c0_11] : memref<8x256xf32, #tpu.memory_space<vmem>>, vector<1x128xf32>
    %cst_12 = arith.constant dense<0.000000e+00> : vector<128x128xf32>
    %20 = tpu.matmul %17, %18, %cst_12 {dimension_numbers = #tpu.dot_dimension_numbers<[1], [0], [0], [1], [0, 0, 1, 1], [], []>} : vector<128x128xbf16>, vector<128x128xbf16>, vector<128x128xf32> -> vector<128x128xf32>
    %21 = vector.broadcast %19 : vector<1x128xf32> to vector<128x128xf32>
    %22 = arith.addf %20, %21 : vector<128x128xf32>
    %cst_13 = arith.constant 0.000000e+00 : f32
    %23 = vector.broadcast %cst_13 : f32 to vector<128x128xf32>
    %24 = arith.maximumf %22, %23 : vector<128x128xf32>
    %25 = arith.truncf %24 : vector<128x128xf32> to vector<128x128xbf16>
    %c416 = arith.constant 416 : index
    %c0_14 = arith.constant 0 : index
    %26 = vector.load %arg4[%c416, %c0_14] : memref<1472x256xbf16, #tpu.memory_space<vmem>>, vector<128x128xbf16>
    %c3 = arith.constant 3 : index
    %c0_15 = arith.constant 0 : index
    %27 = vector.load %arg5[%c3, %c0_15] : memref<8x256xf32, #tpu.memory_space<vmem>>, vector<1x128xf32>
    %cst_16 = arith.constant dense<0.000000e+00> : vector<128x128xf32>
    %28 = tpu.matmul %25, %26, %cst_16 {dimension_numbers = #tpu.dot_dimension_numbers<[1], [0], [0], [1], [0, 0, 1, 1], [], []>} : vector<128x128xbf16>, vector<128x128xbf16>, vector<128x128xf32> -> vector<128x128xf32>
    %29 = vector.broadcast %27 : vector<1x128xf32> to vector<128x128xf32>
    %30 = arith.addf %28, %29 : vector<128x128xf32>
    %31 = math.tanh %30 : vector<128x128xf32>
    %c0_17 = arith.constant 0 : index
    %c0_18 = arith.constant 0 : index
    %32 = vector.load %arg2[%c0_17, %c0_18] : memref<128x128xf32, #tpu.memory_space<vmem>>, vector<128x128xf32>
    %33 = arith.mulf %31, %32 : vector<128x128xf32>
    %c0_19 = arith.constant 0 : index
    %c0_20 = arith.constant 0 : index
    %34 = vector.load %arg3[%c0_19, %c0_20] : memref<128x128xf32, #tpu.memory_space<vmem>>, vector<128x128xf32>
    %35 = arith.addf %33, %34 : vector<128x128xf32>
    %36 = tpu.reduce_index %35 {axis = 1 : i32, kind = #tpu.reduction_kind<arg_max>} : vector<128x128xf32> -> vector<128xi32>
    %37 = vector.shape_cast %36 : vector<128xi32> to vector<128x1xi32>
    %38 = tpu.iota {dimensions = array<i32: 1>} : vector<128x128xi32>
    %39 = vector.broadcast %37 : vector<128x1xi32> to vector<128x128xi32>
    %40 = arith.cmpi eq, %38, %39 : vector<128x128xi32>
    %41 = arith.extui %40 : vector<128x128xi1> to vector<128x128xi32>
    %42 = arith.sitofp %41 : vector<128x128xi32> to vector<128x128xf32>
    %c544 = arith.constant 544 : index
    %c0_21 = arith.constant 0 : index
    %43 = vector.load %arg4[%c544, %c0_21] : memref<1472x256xbf16, #tpu.memory_space<vmem>>, vector<32x256xbf16>
    %cst_22 = arith.constant dense<0.000000e+00> : vector<128x256xf32>
    %44 = tpu.matmul %1, %43, %cst_22 {dimension_numbers = #tpu.dot_dimension_numbers<[1], [0], [0], [1], [0, 0, 1, 1], [], []>} : vector<128x32xbf16>, vector<32x256xbf16>, vector<128x256xf32> -> vector<128x256xf32>
    %45 = arith.truncf %42 : vector<128x128xf32> to vector<128x128xbf16>
    %c576 = arith.constant 576 : index
    %c0_23 = arith.constant 0 : index
    %46 = vector.load %arg4[%c576, %c0_23] : memref<1472x256xbf16, #tpu.memory_space<vmem>>, vector<128x256xbf16>
    %cst_24 = arith.constant dense<0.000000e+00> : vector<128x256xf32>
    %47 = tpu.matmul %45, %46, %cst_24 {dimension_numbers = #tpu.dot_dimension_numbers<[1], [0], [0], [1], [0, 0, 1, 1], [], []>} : vector<128x128xbf16>, vector<128x256xbf16>, vector<128x256xf32> -> vector<128x256xf32>
    %48 = arith.addf %44, %47 : vector<128x256xf32>
    %c4 = arith.constant 4 : index
    %c0_25 = arith.constant 0 : index
    %49 = vector.load %arg5[%c4, %c0_25] : memref<8x256xf32, #tpu.memory_space<vmem>>, vector<1x256xf32>
    %50 = vector.broadcast %49 : vector<1x256xf32> to vector<128x256xf32>
    %51 = arith.addf %48, %50 : vector<128x256xf32>
    %cst_26 = arith.constant 0.000000e+00 : f32
    %52 = vector.broadcast %cst_26 : f32 to vector<128x256xf32>
    %53 = arith.maximumf %51, %52 : vector<128x256xf32>
    %54 = arith.truncf %53 : vector<128x256xf32> to vector<128x256xbf16>
    %c704 = arith.constant 704 : index
    %c0_27 = arith.constant 0 : index
    %55 = vector.load %arg4[%c704, %c0_27] : memref<1472x256xbf16, #tpu.memory_space<vmem>>, vector<256x256xbf16>
    %c5 = arith.constant 5 : index
    %c0_28 = arith.constant 0 : index
    %56 = vector.load %arg5[%c5, %c0_28] : memref<8x256xf32, #tpu.memory_space<vmem>>, vector<1x256xf32>
    %cst_29 = arith.constant dense<0.000000e+00> : vector<128x256xf32>
    %57 = tpu.matmul %54, %55, %cst_29 {dimension_numbers = #tpu.dot_dimension_numbers<[1], [0], [0], [1], [0, 0, 1, 1], [], []>} : vector<128x256xbf16>, vector<256x256xbf16>, vector<128x256xf32> -> vector<128x256xf32>
    %58 = vector.broadcast %56 : vector<1x256xf32> to vector<128x256xf32>
    %59 = arith.addf %57, %58 : vector<128x256xf32>
    %cst_30 = arith.constant 0.000000e+00 : f32
    %60 = vector.broadcast %cst_30 : f32 to vector<128x256xf32>
    %61 = arith.maximumf %59, %60 : vector<128x256xf32>
    %62 = arith.truncf %61 : vector<128x256xf32> to vector<128x256xbf16>
    %c960 = arith.constant 960 : index
    %c0_31 = arith.constant 0 : index
    %63 = vector.load %arg4[%c960, %c0_31] : memref<1472x256xbf16, #tpu.memory_space<vmem>>, vector<256x256xbf16>
    %c6 = arith.constant 6 : index
    %c0_32 = arith.constant 0 : index
    %64 = vector.load %arg5[%c6, %c0_32] : memref<8x256xf32, #tpu.memory_space<vmem>>, vector<1x256xf32>
    %cst_33 = arith.constant dense<0.000000e+00> : vector<128x256xf32>
    %65 = tpu.matmul %62, %63, %cst_33 {dimension_numbers = #tpu.dot_dimension_numbers<[1], [0], [0], [1], [0, 0, 1, 1], [], []>} : vector<128x256xbf16>, vector<256x256xbf16>, vector<128x256xf32> -> vector<128x256xf32>
    %66 = vector.broadcast %64 : vector<1x256xf32> to vector<128x256xf32>
    %67 = arith.addf %65, %66 : vector<128x256xf32>
    %cst_34 = arith.constant 0.000000e+00 : f32
    %68 = vector.broadcast %cst_34 : f32 to vector<128x256xf32>
    %69 = arith.maximumf %67, %68 : vector<128x256xf32>
    %70 = arith.truncf %69 : vector<128x256xf32> to vector<128x256xbf16>
    %c1216 = arith.constant 1216 : index
    %c0_35 = arith.constant 0 : index
    %71 = vector.load %arg4[%c1216, %c0_35] : memref<1472x256xbf16, #tpu.memory_space<vmem>>, vector<256x128xbf16>
    %c7 = arith.constant 7 : index
    %c0_36 = arith.constant 0 : index
    %72 = vector.load %arg5[%c7, %c0_36] : memref<8x256xf32, #tpu.memory_space<vmem>>, vector<1x128xf32>
    %cst_37 = arith.constant dense<0.000000e+00> : vector<128x128xf32>
    %73 = tpu.matmul %70, %71, %cst_37 {dimension_numbers = #tpu.dot_dimension_numbers<[1], [0], [0], [1], [0, 0, 1, 1], [], []>} : vector<128x256xbf16>, vector<256x128xbf16>, vector<128x128xf32> -> vector<128x128xf32>
    %74 = vector.broadcast %72 : vector<1x128xf32> to vector<128x128xf32>
    %75 = arith.addf %73, %74 : vector<128x128xf32>
    %76 = math.tanh %75 : vector<128x128xf32>
    %c0_38 = arith.constant 0 : index
    %c0_39 = arith.constant 0 : index
    %77 = vector.load %arg6[%c0_38, %c0_39] : memref<128x384xf32, #tpu.memory_space<vmem>>, vector<128x128xf32>
    tpu.vector_store %arg6[%c0_38, %c0_39], %42 {strides = array<i32>} : memref<128x384xf32, #tpu.memory_space<vmem>>, vector<128x128xf32>,
    %c0_40 = arith.constant 0 : index
    %c128 = arith.constant 128 : index
    %78 = vector.load %arg6[%c0_40, %c128] : memref<128x384xf32, #tpu.memory_space<vmem>>, vector<128x128xf32>
    tpu.vector_store %arg6[%c0_40, %c128], %76 {strides = array<i32>} : memref<128x384xf32, #tpu.memory_space<vmem>>, vector<128x128xf32>,
    %c0_41 = arith.constant 0 : index
    %c256 = arith.constant 256 : index
    %79 = vector.load %arg6[%c0_41, %c256] : memref<128x384xf32, #tpu.memory_space<vmem>>, vector<128x128xf32>
    tpu.vector_store %arg6[%c0_41, %c256], %31 {strides = array<i32>} : memref<128x384xf32, #tpu.memory_space<vmem>>, vector<128x128xf32>,
    return
  }
  func.func @transform_0(%arg0: i32) -> (i32, i32) {
    %c0_i32 = arith.constant 0 : i32
    %c0_i32_0 = arith.constant 0 : i32
    return %arg0, %c0_i32 : i32, i32
  }
  func.func @transform_1(%arg0: i32) -> (i32, i32) {
    %c0_i32 = arith.constant 0 : i32
    %c0_i32_0 = arith.constant 0 : i32
    return %arg0, %c0_i32 : i32, i32
  }
  func.func @transform_2(%arg0: i32) -> (i32, i32) {
    %c0_i32 = arith.constant 0 : i32
    %c0_i32_0 = arith.constant 0 : i32
    return %arg0, %c0_i32 : i32, i32
  }
  func.func @transform_3(%arg0: i32) -> (i32, i32) {
    %c0_i32 = arith.constant 0 : i32
    %c0_i32_0 = arith.constant 0 : i32
    %c0_i32_1 = arith.constant 0 : i32
    return %c0_i32, %c0_i32_0 : i32, i32
  }
  func.func @transform_4(%arg0: i32) -> (i32, i32) {
    %c0_i32 = arith.constant 0 : i32
    %c0_i32_0 = arith.constant 0 : i32
    %c0_i32_1 = arith.constant 0 : i32
    return %c0_i32, %c0_i32_0 : i32, i32
  }
  func.func @transform_5(%arg0: i32) -> (i32, i32) {
    %c0_i32 = arith.constant 0 : i32
    %c0_i32_0 = arith.constant 0 : i32
    return %arg0, %c0_i32 : i32, i32
  }
}

</mosaic_0001>

<bundles_post_ra>
// kernel: tpu_custom_call.1
= control target key start
LH: loop header
LB: loop body
LE: loop exit
PB: predicated region body
PF: predicated region fallthrough
CT: control target
= control target key end

     0   :  { %10 = vsyncpa [#allocation3], 0  ;;  %s3976_s0 = inlined_call_operand.vmem [shape: f32[128,32], index: 0, kind: input, shape index: {}]   ;;  %s3977_s1 = inlined_call_operand.vmem [shape: f32[128,128], index: 1, kind: input, shape index: {}]   ;;  %s3978_s2 = inlined_call_operand.hbm [shape: f32[128,128], index: 2, kind: input, shape index: {}]   ;;  %s3979_s3 = inlined_call_operand.hbm [shape: bf16[1472,256], index: 3, kind: input, shape index: {}]   ;;  %s3980_s4 = inlined_call_operand.vmem [shape: f32[8,256], index: 4, kind: input, shape index: {}]   ;;  %s3981_s5 = inlined_call_operand.hbm [shape: f32[128,384], index: 5, kind: output, shape index: {}]  }
   0x1   :  { %11 = vsyncpa [#allocation6], 0 }
   0x2   :  { %12 = vsyncpa [#allocation4], 0  ;;  %s21_s20 = sshll.u32 %s3978_s2, 4  ;;  %s3466_s21 = smov [#allocation2]   ;;  %s22_s20 = int_to_ptr.hbm [resolvable:$true] %s21_s20 }
   0x3   :  { %s23_s22 = sshll.u32 %s3466_s21, 4  ;;  %s34_s25 = sshll.u32 %s3979_s3, 4  ;;  %s24_s22 = int_to_ptr.vmem [resolvable:$true] %s23_s22  ;;  %s35_s25 = int_to_ptr.hbm [resolvable:$true] %s34_s25 }
   0x4   :  { %s3467_s26 = smov 128   ;;  %s3468_s27 = smov 8  }
   0x5   :  { %29 = dma.hbm_to_vmem [thread:$0]  %s22_s20, 2048, %s24_s22, [#allocation3], %s3467_s26, %s3467_s26, %s3468_s27  }
   0x6   :  { %s3469_s28 = smov [#allocation5]  }
   0x7   :  { %s36_s29 = sshll.u32 %s3469_s28, 4  ;;  %s37_s29 = int_to_ptr.vmem [resolvable:$true] %s36_s29 }
   0x8   :  { %42 = dma.hbm_to_vmem [thread:$0]  %s35_s25, 23552, %s37_s29, [#allocation6], %s3467_s26, %s3467_s26, %s3468_s27  }
   0x9   :  { %3460 = dma.done.wait [#allocation3], 2048  }
   0xa   :  { %3461 = vsyncadd [#allocation3], 4294965248 }
   0xb   :  { %3462 = dma.done.wait [#allocation6], 23552  }
   0xc   :  { %3463 = vsyncadd [#allocation6], 4294943744  ;;  %v2562_v0 = vld [vmem:[#allocation5 + $0x10] sm:$0xf]  ;;  %v3182_v1 = vld [vmem:[#allocation5 + $0x14] sm:$0xf0] }
   0xd   :  { %v3181_v2 = vld [vmem:[#allocation5 + $0x14] sm:$0xf]  ;;  %v2563_v3 = vor.u32 %v3182_v1, %v2562_v0  ;;  %v2564_v4 = vld [vmem:[#allocation5 + $0x18] sm:$0xf0]  ;;  %v2554_v5 = vld [vmem:[#allocation5] sm:$0xf] }
   0xe   :  { %v3180_v6 = vld [vmem:[#allocation5 + $0x4] sm:$0xf0]  ;;  %v2567_v7 = vor.u32 %v3181_v2, %v2564_v4  ;;  %v3179_v8 = vld [vmem:[#allocation5 + $0x4] sm:$0xf]  ;;  %v2556_v9 = vld [vmem:[#allocation5 + $0x8] sm:$0xf0] }
   0xf   :  { %139 = vmatpush.bf16.msra.mxu0 %v2563_v3  ;;  %v2555_v10 = vor.u32 %v3180_v6, %v2554_v5  ;;  %v54_v11 = vld [vmem:[%s3976_s0] sm:$0xff]  ;;  %v55_v12 = vld [vmem:[%s3976_s0 + $0x8] sm:$0xff]  ;;  %v2559_v13 = vor.u32 %v3179_v8, %v2556_v9  ;;  %vm108_vm0 = vcmask 261120   ;;  %v56_v15 = vld [vmem:[%s3976_s0 + $0x10] sm:$0xff]  ;;  %s2538_s29 = sshll.u32 %s3981_s5, 4  ;;  %s3473_s2 = smov 384   ;;  %s2539_s29 = int_to_ptr.hbm [resolvable:$true] %s2538_s29 }
  0x10   :  { %188 = vmatpush.bf16.msra.mxu1 %v2567_v7  ;;  %v3517_v14 = vpack.c.bf16 %v55_v12, %v54_v11  ;;  %v57_v16 = vld [vmem:[%s3976_s0 + $0x18] sm:$0xff]  ;;  %v58_v18 = vld [vmem:[%s3976_s0 + $0x20] sm:$0xff]  ;;  %v59_v19 = vld [vmem:[%s3976_s0 + $0x28] sm:$0xff]  ;;  %s3474_s3 = smov 24  }
  0x11   :  { %v3529_v17 = vpack.c.bf16 %v57_v16, %v56_v15  ;;  %v3541_v20 = vpack.c.bf16 %v59_v19, %v58_v18  ;;  %v60_v21 = vld [vmem:[%s3976_s0 + $0x30] sm:$0xff]  ;;  %v61_v22 = vld [vmem:[%s3976_s0 + $0x38] sm:$0xff]  ;;  %v62_v24 = vld [vmem:[%s3976_s0 + $0x40] sm:$0xff] }
  0x12   :  { %v3553_v23 = vpack.c.bf16 %v61_v22, %v60_v21  ;;  %v63_v25 = vld [vmem:[%s3976_s0 + $0x48] sm:$0xff]  ;;  %v2614_v27 = vld [vmem:[#allocation5 + $0x90] sm:$0xf]  ;;  %v3190_v28 = vld [vmem:[#allocation5 + $0x94] sm:$0xf0] }
  0x13   :  { %140 = vmatpush.bf16.msra.mxu0 %v2555_v10  ;;  %v3565_v26 = vpack.c.bf16 %v63_v25, %v62_v24  ;;  %v2646_v29 = vld [vmem:[#allocation5 + $0x110] sm:$0xf]  ;;  %v2615_v30 = vor.u32 %v3190_v28, %v2614_v27  ;;  %v3198_v31 = vld [vmem:[#allocation5 + $0x114] sm:$0xf0]  ;;  %v2610_v36 = vld [vmem:[#allocation5 + $0x80] sm:$0xf] }
  0x14   :  { %189 = vmatpush.bf16.msra.mxu1 %v2559_v13  ;;  %v2647_v32 = vor.u32 %v3198_v31, %v2646_v29  ;;  %v64_v33 = vld [vmem:[%s3976_s0 + $0x50] sm:$0xff]  ;;  %v65_v34 = vld [vmem:[%s3976_s0 + $0x58] sm:$0xff]  ;;  %v3189_v37 = vld [vmem:[#allocation5 + $0x84] sm:$0xf0] }
  0x15   :  { %408 = vmatpush.bf16.msra.mxu2 %v2615_v30  ;;  %v3577_v35 = vpack.c.bf16 %v65_v34, %v64_v33  ;;  %v2642_v38 = vld [vmem:[#allocation5 + $0x100] sm:$0xf]  ;;  %v2611_v39 = vor.u32 %v3189_v37, %v2610_v36  ;;  %v3197_v40 = vld [vmem:[#allocation5 + $0x104] sm:$0xf0]  ;;  %v2606_v42 = vld [vmem:[#allocation5 + $0x70] sm:$0xf] }
  0x16   :  { %2568 = vmatmul.msk.bf16.vlgmr.msra.gmra.mxu0 %vm108_vm0, %v3517_v14  ;;  %457 = vmatpush.bf16.msra.mxu3 %v2647_v32  ;;  %v2643_v41 = vor.u32 %v3197_v40, %v2642_v38  ;;  %v3188_v43 = vld [vmem:[#allocation5 + $0x74] sm:$0xf0]  ;;  %v2638_v44 = vld [vmem:[#allocation5 + $0xf0] sm:$0xf]  ;;  %v2602_v48 = vld [vmem:[#allocation5 + $0x60] sm:$0xf] }
  0x17   :  { %2576 = vmatmul.msk.bf16.vlgmr.msra.gmra.mxu1 %vm108_vm0, %v3517_v14  ;;  %v2607_v45 = vor.u32 %v3188_v43, %v2606_v42  ;;  %v3196_v46 = vld [vmem:[#allocation5 + $0xf4] sm:$0xf0]  ;;  %v3187_v49 = vld [vmem:[#allocation5 + $0x64] sm:$0xf0]  ;;  %v2634_v50 = vld [vmem:[#allocation5 + $0xe0] sm:$0xf] }
  0x18   :  { %v2639_v47 = vor.u32 %v3196_v46, %v2638_v44  ;;  %v3195_v51 = vld [vmem:[#allocation5 + $0xe4] sm:$0xf0]  ;;  %v2603_v52 = vor.u32 %v3187_v49, %v2602_v48  ;;  %v66_v54 = vld [vmem:[%s3976_s0 + $0x60] sm:$0xff]  ;;  %v2598_v56 = vld [vmem:[#allocation5 + $0x50] sm:$0xf] }
  0x19   :  { %409 = vmatpush.bf16.msra.mxu2 %v2611_v39  ;;  %v2635_v53 = vor.u32 %v3195_v51, %v2634_v50  ;;  %v67_v55 = vld [vmem:[%s3976_s0 + $0x68] sm:$0xff]  ;;  %v3186_v57 = vld [vmem:[#allocation5 + $0x54] sm:$0xf0]  ;;  %v2630_v58 = vld [vmem:[#allocation5 + $0xd0] sm:$0xf] }
  0x1a   :  { %458 = vmatpush.bf16.msra.mxu3 %v2643_v41  ;;  %v3589_v59 = vpack.c.bf16 %v67_v55, %v66_v54  ;;  %v2599_v60 = vor.u32 %v3186_v57, %v2598_v56  ;;  %v3194_v61 = vld [vmem:[#allocation5 + $0xd4] sm:$0xf0]  ;;  %v2594_v63 = vld [vmem:[#allocation5 + $0x40] sm:$0xf]  ;;  %v3185_v0 = vld [vmem:[#allocation5 + $0x44] sm:$0xf0] }
  0x1b   :  { %v2631_v62 = vor.u32 %v3194_v61, %v2630_v58  ;;  %v2595_v1 = vor.u32 %v3185_v0, %v2594_v63  ;;  %v2626_v2 = vld [vmem:[#allocation5 + $0xc0] sm:$0xf]  ;;  %v3193_v3 = vld [vmem:[#allocation5 + $0xc4] sm:$0xf0]  ;;  %v2590_v5 = vld [vmem:[#allocation5 + $0x30] sm:$0xf] }
  0x1c   :  { %v2627_v4 = vor.u32 %v3193_v3, %v2626_v2  ;;  %v3184_v6 = vld [vmem:[#allocation5 + $0x34] sm:$0xf0]  ;;  %v2622_v7 = vld [vmem:[#allocation5 + $0xb0] sm:$0xf]  ;;  %v2586_v11 = vld [vmem:[#allocation5 + $0x20] sm:$0xf] }
  0x1d   :  { %410 = vmatpush.bf16.msra.mxu2 %v2607_v45  ;;  %v2591_v8 = vor.u32 %v3184_v6, %v2590_v5  ;;  %v3192_v9 = vld [vmem:[#allocation5 + $0xb4] sm:$0xf0]  ;;  %v3183_v12 = vld [vmem:[#allocation5 + $0x24] sm:$0xf0]  ;;  %v2618_v13 = vld [vmem:[#allocation5 + $0xa0] sm:$0xf] }
  0x1e   :  { %459 = vmatpush.bf16.msra.mxu3 %v2639_v47  ;;  %v2623_v10 = vor.u32 %v3192_v9, %v2622_v7  ;;  %v2587_v15 = vor.u32 %v3183_v12, %v2586_v11  ;;  %v3191_v16 = vld [vmem:[#allocation5 + $0xa4] sm:$0xf0]  ;;  %v68_v18 = vld [vmem:[%s3976_s0 + $0x70] sm:$0xff]  ;;  %v69_v19 = vld [vmem:[%s3976_s0 + $0x78] sm:$0xff] }
  0x1f   :  { %v2619_v21 = vor.u32 %v3191_v16, %v2618_v13  ;;  %v3601_v22 = vpack.c.bf16 %v69_v19, %v68_v18  ;;  %v82_v24 = vld [vmem:[%s3980_s4] ss:$8 sm:$0x3]  ;;  %v2678_v30 = vld [vmem:[#allocation5 + $0x190] sm:$0xf] }
  0x20   :  { %v3610_v28 = vperm.slane %v82_v24, 0  ;;  %v3612_v29 = vperm.slane %v82_v24, 1  ;;  %v3206_v31 = vld [vmem:[#allocation5 + $0x194] sm:$0xf0]  ;;  %v2674_v48 = vld [vmem:[#allocation5 + $0x180] sm:$0xf] }
  0x21   :  { %411 = vmatpush.bf16.msra.mxu2 %v2603_v52  ;;  %v2679_v32 = vor.u32 %v3206_v31, %v2678_v30  ;;  %v3205_v49 = vld [vmem:[#allocation5 + $0x184] sm:$0xf0]  ;;  %v2670_v2 = vld [vmem:[#allocation5 + $0x170] sm:$0xf]  ;;  %v3204_v3 = vld [vmem:[#allocation5 + $0x174] sm:$0xf0] }
  0x22   :  { %460 = vmatpush.bf16.msra.mxu3 %v2635_v53  ;;  %v2675_v50 = vor.u32 %v3205_v49, %v2674_v48  ;;  %v2666_v24 = vld [vmem:[#allocation5 + $0x160] sm:$0xf] }
  0x23   :  { %595 = vmatpush.bf16.msrb.mxu0 %v2679_v32 }
  0x25   :  { %412 = vmatpush.bf16.msra.mxu2 %v2599_v60 }
  0x26   :  { %2569 = vmatmul.msk.bf16.gmra.mxu0 %vm108_vm0, %v3529_v17  ;;  %461 = vmatpush.bf16.msra.mxu3 %v2631_v62 }
  0x27   :  { %2577 = vmatmul.msk.bf16.gmra.mxu1 %vm108_vm0, %v3529_v17  ;;  %596 = vmatpush.bf16.msrb.mxu0 %v2675_v50 }
  0x29   :  { %413 = vmatpush.bf16.msra.mxu2 %v2595_v1 }
  0x2a   :  { %462 = vmatpush.bf16.msra.mxu3 %v2627_v4  ;;  %v2671_v4 = vor.u32 %v3204_v3, %v2670_v2 }
  0x2c   :  { %597 = vmatpush.bf16.msrb.mxu0 %v2671_v4 }
  0x2d   :  { %414 = vmatpush.bf16.msra.mxu2 %v2591_v8 }
  0x2e   :  { %463 = vmatpush.bf16.msra.mxu3 %v2623_v10 }
  0x31   :  { %415 = vmatpush.bf16.msra.mxu2 %v2587_v15 }
  0x32   :  { %464 = vmatpush.bf16.msra.mxu3 %v2619_v21 }
  0x36   :  { %2570 = vmatmul.msk.bf16.gmra.mxu0 %vm108_vm0, %v3541_v20 }
  0x37   :  { %2578 = vmatmul.msk.bf16.gmra.mxu1 %vm108_vm0, %v3541_v20 }
  0x46   :  { %2571 = vmatmul.msk.bf16.gmra.mxu0 %vm108_vm0, %v3553_v23 }
  0x47   :  { %2579 = vmatmul.msk.bf16.gmra.mxu1 %vm108_vm0, %v3553_v23 }
  0x56   :  { %2572 = vmatmul.msk.bf16.gmra.mxu0 %vm108_vm0, %v3565_v26 }
  0x57   :  { %2580 = vmatmul.msk.bf16.gmra.mxu1 %vm108_vm0, %v3565_v26 }
  0x66   :  { %2573 = vmatmul.msk.bf16.gmra.mxu0 %vm108_vm0, %v3577_v35 }
  0x67   :  { %2581 = vmatmul.msk.bf16.gmra.mxu1 %vm108_vm0, %v3577_v35 }
  0x76   :  { %2574 = vmatmul.msk.bf16.gmra.mxu0 %vm108_vm0, %v3589_v59 }
  0x77   :  { %2582 = vmatmul.msk.bf16.gmra.mxu1 %vm108_vm0, %v3589_v59 }
  0x86   :  { %2575 = vmatmul.msk.bf16.gmra.mxu0 %vm108_vm0, %v3601_v22 }
  0x87   :  { %2583 = vmatmul.msk.bf16.gmra.mxu1 %vm108_vm0, %v3601_v22 }
  0x93   :  { %v142_v25 = vpop.f32.mrf.mxu0 }
  0x94   :  { %v191_v27 = vpop.f32.mrf.mxu1  ;;  %v143_v33 = vadd.f32 %v142_v25, %v3610_v28  ;;  %v3203_v25 = vld [vmem:[#allocation5 + $0x164] sm:$0xf0] }
  0x95   :  { %v192_v34 = vadd.f32 %v191_v27, %v3612_v29  ;;  %v2667_v27 = vor.u32 %v3203_v25, %v2666_v24 }
  0x96   :  { %v231_v40 = vmax.f32 %v143_v33, 0.0 }
  0x97   :  { %v232_v42 = vmax.f32 %v192_v34, 0.0  ;;  %598 = vmatpush.bf16.msrb.mxu0 %v2667_v27 }
  0x9b   :  { %v144_v36 = vpop.f32.mrf.mxu0 }
  0x9c   :  { %v145_v37 = vadd.f32 %v144_v36, %v3610_v28  ;;  %v193_v38 = vpop.f32.mrf.mxu1 }
  0x9d   :  { %v194_v39 = vadd.f32 %v193_v38, %v3612_v29 }
  0x9e   :  { %v233_v41 = vmax.f32 %v145_v37, 0.0 }
  0x9f   :  { %v234_v43 = vmax.f32 %v194_v39, 0.0 }
  0xa0   :  { %v263_v44 = vpack.c.bf16 %v233_v41, %v231_v40 }
  0xa1   :  { %v264_v45 = vpack.c.bf16 %v234_v43, %v232_v42 }
  0xa2   :  { %416 = vmatmul.bf16.vlgmr.msra.gmra.mxu2 %v263_v44 }
  0xa3   :  { %465 = vmatmul.bf16.vlgmr.msra.gmra.mxu3 %v264_v45  ;;  %v147_v46 = vpop.f32.mrf.mxu0  ;;  %v2662_v45 = vld [vmem:[#allocation5 + $0x150] sm:$0xf] }
  0xa4   :  { %v196_v47 = vpop.f32.mrf.mxu1  ;;  %v148_v51 = vadd.f32 %v147_v46, %v3610_v28  ;;  %v3202_v46 = vld [vmem:[#allocation5 + $0x154] sm:$0xf0] }
  0xa5   :  { %v197_v52 = vadd.f32 %v196_v47, %v3612_v29  ;;  %v2663_v47 = vor.u32 %v3202_v46, %v2662_v45 }
  0xa6   :  { %v235_v57 = vmax.f32 %v148_v51, 0.0 }
  0xa7   :  { %v236_v60 = vmax.f32 %v197_v52, 0.0  ;;  %599 = vmatpush.bf16.msrb.mxu0 %v2663_v47 }
  0xab   :  { %v149_v53 = vpop.f32.mrf.mxu0 }
  0xac   :  { %v150_v54 = vadd.f32 %v149_v53, %v3610_v28  ;;  %v198_v55 = vpop.f32.mrf.mxu1 }
  0xad   :  { %v199_v56 = vadd.f32 %v198_v55, %v3612_v29 }
  0xae   :  { %v237_v58 = vmax.f32 %v150_v54, 0.0 }
  0xaf   :  { %v238_v61 = vmax.f32 %v199_v56, 0.0 }
  0xb0   :  { %v265_v62 = vpack.c.bf16 %v237_v58, %v235_v57 }
  0xb1   :  { %v266_v63 = vpack.c.bf16 %v238_v61, %v236_v60 }
  0xb2   :  { %421 = vmatmul.bf16.gmra.mxu2 %v265_v62 }
  0xb3   :  { %470 = vmatmul.bf16.gmra.mxu3 %v266_v63  ;;  %v152_v0 = vpop.f32.mrf.mxu0  ;;  %v2658_v63 = vld [vmem:[#allocation5 + $0x140] sm:$0xf] }
  0xb4   :  { %v201_v1 = vpop.f32.mrf.mxu1  ;;  %v153_v5 = vadd.f32 %v152_v0, %v3610_v28  ;;  %v3201_v0 = vld [vmem:[#allocation5 + $0x144] sm:$0xf0] }
  0xb5   :  { %v202_v6 = vadd.f32 %v201_v1, %v3612_v29  ;;  %v2659_v1 = vor.u32 %v3201_v0, %v2658_v63 }
  0xb6   :  { %v239_v11 = vmax.f32 %v153_v5, 0.0 }
  0xb7   :  { %v240_v13 = vmax.f32 %v202_v6, 0.0  ;;  %600 = vmatpush.bf16.msrb.mxu0 %v2659_v1 }
  0xbb   :  { %v154_v7 = vpop.f32.mrf.mxu0 }
  0xbc   :  { %v155_v8 = vadd.f32 %v154_v7, %v3610_v28  ;;  %v203_v9 = vpop.f32.mrf.mxu1 }
  0xbd   :  { %v204_v10 = vadd.f32 %v203_v9, %v3612_v29 }
  0xbe   :  { %v241_v12 = vmax.f32 %v155_v8, 0.0 }
  0xbf   :  { %v242_v15 = vmax.f32 %v204_v10, 0.0 }
  0xc0   :  { %v267_v16 = vpack.c.bf16 %v241_v12, %v239_v11 }
  0xc1   :  { %v268_v18 = vpack.c.bf16 %v242_v15, %v240_v13 }
  0xc2   :  { %426 = vmatmul.bf16.gmra.mxu2 %v267_v16  ;;  %v2654_v16 = vld [vmem:[#allocation5 + $0x130] sm:$0xf] }
  0xc3   :  { %475 = vmatmul.bf16.gmra.mxu3 %v268_v18  ;;  %v157_v19 = vpop.f32.mrf.mxu0  ;;  %v3200_v18 = vld [vmem:[#allocation5 + $0x134] sm:$0xf0] }
  0xc4   :  { %v206_v21 = vpop.f32.mrf.mxu1  ;;  %v158_v30 = vadd.f32 %v157_v19, %v3610_v28 }
  0xc5   :  { %v207_v31 = vadd.f32 %v206_v21, %v3612_v29  ;;  %v2655_v21 = vor.u32 %v3200_v18, %v2654_v16 }
  0xc6   :  { %v243_v37 = vmax.f32 %v158_v30, 0.0 }
  0xc7   :  { %v244_v39 = vmax.f32 %v207_v31, 0.0  ;;  %601 = vmatpush.bf16.msrb.mxu0 %v2655_v21 }
  0xcb   :  { %v159_v32 = vpop.f32.mrf.mxu0 }
  0xcc   :  { %v160_v33 = vadd.f32 %v159_v32, %v3610_v28  ;;  %v208_v34 = vpop.f32.mrf.mxu1 }
  0xcd   :  { %v209_v36 = vadd.f32 %v208_v34, %v3612_v29 }
  0xce   :  { %v245_v38 = vmax.f32 %v160_v33, 0.0 }
  0xcf   :  { %v246_v40 = vmax.f32 %v209_v36, 0.0 }
  0xd0   :  { %v269_v41 = vpack.c.bf16 %v245_v38, %v243_v37 }
  0xd1   :  { %v270_v42 = vpack.c.bf16 %v246_v40, %v244_v39 }
  0xd2   :  { %431 = vmatmul.bf16.gmra.mxu2 %v269_v41 }
  0xd3   :  { %480 = vmatmul.bf16.gmra.mxu3 %v270_v42  ;;  %v162_v43 = vpop.f32.mrf.mxu0 }
  0xd4   :  { %v211_v44 = vpop.f32.mrf.mxu1  ;;  %v163_v48 = vadd.f32 %v162_v43, %v3610_v28  ;;  %v2650_v43 = vld [vmem:[#allocation5 + $0x120] sm:$0xf] }
  0xd5   :  { %v212_v49 = vadd.f32 %v211_v44, %v3612_v29  ;;  %v3199_v44 = vld [vmem:[#allocation5 + $0x124] sm:$0xf0] }
  0xd6   :  { %v247_v54 = vmax.f32 %v163_v48, 0.0  ;;  %v2651_v47 = vor.u32 %v3199_v44, %v2650_v43  ;;  %v2698_v43 = vld [vmem:[#allocation5 + $0x1e0] sm:$0xf]  ;;  %v3211_v44 = vld [vmem:[#allocation5 + $0x1e4] sm:$0xf0] }
  0xd7   :  { %v248_v56 = vmax.f32 %v212_v49, 0.0 }
  0xd8   :  { %602 = vmatpush.bf16.msrb.mxu0 %v2651_v47 }
  0xdb   :  { %v164_v50 = vpop.f32.mrf.mxu0 }
  0xdc   :  { %v165_v51 = vadd.f32 %v164_v50, %v3610_v28  ;;  %v213_v52 = vpop.f32.mrf.mxu1 }
  0xdd   :  { %v214_v53 = vadd.f32 %v213_v52, %v3612_v29 }
  0xde   :  { %v249_v55 = vmax.f32 %v165_v51, 0.0 }
  0xdf   :  { %v250_v57 = vmax.f32 %v214_v53, 0.0 }
  0xe0   :  { %v271_v58 = vpack.c.bf16 %v249_v55, %v247_v54 }
  0xe1   :  { %v272_v60 = vpack.c.bf16 %v250_v57, %v248_v56  ;;  %v2710_v57 = vld [vmem:[#allocation5 + $0x210] sm:$0xf] }
  0xe2   :  { %436 = vmatmul.bf16.gmra.mxu2 %v271_v58  ;;  %v3214_v58 = vld [vmem:[#allocation5 + $0x214] sm:$0xf0] }
  0xe3   :  { %485 = vmatmul.bf16.gmra.mxu3 %v272_v60  ;;  %v167_v61 = vpop.f32.mrf.mxu0  ;;  %v2711_v60 = vor.u32 %v3214_v58, %v2710_v57  ;;  %v2694_v57 = vld [vmem:[#allocation5 + $0x1d0] sm:$0xf]  ;;  %v3210_v58 = vld [vmem:[#allocation5 + $0x1d4] sm:$0xf0] }
  0xe4   :  { %v216_v62 = vpop.f32.mrf.mxu1  ;;  %v168_v2 = vadd.f32 %v167_v61, %v3610_v28 }
  0xe5   :  { %v217_v3 = vadd.f32 %v216_v62, %v3612_v29  ;;  %733 = vmatpush.bf16.msrb.mxu1 %v2711_v60  ;;  %v2695_v60 = vor.u32 %v3210_v58, %v2694_v57 }
  0xe6   :  { %v251_v8 = vmax.f32 %v168_v2, 0.0 }
  0xe7   :  { %v252_v10 = vmax.f32 %v217_v3, 0.0 }
  0xeb   :  { %v169_v4 = vpop.f32.mrf.mxu0 }
  0xec   :  { %v170_v5 = vadd.f32 %v169_v4, %v3610_v28  ;;  %v218_v6 = vpop.f32.mrf.mxu1 }
  0xed   :  { %v219_v7 = vadd.f32 %v218_v6, %v3612_v29  ;;  %v2706_v6 = vld [vmem:[#allocation5 + $0x200] sm:$0xf] }
  0xee   :  { %v253_v9 = vmax.f32 %v170_v5, 0.0 }
  0xef   :  { %v254_v11 = vmax.f32 %v219_v7, 0.0  ;;  %v3213_v7 = vld [vmem:[#allocation5 + $0x204] sm:$0xf0] }
  0xf0   :  { %v273_v12 = vpack.c.bf16 %v253_v9, %v251_v8  ;;  %v2707_v8 = vor.u32 %v3213_v7, %v2706_v6  ;;  %v2690_v7 = vld [vmem:[#allocation5 + $0x1c0] sm:$0xf] }
  0xf1   :  { %v274_v13 = vpack.c.bf16 %v254_v11, %v252_v10 }
  0xf2   :  { %441 = vmatmul.bf16.gmra.mxu2 %v273_v12  ;;  %734 = vmatpush.bf16.msrb.mxu1 %v2707_v8  ;;  %v3209_v8 = vld [vmem:[#allocation5 + $0x1c4] sm:$0xf0] }
  0xf3   :  { %490 = vmatmul.bf16.gmra.mxu3 %v274_v13  ;;  %v172_v15 = vpop.f32.mrf.mxu0 }
  0xf4   :  { %v221_v19 = vpop.f32.mrf.mxu1  ;;  %v173_v24 = vadd.f32 %v172_v15, %v3610_v28 }
  0xf5   :  { %v222_v25 = vadd.f32 %v221_v19, %v3612_v29 }
  0xf6   :  { %v255_v33 = vmax.f32 %v173_v24, 0.0 }
  0xf7   :  { %v256_v36 = vmax.f32 %v222_v25, 0.0  ;;  %v2702_v25 = vld [vmem:[#allocation5 + $0x1f0] sm:$0xf] }
  0xfb   :  { %v174_v27 = vpop.f32.mrf.mxu0 }
  0xfc   :  { %v175_v30 = vadd.f32 %v174_v27, %v3610_v28  ;;  %v223_v31 = vpop.f32.mrf.mxu1  ;;  %v3212_v27 = vld [vmem:[#allocation5 + $0x1f4] sm:$0xf0] }
  0xfd   :  { %v224_v32 = vadd.f32 %v223_v31, %v3612_v29 }
  0xfe   :  { %v257_v34 = vmax.f32 %v175_v30, 0.0  ;;  %v2703_v30 = vor.u32 %v3212_v27, %v2702_v25  ;;  %v2686_v27 = vld [vmem:[#allocation5 + $0x1b0] sm:$0xf] }
  0xff   :  { %v258_v37 = vmax.f32 %v224_v32, 0.0 }
 0x100   :  { %v275_v38 = vpack.c.bf16 %v257_v34, %v255_v33  ;;  %735 = vmatpush.bf16.msrb.mxu1 %v2703_v30  ;;  %v3208_v30 = vld [vmem:[#allocation5 + $0x1b4] sm:$0xf0] }
 0x101   :  { %v276_v39 = vpack.c.bf16 %v258_v37, %v256_v36 }
 0x102   :  { %446 = vmatmul.bf16.gmra.mxu2 %v275_v38 }
 0x103   :  { %495 = vmatmul.bf16.gmra.mxu3 %v276_v39  ;;  %v177_v40 = vpop.f32.mrf.mxu0 }
 0x104   :  { %v226_v41 = vpop.f32.mrf.mxu1  ;;  %v178_v42 = vadd.f32 %v177_v40, %v3610_v28 }
 0x105   :  { %v227_v45 = vadd.f32 %v226_v41, %v3612_v29 }
 0x106   :  { %v259_v51 = vmax.f32 %v178_v42, 0.0 }
 0x107   :  { %v260_v53 = vmax.f32 %v227_v45, 0.0  ;;  %v2699_v45 = vor.u32 %v3211_v44, %v2698_v43 }
 0x109   :  { %736 = vmatpush.bf16.msrb.mxu1 %v2699_v45 }
 0x10b   :  { %v179_v46 = vpop.f32.mrf.mxu0 }
 0x10c   :  { %v180_v48 = vadd.f32 %v179_v46, %v3610_v28  ;;  %v228_v49 = vpop.f32.mrf.mxu1  ;;  %v3649_v28 = vld [vmem:[%s3980_s4 + $0x1] ss:$0 sm:$0xff] }
 0x10d   :  { %v229_v50 = vadd.f32 %v228_v49, %v3612_v29  ;;  %737 = vmatpush.bf16.msrb.mxu1 %v2695_v60 }
 0x10e   :  { %v261_v52 = vmax.f32 %v180_v48, 0.0 }
 0x10f   :  { %v262_v54 = vmax.f32 %v229_v50, 0.0 }
 0x110   :  { %v277_v55 = vpack.c.bf16 %v261_v52, %v259_v51 }
 0x111   :  { %v278_v56 = vpack.c.bf16 %v262_v54, %v260_v53 }
 0x112   :  { %451 = vmatmul.bf16.gmra.mxu2 %v277_v55 }
 0x113   :  { %500 = vmatmul.bf16.gmra.mxu3 %v278_v56 }
 0x125   :  { %v417_v61 = vpop.f32.mrf.mxu2 }
 0x126   :  { %v466_v62 = vpop.f32.mrf.mxu3  ;;  %v418_v29 = vadd.f32 %v417_v61, %v3649_v28 }
 0x128   :  { %v467_v0 = vadd.f32 %v466_v62, %v418_v29 }
 0x12a   :  { %v506_v4 = vmax.f32 %v467_v0, 0.0 }
 0x12d   :  { %v419_v63 = vpop.f32.mrf.mxu2 }
 0x12e   :  { %v420_v1 = vadd.f32 %v419_v63, %v3649_v28  ;;  %v468_v2 = vpop.f32.mrf.mxu3 }
 0x130   :  { %v469_v3 = vadd.f32 %v468_v2, %v420_v1 }
 0x132   :  { %v507_v5 = vmax.f32 %v469_v3, 0.0 }
 0x134   :  { %v522_v9 = vpack.c.bf16 %v507_v5, %v506_v4 }
 0x135   :  { %v422_v10 = vpop.f32.mrf.mxu2 }
 0x136   :  { %v471_v11 = vpop.f32.mrf.mxu3  ;;  %603 = vmatmul.bf16.vlgmr.msrb.gmra.mxu0 %v522_v9  ;;  %v423_v12 = vadd.f32 %v422_v10, %v3649_v28  ;;  %v2691_v9 = vor.u32 %v3209_v8, %v2690_v7 }
 0x138   :  { %v472_v15 = vadd.f32 %v471_v11, %v423_v12  ;;  %738 = vmatpush.bf16.msrb.mxu1 %v2691_v9 }
 0x13a   :  { %v508_v21 = vmax.f32 %v472_v15, 0.0 }
 0x13d   :  { %v424_v13 = vpop.f32.mrf.mxu2 }
 0x13e   :  { %v425_v16 = vadd.f32 %v424_v13, %v3649_v28  ;;  %v473_v18 = vpop.f32.mrf.mxu3 }
 0x140   :  { %v474_v19 = vadd.f32 %v473_v18, %v425_v16 }
 0x142   :  { %v509_v24 = vmax.f32 %v474_v19, 0.0 }
 0x144   :  { %v523_v31 = vpack.c.bf16 %v509_v24, %v508_v21 }
 0x145   :  { %v427_v32 = vpop.f32.mrf.mxu2 }
 0x146   :  { %v476_v33 = vpop.f32.mrf.mxu3  ;;  %608 = vmatmul.bf16.gmra.mxu0 %v523_v31  ;;  %v428_v34 = vadd.f32 %v427_v32, %v3649_v28  ;;  %v2687_v31 = vor.u32 %v3208_v30, %v2686_v27 }
 0x148   :  { %v477_v37 = vadd.f32 %v476_v33, %v428_v34  ;;  %739 = vmatpush.bf16.msrb.mxu1 %v2687_v31 }
 0x14a   :  { %v510_v41 = vmax.f32 %v477_v37, 0.0  ;;  %v3207_v37 = vld [vmem:[#allocation5 + $0x1a4] sm:$0xf0] }
 0x14d   :  { %v429_v36 = vpop.f32.mrf.mxu2 }
 0x14e   :  { %v430_v38 = vadd.f32 %v429_v36, %v3649_v28  ;;  %v478_v39 = vpop.f32.mrf.mxu3  ;;  %v2682_v36 = vld [vmem:[#allocation5 + $0x1a0] sm:$0xf] }
 0x150   :  { %v479_v40 = vadd.f32 %v478_v39, %v430_v38  ;;  %v2683_v38 = vor.u32 %v3207_v37, %v2682_v36 }
 0x152   :  { %v511_v42 = vmax.f32 %v479_v40, 0.0  ;;  %740 = vmatpush.bf16.msrb.mxu1 %v2683_v38 }
 0x154   :  { %v524_v46 = vpack.c.bf16 %v511_v42, %v510_v41 }
 0x155   :  { %v432_v47 = vpop.f32.mrf.mxu2 }
 0x156   :  { %v481_v48 = vpop.f32.mrf.mxu3  ;;  %613 = vmatmul.bf16.gmra.mxu0 %v524_v46  ;;  %v433_v49 = vadd.f32 %v432_v47, %v3649_v28 }
 0x158   :  { %v482_v51 = vadd.f32 %v481_v48, %v433_v49 }
 0x15a   :  { %v512_v55 = vmax.f32 %v482_v51, 0.0 }
 0x15d   :  { %v434_v50 = vpop.f32.mrf.mxu2 }
 0x15e   :  { %v435_v52 = vadd.f32 %v434_v50, %v3649_v28  ;;  %v483_v53 = vpop.f32.mrf.mxu3 }
 0x160   :  { %v484_v54 = vadd.f32 %v483_v53, %v435_v52 }
 0x162   :  { %v513_v56 = vmax.f32 %v484_v54, 0.0 }
 0x164   :  { %v525_v61 = vpack.c.bf16 %v513_v56, %v512_v55 }
 0x165   :  { %v437_v62 = vpop.f32.mrf.mxu2 }
 0x166   :  { %v486_v29 = vpop.f32.mrf.mxu3  ;;  %618 = vmatmul.bf16.gmra.mxu0 %v525_v61  ;;  %v438_v63 = vadd.f32 %v437_v62, %v3649_v28  ;;  %v546_v61 = vld [vmem:[%s3980_s4 + $0x2] ss:$0 sm:$0xff] }
 0x168   :  { %v487_v1 = vadd.f32 %v486_v29, %v438_v63 }
 0x16a   :  { %v514_v5 = vmax.f32 %v487_v1, 0.0 }
 0x16d   :  { %v439_v0 = vpop.f32.mrf.mxu2 }
 0x16e   :  { %v440_v2 = vadd.f32 %v439_v0, %v3649_v28  ;;  %v488_v3 = vpop.f32.mrf.mxu3 }
 0x170   :  { %v489_v4 = vadd.f32 %v488_v3, %v440_v2 }
 0x172   :  { %v515_v6 = vmax.f32 %v489_v4, 0.0 }
 0x174   :  { %v526_v10 = vpack.c.bf16 %v515_v6, %v514_v5 }
 0x175   :  { %v442_v11 = vpop.f32.mrf.mxu2 }
 0x176   :  { %v491_v12 = vpop.f32.mrf.mxu3  ;;  %623 = vmatmul.bf16.gmra.mxu0 %v526_v10  ;;  %v443_v13 = vadd.f32 %v442_v11, %v3649_v28 }
 0x178   :  { %v492_v16 = vadd.f32 %v491_v12, %v443_v13 }
 0x17a   :  { %v516_v24 = vmax.f32 %v492_v16, 0.0 }
 0x17d   :  { %v444_v15 = vpop.f32.mrf.mxu2 }
 0x17e   :  { %v445_v18 = vadd.f32 %v444_v15, %v3649_v28  ;;  %v493_v19 = vpop.f32.mrf.mxu3 }
 0x180   :  { %v494_v21 = vadd.f32 %v493_v19, %v445_v18 }
 0x182   :  { %v517_v25 = vmax.f32 %v494_v21, 0.0 }
 0x184   :  { %v527_v32 = vpack.c.bf16 %v517_v25, %v516_v24 }
 0x185   :  { %v447_v33 = vpop.f32.mrf.mxu2 }
 0x186   :  { %v496_v34 = vpop.f32.mrf.mxu3  ;;  %628 = vmatmul.bf16.gmra.mxu0 %v527_v32  ;;  %v448_v39 = vadd.f32 %v447_v33, %v3649_v28 }
 0x188   :  { %v497_v41 = vadd.f32 %v496_v34, %v448_v39 }
 0x18a   :  { %v518_v45 = vmax.f32 %v497_v41, 0.0 }
 0x18d   :  { %v449_v40 = vpop.f32.mrf.mxu2 }
 0x18e   :  { %v450_v42 = vadd.f32 %v449_v40, %v3649_v28  ;;  %v498_v43 = vpop.f32.mrf.mxu3 }
 0x190   :  { %v499_v44 = vadd.f32 %v498_v43, %v450_v42 }
 0x192   :  { %v519_v46 = vmax.f32 %v499_v44, 0.0 }
 0x194   :  { %v528_v47 = vpack.c.bf16 %v519_v46, %v518_v45 }
 0x195   :  { %v452_v48 = vpop.f32.mrf.mxu2 }
 0x196   :  { %v501_v49 = vpop.f32.mrf.mxu3  ;;  %633 = vmatmul.bf16.gmra.mxu0 %v528_v47  ;;  %v453_v50 = vadd.f32 %v452_v48, %v3649_v28 }
 0x198   :  { %v502_v52 = vadd.f32 %v501_v49, %v453_v50 }
 0x19a   :  { %v520_v56 = vmax.f32 %v502_v52, 0.0 }
 0x19d   :  { %v454_v51 = vpop.f32.mrf.mxu2 }
 0x19e   :  { %v455_v53 = vadd.f32 %v454_v51, %v3649_v28  ;;  %v503_v54 = vpop.f32.mrf.mxu3 }
 0x1a0   :  { %v504_v55 = vadd.f32 %v503_v54, %v455_v53 }
 0x1a2   :  { %v521_v57 = vmax.f32 %v504_v55, 0.0 }
 0x1a4   :  { %v529_v58 = vpack.c.bf16 %v521_v57, %v520_v56 }
 0x1a6   :  { %638 = vmatmul.bf16.gmra.mxu0 %v529_v58 }
 0x1b3   :  { %v604_v60 = vpop.f32.mrf.mxu0 }
 0x1b4   :  { %v605_v62 = vadd.f32 %v604_v60, %v546_v61 }
 0x1b6   :  { %v644_v0 = vmax.f32 %v605_v62, 0.0  ;;  %v2786_v62 = vld [vmem:[#allocation5 + $0x2b0] sm:$0xf] }
 0x1bb   :  { %v606_v29 = vpop.f32.mrf.mxu0 }
 0x1bc   :  { %v607_v63 = vadd.f32 %v606_v29, %v546_v61  ;;  %v3234_v29 = vld [vmem:[#allocation5 + $0x2b4] sm:$0xf0] }
 0x1be   :  { %v645_v1 = vmax.f32 %v607_v63, 0.0  ;;  %v3233_v63 = vld [vmem:[#allocation5 + $0x2b4] sm:$0xf] }
 0x1c0   :  { %v660_v2 = vpack.c.bf16 %v645_v1, %v644_v0  ;;  %v2787_v0 = vor.u32 %v3234_v29, %v2786_v62  ;;  %v2788_v1 = vld [vmem:[#allocation5 + $0x2b8] sm:$0xf0]  ;;  %v3227_v29 = vld [vmem:[#allocation5 + $0x284] sm:$0xf] }
 0x1c2   :  { %741 = vmatmul.bf16.vlgmr.msrb.gmra.mxu1 %v660_v2  ;;  %v2791_v2 = vor.u32 %v3233_v63, %v2788_v1  ;;  %1052 = vmatpush.bf16.msrb.mxu2 %v2787_v0  ;;  %v2764_v63 = vld [vmem:[#allocation5 + $0x288] sm:$0xf0] }
 0x1c3   :  { %v609_v3 = vpop.f32.mrf.mxu0  ;;  %v2767_v1 = vor.u32 %v3227_v29, %v2764_v63  ;;  %v807_v63 = vld [vmem:[%s3977_s1 + $0x48] sm:$0xff] }
 0x1c4   :  { %v610_v28 = vadd.f32 %v609_v3, %v546_v61  ;;  %1101 = vmatpush.bf16.msrb.mxu3 %v2791_v2  ;;  %v2834_v3 = vld [vmem:[#allocation5 + $0x230] sm:$0xf]  ;;  %v802_v2 = vld [vmem:[%s3977_s1 + $0x20] sm:$0xff] }
 0x1c6   :  { %v646_v6 = vmax.f32 %v610_v28, 0.0  ;;  %v3218_v28 = vld [vmem:[#allocation5 + $0x234] sm:$0xf0] }
 0x1cb   :  { %v611_v4 = vpop.f32.mrf.mxu0 }
 0x1cc   :  { %v612_v5 = vadd.f32 %v611_v4, %v546_v61  ;;  %v3217_v4 = vld [vmem:[#allocation5 + $0x234] sm:$0xf] }
 0x1ce   :  { %v647_v7 = vmax.f32 %v612_v5, 0.0  ;;  %v2835_v5 = vor.u32 %v3218_v28, %v2834_v3 }
 0x1d0   :  { %v661_v8 = vpack.c.bf16 %v647_v7, %v646_v6  ;;  %v2836_v6 = vld [vmem:[#allocation5 + $0x238] sm:$0xf0]  ;;  %1176 = vmatpush.bf16.msra.mxu0 %v2835_v5  ;;  %v834_v5 = vld [vmem:[#allocation2 + $0x20] sm:$0xff] }
 0x1d1   :  { %v2839_v7 = vor.u32 %v3217_v4, %v2836_v6 }
 0x1d2   :  { %746 = vmatmul.bf16.gmra.mxu1 %v661_v8 }
 0x1d3   :  { %v614_v9 = vpop.f32.mrf.mxu0  ;;  %1225 = vmatpush.bf16.msra.mxu1 %v2839_v7 }
 0x1d4   :  { %v615_v10 = vadd.f32 %v614_v9, %v546_v61 }
 0x1d6   :  { %v648_v13 = vmax.f32 %v615_v10, 0.0  ;;  %v2778_v10 = vld [vmem:[#allocation5 + $0x2a0] sm:$0xf] }
 0x1db   :  { %v616_v11 = vpop.f32.mrf.mxu0 }
 0x1dc   :  { %v617_v12 = vadd.f32 %v616_v11, %v546_v61  ;;  %v3232_v11 = vld [vmem:[#allocation5 + $0x2a4] sm:$0xf0] }
 0x1de   :  { %v649_v15 = vmax.f32 %v617_v12, 0.0  ;;  %v3231_v12 = vld [vmem:[#allocation5 + $0x2a4] sm:$0xf] }
 0x1e0   :  { %v662_v16 = vpack.c.bf16 %v649_v15, %v648_v13  ;;  %v2779_v13 = vor.u32 %v3232_v11, %v2778_v10  ;;  %v2780_v15 = vld [vmem:[#allocation5 + $0x2a8] sm:$0xf0] }
 0x1e2   :  { %751 = vmatmul.bf16.gmra.mxu1 %v662_v16  ;;  %v2783_v16 = vor.u32 %v3231_v12, %v2780_v15  ;;  %1053 = vmatpush.bf16.msrb.mxu2 %v2779_v13  ;;  %v835_v12 = vld [vmem:[#allocation2 + $0x28] sm:$0xff]  ;;  %v2754_v15 = vld [vmem:[#allocation5 + $0x270] sm:$0xf] }
 0x1e3   :  { %v619_v18 = vpop.f32.mrf.mxu0 }
 0x1e4   :  { %v620_v19 = vadd.f32 %v619_v18, %v546_v61  ;;  %1102 = vmatpush.bf16.msrb.mxu3 %v2783_v16  ;;  %v798_v18 = vld [vmem:[%s3977_s1] sm:$0xff]  ;;  %v3226_v16 = vld [vmem:[#allocation5 + $0x274] sm:$0xf0] }
 0x1e6   :  { %v650_v25 = vmax.f32 %v620_v19, 0.0 }
 0x1eb   :  { %v621_v21 = vpop.f32.mrf.mxu0 }
 0x1ec   :  { %v622_v24 = vadd.f32 %v621_v21, %v546_v61 }
 0x1ee   :  { %v651_v27 = vmax.f32 %v622_v24, 0.0 }
 0x1f0   :  { %v663_v30 = vpack.c.bf16 %v651_v27, %v650_v25  ;;  %v830_v25 = vld [vmem:[#allocation2] sm:$0xff] }
 0x1f2   :  { %756 = vmatmul.bf16.gmra.mxu1 %v663_v30 }
 0x1f3   :  { %v624_v31 = vpop.f32.mrf.mxu0 }
 0x1f4   :  { %v625_v32 = vadd.f32 %v624_v31, %v546_v61  ;;  %v799_v31 = vld [vmem:[%s3977_s1 + $0x8] sm:$0xff] }
 0x1f6   :  { %v652_v36 = vmax.f32 %v625_v32, 0.0 }
 0x1fb   :  { %v626_v33 = vpop.f32.mrf.mxu0 }
 0x1fc   :  { %v627_v34 = vadd.f32 %v626_v33, %v546_v61 }
 0x1fe   :  { %v653_v37 = vmax.f32 %v627_v34, 0.0 }
 0x200   :  { %v664_v38 = vpack.c.bf16 %v653_v37, %v652_v36  ;;  %v831_v36 = vld [vmem:[#allocation2 + $0x8] sm:$0xff] }
 0x202   :  { %761 = vmatmul.bf16.gmra.mxu1 %v664_v38  ;;  %v2770_v38 = vld [vmem:[#allocation5 + $0x290] sm:$0xf] }
 0x203   :  { %v629_v39 = vpop.f32.mrf.mxu0 }
 0x204   :  { %v630_v40 = vadd.f32 %v629_v39, %v546_v61  ;;  %v3230_v39 = vld [vmem:[#allocation5 + $0x294] sm:$0xf0] }
 0x206   :  { %v654_v43 = vmax.f32 %v630_v40, 0.0  ;;  %v2771_v40 = vor.u32 %v3230_v39, %v2770_v38  ;;  %v3215_v39 = vld [vmem:[#allocation5 + $0x224] sm:$0xf] }
 0x208   :  { %1054 = vmatpush.bf16.msrb.mxu2 %v2771_v40  ;;  %v2828_v40 = vld [vmem:[#allocation5 + $0x228] sm:$0xf0] }
 0x20b   :  { %v631_v41 = vpop.f32.mrf.mxu0 }
 0x20c   :  { %v632_v42 = vadd.f32 %v631_v41, %v546_v61  ;;  %v3229_v41 = vld [vmem:[#allocation5 + $0x294] sm:$0xf] }
 0x20e   :  { %v655_v44 = vmax.f32 %v632_v42, 0.0  ;;  %v2772_v42 = vld [vmem:[#allocation5 + $0x298] sm:$0xf0] }
 0x210   :  { %v665_v45 = vpack.c.bf16 %v655_v44, %v654_v43  ;;  %v2775_v44 = vor.u32 %v3229_v41, %v2772_v42  ;;  %v2831_v42 = vor.u32 %v3215_v39, %v2828_v40  ;;  %v810_v39 = vld [vmem:[%s3977_s1 + $0x60] sm:$0xff] }
 0x212   :  { %766 = vmatmul.bf16.gmra.mxu1 %v665_v45  ;;  %1103 = vmatpush.bf16.msrb.mxu3 %v2775_v44  ;;  %v800_v45 = vld [vmem:[%s3977_s1 + $0x10] sm:$0xff] }
 0x213   :  { %v634_v46 = vpop.f32.mrf.mxu0  ;;  %1226 = vmatpush.bf16.msra.mxu1 %v2831_v42  ;;  %v842_v42 = vld [vmem:[#allocation2 + $0x60] sm:$0xff] }
 0x214   :  { %v635_v47 = vadd.f32 %v634_v46, %v546_v61 }
 0x216   :  { %v656_v50 = vmax.f32 %v635_v47, 0.0  ;;  %1104 = vmatpush.bf16.msrb.mxu3 %v2767_v1 }
 0x21b   :  { %v636_v48 = vpop.f32.mrf.mxu0 }
 0x21c   :  { %v637_v49 = vadd.f32 %v636_v48, %v546_v61 }
 0x21e   :  { %v657_v51 = vmax.f32 %v637_v49, 0.0  ;;  %v832_v49 = vld [vmem:[#allocation2 + $0x10] sm:$0xff] }
 0x220   :  { %v666_v52 = vpack.c.bf16 %v657_v51, %v656_v50 }
 0x222   :  { %771 = vmatmul.bf16.gmra.mxu1 %v666_v52  ;;  %v801_v52 = vld [vmem:[%s3977_s1 + $0x18] sm:$0xff] }
 0x223   :  { %v639_v53 = vpop.f32.mrf.mxu0 }
 0x224   :  { %v640_v54 = vadd.f32 %v639_v53, %v546_v61 }
 0x226   :  { %v658_v57 = vmax.f32 %v640_v54, 0.0 }
 0x22b   :  { %v641_v55 = vpop.f32.mrf.mxu0 }
 0x22c   :  { %v642_v56 = vadd.f32 %v641_v55, %v546_v61  ;;  %v3673_v61 = vld [vmem:[%s3980_s4 + $0x3] ss:$0 sm:$0xff] }
 0x22e   :  { %v659_v58 = vmax.f32 %v642_v56, 0.0  ;;  %v833_v56 = vld [vmem:[#allocation2 + $0x18] sm:$0xff] }
 0x230   :  { %v667_v60 = vpack.c.bf16 %v659_v58, %v658_v57  ;;  %v2762_v58 = vld [vmem:[#allocation5 + $0x280] sm:$0xf] }
 0x232   :  { %776 = vmatmul.bf16.gmra.mxu1 %v667_v60  ;;  %v3228_v60 = vld [vmem:[#allocation5 + $0x284] sm:$0xf0] }
 0x233   :  { %v2763_v62 = vor.u32 %v3228_v60, %v2762_v58  ;;  %v838_v60 = vld [vmem:[#allocation2 + $0x40] sm:$0xff] }
 0x235   :  { %1055 = vmatpush.bf16.msrb.mxu2 %v2763_v62 }
 0x23f   :  { %v742_v8 = vpop.f32.mrf.mxu1 }
 0x240   :  { %v743_v9 = vadd.f32 %v742_v8, %v3673_v61  ;;  %v803_v8 = vld [vmem:[%s3977_s1 + $0x28] sm:$0xff] }
 0x242   :  { %3324 = vtanh.f32 %v743_v9  ;;  %2848 = vmatmul.msk.bf16.vlgmr.msra.gmra.mxu1 %vm108_vm0, %v3517_v14 }
 0x247   :  { %v744_v19 = vpop.f32.mrf.mxu1 }
 0x248   :  { %v3325_v21 = vpop.eup %3324  ;;  %v745_v24 = vadd.f32 %v744_v19, %v3673_v61  ;;  %v3225_v19 = vld [vmem:[#allocation5 + $0x274] sm:$0xf] }
 0x249   :  { %2516 = vst [vmem:[#allocation7 + $0x10] sm:$0xff] %v3325_v21  ;;  %v814_v27 = vmul.f32 %v3325_v21, %v798_v18  ;;  %v2755_v18 = vor.u32 %v3226_v16, %v2754_v15  ;;  %v2756_v21 = vld [vmem:[#allocation5 + $0x278] sm:$0xf0]  ;;  %v840_v15 = vld [vmem:[#allocation2 + $0x50] sm:$0xff] }
 0x24a   :  { %3326 = vtanh.f32 %v745_v24 }
 0x24b   :  { %v846_v30 = vadd.f32 %v830_v25, %v814_v27  ;;  %v2759_v25 = vor.u32 %v3225_v19, %v2756_v21  ;;  %1056 = vmatpush.bf16.msrb.mxu2 %v2755_v18  ;;  %v804_v27 = vld [vmem:[%s3977_s1 + $0x30] sm:$0xff]  ;;  %v809_v19 = vld [vmem:[%s3977_s1 + $0x58] sm:$0xff] }
 0x24d   :  { %862 = vmax.index.xlane.f32.xlu0 %v846_v30  ;;  %1105 = vmatpush.bf16.msrb.mxu3 %v2759_v25 }
 0x24f   :  { %v747_v32 = vpop.f32.mrf.mxu1 }
 0x250   :  { %v3327_v33 = vpop.eup %3326  ;;  %v748_v34 = vadd.f32 %v747_v32, %v3673_v61 }
 0x251   :  { %2517 = vst [vmem:[#allocation7 + $0x28] sm:$0xff] %v3327_v33  ;;  %v815_v37 = vmul.f32 %v3327_v33, %v799_v31  ;;  %v836_v33 = vld [vmem:[#allocation2 + $0x30] sm:$0xff] }
 0x252   :  { %3328 = vtanh.f32 %v748_v34  ;;  %2849 = vmatmul.msk.bf16.gmra.mxu1 %vm108_vm0, %v3529_v17 }
 0x253   :  { %v847_v43 = vadd.f32 %v831_v36, %v815_v37  ;;  %v2826_v36 = vld [vmem:[#allocation5 + $0x220] sm:$0xf]  ;;  %v3216_v37 = vld [vmem:[#allocation5 + $0x224] sm:$0xf0] }
 0x254   :  { %v2827_v38 = vor.u32 %v3216_v37, %v2826_v36  ;;  %v2732_v36 = vld [vmem:[#allocation5 + $0x248] sm:$0xf0] }
 0x255   :  { %864 = vmax.index.xlane.f32.xlu0 %v847_v43  ;;  %v805_v43 = vld [vmem:[%s3977_s1 + $0x38] sm:$0xff] }
 0x256   :  { %1177 = vmatpush.bf16.msra.mxu0 %v2827_v38 }
 0x257   :  { %v749_v46 = vpop.f32.mrf.mxu1 }
 0x258   :  { %v3329_v47 = vpop.eup %3328  ;;  %v750_v48 = vadd.f32 %v749_v46, %v3673_v61 }
 0x259   :  { %2518 = vst [vmem:[#allocation7 + $0x40] sm:$0xff] %v3329_v47  ;;  %v816_v50 = vmul.f32 %v3329_v47, %v800_v45  ;;  %2840 = vmatmul.msk.bf16.vlgmr.msra.gmra.mxu0 %vm108_vm0, %v3517_v14  ;;  %v837_v47 = vld [vmem:[#allocation2 + $0x38] sm:$0xff] }
 0x25a   :  { %3330 = vtanh.f32 %v750_v48 }
 0x25b   :  { %v848_v51 = vadd.f32 %v832_v49, %v816_v50  ;;  %v2746_v49 = vld [vmem:[#allocation5 + $0x260] sm:$0xf]  ;;  %v3224_v50 = vld [vmem:[#allocation5 + $0x264] sm:$0xf0] }
 0x25d   :  { %866 = vmax.index.xlane.f32.xlu1 %v848_v51  ;;  %v2747_v51 = vor.u32 %v3224_v50, %v2746_v49  ;;  %v843_v49 = vld [vmem:[#allocation2 + $0x68] sm:$0xff] }
 0x25f   :  { %v752_v53 = vpop.f32.mrf.mxu1  ;;  %1057 = vmatpush.bf16.msrb.mxu2 %v2747_v51 }
 0x260   :  { %v3331_v54 = vpop.eup %3330  ;;  %v753_v55 = vadd.f32 %v752_v53, %v3673_v61  ;;  %v2748_v53 = vld [vmem:[#allocation5 + $0x268] sm:$0xf0] }
 0x261   :  { %2519 = vst [vmem:[#allocation7 + $0x58] sm:$0xff] %v3331_v54  ;;  %v817_v57 = vmul.f32 %v3331_v54, %v801_v52  ;;  %v3223_v52 = vld [vmem:[#allocation5 + $0x264] sm:$0xf] }
 0x262   :  { %3332 = vtanh.f32 %v753_v55  ;;  %v2751_v55 = vor.u32 %v3223_v52, %v2748_v53  ;;  %2850 = vmatmul.msk.bf16.gmra.mxu1 %vm108_vm0, %v3541_v20  ;;  %v812_v52 = vld [vmem:[%s3977_s1 + $0x70] sm:$0xff] }
 0x263   :  { %v849_v0 = vadd.f32 %v833_v56, %v817_v57  ;;  %v806_v56 = vld [vmem:[%s3977_s1 + $0x40] sm:$0xff] }
 0x264   :  { %1106 = vmatpush.bf16.msrb.mxu3 %v2751_v55 }
 0x265   :  { %868 = vmax.index.xlane.f32.xlu1 %v849_v0 }
 0x267   :  { %v754_v3 = vpop.f32.mrf.mxu1 }
 0x268   :  { %v3333_v28 = vpop.eup %3332  ;;  %v755_v4 = vadd.f32 %v754_v3, %v3673_v61  ;;  %v839_v3 = vld [vmem:[#allocation2 + $0x48] sm:$0xff] }
 0x269   :  { %2520 = vst [vmem:[#allocation7 + $0x70] sm:$0xff] %v3333_v28  ;;  %v818_v6 = vmul.f32 %v3333_v28, %v802_v2  ;;  %2841 = vmatmul.msk.bf16.gmra.mxu0 %vm108_vm0, %v3529_v17 }
 0x26a   :  { %3334 = vtanh.f32 %v755_v4  ;;  %v2738_v4 = vld [vmem:[#allocation5 + $0x250] sm:$0xf] }
 0x26b   :  { %v850_v7 = vadd.f32 %v834_v5, %v818_v6  ;;  %v3222_v5 = vld [vmem:[#allocation5 + $0x254] sm:$0xf0] }
 0x26c   :  { %v2739_v6 = vor.u32 %v3222_v5, %v2738_v4  ;;  %v2980_v5 = vld [vmem:[#allocation5 + $0x3b0] sm:$0xf] }
 0x26d   :  { %870 = vmax.index.xlane.f32.xlu2 %v850_v7  ;;  %v3221_v7 = vld [vmem:[#allocation5 + $0x254] sm:$0xf] }
 0x26e   :  { %1058 = vmatpush.bf16.msrb.mxu2 %v2739_v6  ;;  %v3266_v6 = vld [vmem:[#allocation5 + $0x3b4] sm:$0xf0] }
 0x26f   :  { %v757_v9 = vpop.f32.mrf.mxu1 }
 0x270   :  { %v3335_v10 = vpop.eup %3334  ;;  %v758_v11 = vadd.f32 %v757_v9, %v3673_v61 }
 0x271   :  { %2521 = vst [vmem:[#allocation7 + $0x88] sm:$0xff] %v3335_v10  ;;  %v819_v13 = vmul.f32 %v3335_v10, %v803_v8  ;;  %v2740_v8 = vld [vmem:[#allocation5 + $0x258] sm:$0xf0] }
 0x272   :  { %3336 = vtanh.f32 %v758_v11  ;;  %v2743_v10 = vor.u32 %v3221_v7, %v2740_v8  ;;  %v808_v11 = vld [vmem:[%s3977_s1 + $0x50] sm:$0xff]  ;;  %2851 = vmatmul.msk.bf16.gmra.mxu1 %vm108_vm0, %v3553_v23  ;;  %v2981_v7 = vor.u32 %v3266_v6, %v2980_v5 }
 0x273   :  { %v851_v24 = vadd.f32 %v835_v12, %v819_v13  ;;  %v3249_v8 = vld [vmem:[#allocation5 + $0x334] sm:$0xf] }
 0x274   :  { %1107 = vmatpush.bf16.msrb.mxu3 %v2743_v10 }
 0x275   :  { %872 = vmax.index.xlane.f32.xlu2 %v851_v24 }
 0x277   :  { %v759_v30 = vpop.f32.mrf.mxu1 }
 0x278   :  { %v3337_v31 = vpop.eup %3336  ;;  %v760_v32 = vadd.f32 %v759_v30, %v3673_v61 }
 0x279   :  { %2522 = vst [vmem:[#allocation7 + $0xa0] sm:$0xff] %v3337_v31  ;;  %v820_v34 = vmul.f32 %v3337_v31, %v804_v27  ;;  %2842 = vmatmul.msk.bf16.gmra.mxu0 %vm108_vm0, %v3541_v20  ;;  %v841_v27 = vld [vmem:[#allocation2 + $0x58] sm:$0xff]  ;;  %v2730_v31 = vld [vmem:[#allocation5 + $0x240] sm:$0xf] }
 0x27a   :  { %3338 = vtanh.f32 %v760_v32  ;;  %v3220_v32 = vld [vmem:[#allocation5 + $0x244] sm:$0xf0] }
 0x27b   :  { %v852_v41 = vadd.f32 %v836_v33, %v820_v34  ;;  %v2731_v33 = vor.u32 %v3220_v32, %v2730_v31  ;;  %v3219_v34 = vld [vmem:[#allocation5 + $0x244] sm:$0xf]  ;;  %v2910_v32 = vld [vmem:[#allocation5 + $0x328] sm:$0xf0] }
 0x27c   :  { %v2735_v38 = vor.u32 %v3219_v34, %v2732_v36  ;;  %v3247_v31 = vld [vmem:[#allocation5 + $0x324] sm:$0xf] }
 0x27d   :  { %874 = vmax.index.xlane.f32.xlu0 %v852_v41  ;;  %1059 = vmatpush.bf16.msrb.mxu2 %v2731_v33  ;;  %v2913_v33 = vor.u32 %v3247_v31, %v2910_v32  ;;  %v2940_v31 = vld [vmem:[#allocation5 + $0x360] sm:$0xf]  ;;  %v3256_v32 = vld [vmem:[#allocation5 + $0x364] sm:$0xf0] }
 0x27e   :  { %1108 = vmatpush.bf16.msrb.mxu3 %v2735_v38 }
 0x27f   :  { %v762_v44 = vpop.f32.mrf.mxu1 }
 0x280   :  { %v3339_v45 = vpop.eup %3338  ;;  %v763_v46 = vadd.f32 %v762_v44, %v3673_v61 }
 0x281   :  { %2523 = vst [vmem:[#allocation7 + $0xb8] sm:$0xff] %v3339_v45  ;;  %v821_v48 = vmul.f32 %v3339_v45, %v805_v43  ;;  %v811_v45 = vld [vmem:[%s3977_s1 + $0x68] sm:$0xff] }
 0x282   :  { %3340 = vtanh.f32 %v763_v46  ;;  %2852 = vmatmul.msk.bf16.gmra.mxu1 %vm108_vm0, %v3565_v26  ;;  %1603 = vmatpush.bf16.msra.mxu3 %v2981_v7 }
 0x283   :  { %v853_v54 = vadd.f32 %v837_v47, %v821_v48 }
 0x285   :  { %876 = vmax.index.xlane.f32.xlu1 %v853_v54 }
 0x287   :  { %v764_v57 = vpop.f32.mrf.mxu1 }
 0x288   :  { %v3341_v58 = vpop.eup %3340  ;;  %v765_v14 = vadd.f32 %v764_v57, %v3673_v61 }
 0x289   :  { %2524 = vst [vmem:[#allocation7 + $0xd0] sm:$0xff] %v3341_v58  ;;  %v822_v62 = vmul.f32 %v3341_v58, %v806_v56  ;;  %2843 = vmatmul.msk.bf16.gmra.mxu0 %vm108_vm0, %v3553_v23  ;;  %v844_v56 = vld [vmem:[#allocation2 + $0x70] sm:$0xff]  ;;  %v894_v58 = vlaneseq }
 0x28a   :  { %3342 = vtanh.f32 %v765_v14  ;;  %v2916_v23 = vld [vmem:[#allocation5 + $0x330] sm:$0xf] }
 0x28b   :  { %v854_v29 = vadd.f32 %v838_v60, %v822_v62  ;;  %v3250_v60 = vld [vmem:[#allocation5 + $0x334] sm:$0xf0] }
 0x28c   :  { %v2917_v62 = vor.u32 %v3250_v60, %v2916_v23  ;;  %v3243_v60 = vld [vmem:[#allocation5 + $0x304] sm:$0xf] }
 0x28d   :  { %878 = vmax.index.xlane.f32.xlu2 %v854_v29  ;;  %v3752_v29 = vand.u32 127, %v894_v58  ;;  %v2956_v58 = vld [vmem:[#allocation5 + $0x380] sm:$0xf] }
 0x28e   :  { %1554 = vmatpush.bf16.msra.mxu2 %v2917_v62  ;;  %v2894_v62 = vld [vmem:[#allocation5 + $0x308] sm:$0xf0] }
 0x28f   :  { %v767_v0 = vpop.f32.mrf.mxu1 }
 0x290   :  { %v3343_v1 = vpop.eup %3342  ;;  %v768_v2 = vadd.f32 %v767_v0, %v3673_v61 }
 0x291   :  { %2525 = vst [vmem:[#allocation7 + $0xe8] sm:$0xff] %v3343_v1  ;;  %v823_v28 = vmul.f32 %v3343_v1, %v807_v63  ;;  %v813_v63 = vld [vmem:[%s3977_s1 + $0x78] sm:$0xff] }
 0x292   :  { %3344 = vtanh.f32 %v768_v2  ;;  %v845_v1 = vld [vmem:[#allocation2 + $0x78] sm:$0xff]  ;;  %2853 = vmatmul.msk.bf16.gmra.mxu1 %vm108_vm0, %v3577_v35 }
 0x293   :  { %v855_v9 = vadd.f32 %v839_v3, %v823_v28  ;;  %v3470_v3 = vmov 0.0  }
 0x295   :  { %880 = vmax.index.xlane.f32.xlu0 %v855_v9  ;;  %v2918_v9 = vld [vmem:[#allocation5 + $0x338] sm:$0xf0] }
 0x296   :  { %v2921_v10 = vor.u32 %v3249_v8, %v2918_v9  ;;  %v2948_v8 = vld [vmem:[#allocation5 + $0x370] sm:$0xf]  ;;  %v3258_v9 = vld [vmem:[#allocation5 + $0x374] sm:$0xf0] }
 0x297   :  { %v769_v12 = vpop.f32.mrf.mxu1 }
 0x298   :  { %v3345_v13 = vpop.eup %3344  ;;  %v770_v17 = vadd.f32 %v769_v12, %v3673_v61  ;;  %1652 = vmatpush.bf16.msrb.mxu0 %v2921_v10  ;;  %v3471_v12 = vmov 1.0|1.0   ;;  %v2949_v10 = vor.u32 %v3258_v9, %v2948_v8  ;;  %v2926_v8 = vld [vmem:[#allocation5 + $0x348] sm:$0xf0] }
 0x299   :  { %2526 = vst [vmem:[#allocation7 + $0x100] sm:$0xff] %v3345_v13  ;;  %v824_v16 = vmul.f32 %v3345_v13, %v808_v11  ;;  %2844 = vmatmul.msk.bf16.gmra.mxu0 %vm108_vm0, %v3565_v26  ;;  %v3265_v13 = vld [vmem:[#allocation5 + $0x3b4] sm:$0xf] }
 0x29a   :  { %3346 = vtanh.f32 %v770_v17  ;;  %v2982_v17 = vld [vmem:[#allocation5 + $0x3b8] sm:$0xf0] }
 0x29b   :  { %v856_v18 = vadd.f32 %v840_v15, %v824_v16  ;;  %v2985_v15 = vor.u32 %v3265_v13, %v2982_v17  ;;  %v2908_v16 = vld [vmem:[#allocation5 + $0x320] sm:$0xf] }
 0x29c   :  { %1653 = vmatpush.bf16.msrb.mxu0 %v2913_v33  ;;  %v2941_v33 = vor.u32 %v3256_v32, %v2940_v31 }
 0x29d   :  { %882 = vmax.index.xlane.f32.xlu1 %v856_v18  ;;  %v3248_v18 = vld [vmem:[#allocation5 + $0x324] sm:$0xf0]  ;;  %1701 = vmatpush.bf16.msrb.mxu1 %v2985_v15 }
 0x29f   :  { %v772_v21 = vpop.f32.mrf.mxu1 }
 0x2a0   :  { %v3347_v24 = vpop.eup %3346  ;;  %v773_v25 = vadd.f32 %v772_v21, %v3673_v61 }
 0x2a1   :  { %2527 = vst [vmem:[#allocation7 + $0x118] sm:$0xff] %v3347_v24  ;;  %v825_v30 = vmul.f32 %v3347_v24, %v809_v19  ;;  %v2909_v19 = vor.u32 %v3248_v18, %v2908_v16  ;;  %v3257_v16 = vld [vmem:[#allocation5 + $0x374] sm:$0xf]  ;;  %v2950_v18 = vld [vmem:[#allocation5 + $0x378] sm:$0xf0] }
 0x2a2   :  { %3348 = vtanh.f32 %v773_v25  ;;  %v2972_v25 = vld [vmem:[#allocation5 + $0x3a0] sm:$0xf]  ;;  %2854 = vmatmul.msk.bf16.gmra.mxu1 %vm108_vm0, %v3589_v59 }
 0x2a3   :  { %v857_v37 = vadd.f32 %v841_v27, %v825_v30  ;;  %1555 = vmatpush.bf16.msra.mxu2 %v2909_v19  ;;  %v3264_v27 = vld [vmem:[#allocation5 + $0x3a4] sm:$0xf0]  ;;  %v2953_v19 = vor.u32 %v3257_v16, %v2950_v18 }
 0x2a4   :  { %v2973_v30 = vor.u32 %v3264_v27, %v2972_v25 }
 0x2a5   :  { %884 = vmax.index.xlane.f32.xlu2 %v857_v37  ;;  %v2974_v37 = vld [vmem:[#allocation5 + $0x3a8] sm:$0xf0] }
 0x2a6   :  { %1604 = vmatpush.bf16.msra.mxu3 %v2973_v30 }
 0x2a7   :  { %v774_v40 = vpop.f32.mrf.mxu1 }
 0x2a8   :  { %v3349_v41 = vpop.eup %3348  ;;  %v775_v20 = vadd.f32 %v774_v40, %v3673_v61  ;;  %v3246_v40 = vld [vmem:[#allocation5 + $0x314] sm:$0xf0] }
 0x2a9   :  { %2528 = vst [vmem:[#allocation7 + $0x130] sm:$0xff] %v3349_v41  ;;  %v826_v43 = vmul.f32 %v3349_v41, %v810_v39  ;;  %2845 = vmatmul.msk.bf16.gmra.mxu0 %vm108_vm0, %v3577_v35  ;;  %v3263_v35 = vld [vmem:[#allocation5 + $0x3a4] sm:$0xf]  ;;  %v2900_v39 = vld [vmem:[#allocation5 + $0x310] sm:$0xf] }
 0x2aa   :  { %3350 = vtanh.f32 %v775_v20  ;;  %v2977_v38 = vor.u32 %v3263_v35, %v2974_v37  ;;  %v2901_v41 = vor.u32 %v3246_v40, %v2900_v39  ;;  %v3255_v39 = vld [vmem:[#allocation5 + $0x364] sm:$0xf]  ;;  %v2942_v40 = vld [vmem:[#allocation5 + $0x368] sm:$0xf0] }
 0x2ab   :  { %v858_v44 = vadd.f32 %v842_v42, %v826_v43  ;;  %v2964_v43 = vld [vmem:[#allocation5 + $0x390] sm:$0xf] }
 0x2ac   :  { %1702 = vmatpush.bf16.msrb.mxu1 %v2977_v38  ;;  %1556 = vmatpush.bf16.msra.mxu2 %v2901_v41  ;;  %v2945_v41 = vor.u32 %v3255_v39, %v2942_v40 }
 0x2ad   :  { %886 = vmax.index.xlane.f32.xlu0 %v858_v44  ;;  %v3262_v44 = vld [vmem:[#allocation5 + $0x394] sm:$0xf0] }
 0x2af   :  { %v777_v46 = vpop.f32.mrf.mxu1 }
 0x2b0   :  { %v3351_v47 = vpop.eup %3350  ;;  %v778_v48 = vadd.f32 %v777_v46, %v3673_v61  ;;  %v3245_v46 = vld [vmem:[#allocation5 + $0x314] sm:$0xf] }
 0x2b1   :  { %2529 = vst [vmem:[#allocation7 + $0x148] sm:$0xff] %v3351_v47  ;;  %v827_v50 = vmul.f32 %v3351_v47, %v811_v45  ;;  %v2965_v45 = vor.u32 %v3262_v44, %v2964_v43  ;;  %v2902_v47 = vld [vmem:[#allocation5 + $0x318] sm:$0xf0]  ;;  %v2932_v43 = vld [vmem:[#allocation5 + $0x350] sm:$0xf] }
 0x2b2   :  { %3352 = vtanh.f32 %v778_v48  ;;  %v2905_v48 = vor.u32 %v3245_v46, %v2902_v47  ;;  %2855 = vmatmul.msk.bf16.gmra.mxu1 %vm108_vm0, %v3601_v22  ;;  %v3237_v46 = vld [vmem:[#allocation5 + $0x2d4] sm:$0xf]  ;;  %v2870_v47 = vld [vmem:[#allocation5 + $0x2d8] sm:$0xf0] }
 0x2b3   :  { %v859_v51 = vadd.f32 %v843_v49, %v827_v50  ;;  %1605 = vmatpush.bf16.msra.mxu3 %v2965_v45  ;;  %v3254_v45 = vld [vmem:[#allocation5 + $0x354] sm:$0xf0] }
 0x2b4   :  { %1654 = vmatpush.bf16.msrb.mxu0 %v2905_v48  ;;  %v2933_v48 = vor.u32 %v3254_v45, %v2932_v43  ;;  %v3047_v45 = vld [vmem:[#allocation5 + $0x438] sm:$0xf0] }
 0x2b5   :  { %888 = vmax.index.xlane.f32.xlu1 %v859_v51  ;;  %v2966_v51 = vld [vmem:[#allocation5 + $0x398] sm:$0xf0] }
 0x2b7   :  { %v779_v53 = vpop.f32.mrf.mxu1 }
 0x2b8   :  { %v3353_v54 = vpop.eup %3352  ;;  %v780_v55 = vadd.f32 %v779_v53, %v3673_v61  ;;  %v2892_v53 = vld [vmem:[#allocation5 + $0x300] sm:$0xf] }
 0x2b9   :  { %2530 = vst [vmem:[#allocation7 + $0x160] sm:$0xff] %v3353_v54  ;;  %v828_v57 = vmul.f32 %v3353_v54, %v812_v52  ;;  %2846 = vmatmul.msk.bf16.gmra.mxu0 %vm108_vm0, %v3589_v59  ;;  %v3261_v59 = vld [vmem:[#allocation5 + $0x394] sm:$0xf]  ;;  %v3244_v54 = vld [vmem:[#allocation5 + $0x304] sm:$0xf0] }
 0x2ba   :  { %3354 = vtanh.f32 %v780_v55  ;;  %v2969_v52 = vor.u32 %v3261_v59, %v2966_v51  ;;  %v2893_v55 = vor.u32 %v3244_v54, %v2892_v53  ;;  %v2934_v59 = vld [vmem:[#allocation5 + $0x358] sm:$0xf0] }
 0x2bb   :  { %v860_v14 = vadd.f32 %v844_v56, %v828_v57 }
 0x2bc   :  { %1703 = vmatpush.bf16.msrb.mxu1 %v2969_v52  ;;  %1557 = vmatpush.bf16.msra.mxu2 %v2893_v55 }
 0x2bd   :  { %890 = vmax.index.xlane.f32.xlu2 %v860_v14  ;;  %v3260_v14 = vld [vmem:[#allocation5 + $0x384] sm:$0xf0] }
 0x2be   :  { %v2957_v23 = vor.u32 %v3260_v14, %v2956_v58 }
 0x2c0   :  { %v3355_v61 = vpop.eup %3354  ;;  %v863_v0 = vpop.xlane.xlu0 %862  ;;  %1606 = vmatpush.bf16.msra.mxu3 %v2957_v23  ;;  %v2860_v23 = vld [vmem:[#allocation5 + $0x2c0] sm:$0xf] }
 0x2c1   :  { %2531 = vst [vmem:[#allocation7 + $0x178] sm:$0xff] %v3355_v61  ;;  %vm896_vm1 = vcmp.eq.s32.totalorder %v3752_v29, %v863_v0  ;;  %v829_v2 = vmul.f32 %v3355_v61, %v813_v63  ;;  %v2897_v63 = vor.u32 %v3243_v60, %v2894_v62  ;;  %v3236_v60 = vld [vmem:[#allocation5 + $0x2c4] sm:$0xf0] }
 0x2c2   :  { %v2712_v28 = vsel %vm896_vm1, 1.0, %v3470_v3  ;;  %v2861_v62 = vor.u32 %v3236_v60, %v2860_v23  ;;  %v3101_v23 = vld [vmem:[#allocation5 + $0x4a0] sm:$0xf]  ;;  %v3296_v60 = vld [vmem:[#allocation5 + $0x4a4] sm:$0xf0] }
 0x2c3   :  { %2484 = vst [vmem:[#allocation7] sm:$0xff] %v2712_v28  ;;  %v861_v4 = vadd.f32 %v845_v1, %v829_v2  ;;  %1655 = vmatpush.bf16.msrb.mxu0 %v2897_v63  ;;  %v2958_v1 = vld [vmem:[#allocation5 + $0x388] sm:$0xf0]  ;;  %v2884_v28 = vld [vmem:[#allocation5 + $0x2f0] sm:$0xf] }
 0x2c4   :  { %1607 = vmatpush.bf16.msra.mxu3 %v2949_v10  ;;  %v2924_v63 = vld [vmem:[#allocation5 + $0x340] sm:$0xf] }
 0x2c5   :  { %892 = vmax.index.xlane.f32.xlu0 %v861_v4  ;;  %v3242_v4 = vld [vmem:[#allocation5 + $0x2f4] sm:$0xf0] }
 0x2c6   :  { %v2885_v5 = vor.u32 %v3242_v4, %v2884_v28  ;;  %v3235_v4 = vld [vmem:[#allocation5 + $0x2c4] sm:$0xf] }
 0x2c8   :  { %v865_v26 = vpop.xlane.xlu0 %864  ;;  %1558 = vmatpush.bf16.msra.mxu2 %v2885_v5  ;;  %1608 = vmatpush.bf16.msra.mxu3 %v2941_v33  ;;  %v2862_v5 = vld [vmem:[#allocation5 + $0x2c8] sm:$0xf0] }
 0x2c9   :  { %vm897_vm2 = vcmp.eq.s32.totalorder %v3752_v29, %v865_v26  ;;  %2847 = vmatmul.msk.bf16.gmra.mxu0 %vm108_vm0, %v3601_v22  ;;  %v3259_v22 = vld [vmem:[#allocation5 + $0x384] sm:$0xf]  ;;  %v3241_v26 = vld [vmem:[#allocation5 + $0x2f4] sm:$0xf] }
 0x2ca   :  { %v2713_v11 = vsel %vm897_vm2, 1.0, %v3470_v3  ;;  %vm2792_vm3 = vmpackc.low %vm897_vm2, %vm896_vm1  ;;  %v2961_v2 = vor.u32 %v3259_v22, %v2958_v1 }
 0x2cb   :  { %2485 = vst [vmem:[#allocation7 + $0x18] sm:$0xff] %v2713_v11  ;;  %2793 = vmatmul.msk.bf16.vlgmr.msrb.gmra.mxu2 %vm2792_vm3, %v3471_v12  ;;  %2809 = vmatmul.msk.bf16.vlgmr.msrb.gmra.mxu3 %vm2792_vm3, %v3471_v12  ;;  %v2886_v11 = vld [vmem:[#allocation5 + $0x2f8] sm:$0xf0] }
 0x2cc   :  { %1704 = vmatpush.bf16.msrb.mxu1 %v2961_v2  ;;  %v2889_v13 = vor.u32 %v3241_v26, %v2886_v11  ;;  %1609 = vmatpush.bf16.msra.mxu3 %v2933_v48  ;;  %v3111_v48 = vld [vmem:[#allocation5 + $0x4b8] sm:$0xf0] }
 0x2ce   :  { %1656 = vmatpush.bf16.msrb.mxu0 %v2889_v13 }
 0x2d0   :  { %v867_v21 = vpop.xlane.xlu1 %866  ;;  %1705 = vmatpush.bf16.msrb.mxu1 %v2953_v19  ;;  %v3045_v19 = vld [vmem:[#allocation5 + $0x430] sm:$0xf] }
 0x2d1   :  { %vm898_vm4 = vcmp.eq.s32.totalorder %v3752_v29, %v867_v21  ;;  %v2876_v21 = vld [vmem:[#allocation5 + $0x2e0] sm:$0xf] }
 0x2d2   :  { %v2714_v24 = vsel %vm898_vm4, 1.0, %v3470_v3 }
 0x2d3   :  { %2486 = vst [vmem:[#allocation7 + $0x30] sm:$0xff] %v2714_v24  ;;  %v3240_v24 = vld [vmem:[#allocation5 + $0x2e4] sm:$0xf0] }
 0x2d4   :  { %v2877_v25 = vor.u32 %v3240_v24, %v2876_v21  ;;  %1706 = vmatpush.bf16.msrb.mxu1 %v2945_v41  ;;  %v3282_v21 = vld [vmem:[#allocation5 + $0x434] sm:$0xf0] }
 0x2d5   :  { %v3046_v24 = vor.u32 %v3282_v21, %v3045_v19 }
 0x2d6   :  { %1559 = vmatpush.bf16.msra.mxu2 %v2877_v25  ;;  %v3109_v25 = vld [vmem:[#allocation5 + $0x4b0] sm:$0xf] }
 0x2d8   :  { %v869_v34 = vpop.xlane.xlu1 %868 }
 0x2d9   :  { %vm899_vm5 = vcmp.eq.s32.totalorder %v3752_v29, %v869_v34  ;;  %v3239_v34 = vld [vmem:[#allocation5 + $0x2e4] sm:$0xf] }
 0x2da   :  { %v2715_v36 = vsel %vm899_vm5, 1.0, %v3470_v3  ;;  %vm2794_vm6 = vmpackc.low %vm899_vm5, %vm898_vm4 }
 0x2db   :  { %2487 = vst [vmem:[#allocation7 + $0x48] sm:$0xff] %v2715_v36  ;;  %2795 = vmatmul.msk.bf16.gmra.mxu2 %vm2794_vm6, %v3471_v12  ;;  %2811 = vmatmul.msk.bf16.gmra.mxu3 %vm2794_vm6, %v3471_v12  ;;  %v2878_v36 = vld [vmem:[#allocation5 + $0x2e8] sm:$0xf0] }
 0x2dc   :  { %v2881_v35 = vor.u32 %v3239_v34, %v2878_v36 }
 0x2de   :  { %1657 = vmatpush.bf16.msrb.mxu0 %v2881_v35 }
 0x2e0   :  { %v871_v20 = vpop.xlane.xlu2 %870 }
 0x2e1   :  { %vm900_vm7 = vcmp.eq.s32.totalorder %v3752_v29, %v871_v20  ;;  %v2868_v20 = vld [vmem:[#allocation5 + $0x2d0] sm:$0xf] }
 0x2e2   :  { %v2716_v42 = vsel %vm900_vm7, 1.0, %v3470_v3 }
 0x2e3   :  { %2488 = vst [vmem:[#allocation7 + $0x60] sm:$0xff] %v2716_v42  ;;  %v3238_v42 = vld [vmem:[#allocation5 + $0x2d4] sm:$0xf0] }
 0x2e4   :  { %v2869_v44 = vor.u32 %v3238_v42, %v2868_v20 }
 0x2e6   :  { %1560 = vmatpush.bf16.msra.mxu2 %v2869_v44  ;;  %v3281_v44 = vld [vmem:[#allocation5 + $0x434] sm:$0xf] }
 0x2e8   :  { %v873_v49 = vpop.xlane.xlu2 %872 }
 0x2e9   :  { %vm901_vm8 = vcmp.eq.s32.totalorder %v3752_v29, %v873_v49  ;;  %v2873_v49 = vor.u32 %v3237_v46, %v2870_v47  ;;  %v3050_v46 = vor.u32 %v3281_v44, %v3047_v45  ;;  %v3297_v47 = vld [vmem:[#allocation5 + $0x4b4] sm:$0xf] }
 0x2ea   :  { %v2717_v50 = vsel %vm901_vm8, 1.0, %v3470_v3  ;;  %vm2796_vm9 = vmpackc.low %vm901_vm8, %vm900_vm7  ;;  %1561 = vmatpush.bf16.msra.mxu2 %v2861_v62  ;;  %v3102_v62 = vor.u32 %v3296_v60, %v3101_v23  ;;  %v3021_v60 = vld [vmem:[#allocation5 + $0x400] sm:$0xf] }
 0x2eb   :  { %2489 = vst [vmem:[#allocation7 + $0x78] sm:$0xff] %v2717_v50  ;;  %2797 = vmatmul.msk.bf16.gmra.mxu2 %vm2796_vm9, %v3471_v12  ;;  %2813 = vmatmul.msk.bf16.gmra.mxu3 %vm2796_vm9, %v3471_v12  ;;  %v3253_v50 = vld [vmem:[#allocation5 + $0x354] sm:$0xf] }
 0x2ec   :  { %v2937_v51 = vor.u32 %v3253_v50, %v2934_v59  ;;  %1658 = vmatpush.bf16.msrb.mxu0 %v2873_v49  ;;  %v3114_v59 = vor.u32 %v3297_v47, %v3111_v48  ;;  %v3277_v48 = vld [vmem:[#allocation5 + $0x414] sm:$0xf] }
 0x2ee   :  { %1707 = vmatpush.bf16.msrb.mxu1 %v2937_v51  ;;  %1997 = vmatpush.bf16.msrb.mxu2 %v3046_v24 }
 0x2f0   :  { %v875_v56 = vpop.xlane.xlu0 %874 }
 0x2f1   :  { %vm902_vm10 = vcmp.eq.s32.totalorder %v3752_v29, %v875_v56  ;;  %v1179_v56 = vpop.f32.mrf.mxu0 }
 0x2f2   :  { %v2718_v57 = vsel %vm902_vm10, 1.0, %v3470_v3 }
 0x2f3   :  { %2490 = vst [vmem:[#allocation7 + $0x90] sm:$0xff] %v2718_v57  ;;  %v1228_v57 = vpop.f32.mrf.mxu1 }
 0x2f8   :  { %v877_v61 = vpop.xlane.xlu1 %876 }
 0x2f9   :  { %vm903_vm11 = vcmp.eq.s32.totalorder %v3752_v29, %v877_v61  ;;  %v3252_v61 = vld [vmem:[#allocation5 + $0x344] sm:$0xf0]  ;;  %v1181_v1 = vpop.f32.mrf.mxu0 }
 0x2fa   :  { %v2719_v0 = vsel %vm903_vm11, 1.0, %v3470_v3  ;;  %vm2798_vm12 = vmpackc.low %vm903_vm11, %vm902_vm10 }
 0x2fb   :  { %2491 = vst [vmem:[#allocation7 + $0xa8] sm:$0xff] %v2719_v0  ;;  %2799 = vmatmul.msk.bf16.gmra.mxu2 %vm2798_vm12, %v3471_v12  ;;  %2815 = vmatmul.msk.bf16.gmra.mxu3 %vm2798_vm12, %v3471_v12  ;;  %v2925_v0 = vor.u32 %v3252_v61, %v2924_v63  ;;  %v1230_v2 = vpop.f32.mrf.mxu1 }
 0x2fd   :  { %1610 = vmatpush.bf16.msra.mxu3 %v2925_v0 }
 0x300   :  { %v879_v6 = vpop.xlane.xlu2 %878 }
 0x301   :  { %vm904_vm13 = vcmp.eq.s32.totalorder %v3752_v29, %v879_v6  ;;  %v2865_v6 = vor.u32 %v3235_v4, %v2862_v5  ;;  %v1184_v10 = vpop.f32.mrf.mxu0 }
 0x302   :  { %v2720_v7 = vsel %vm904_vm13, 1.0, %v3470_v3 }
 0x303   :  { %2492 = vst [vmem:[#allocation7 + $0xc0] sm:$0xff] %v2720_v7  ;;  %v3251_v7 = vld [vmem:[#allocation5 + $0x344] sm:$0xf]  ;;  %1659 = vmatpush.bf16.msrb.mxu0 %v2865_v6  ;;  %v1233_v26 = vpop.f32.mrf.mxu1 }
 0x304   :  { %v2929_v9 = vor.u32 %v3251_v7, %v2926_v8 }
 0x306   :  { %1708 = vmatpush.bf16.msrb.mxu1 %v2929_v9 }
 0x307   :  { %2095 = vmatpush.bf16.msra.mxu0 %v3050_v46 }
 0x308   :  { %v881_v17 = vpop.xlane.xlu0 %880 }
 0x309   :  { %vm905_vm14 = vcmp.eq.s32.totalorder %v3752_v29, %v881_v17  ;;  %v1186_v11 = vpop.f32.mrf.mxu0  ;;  %v2856_v17 = vld [vmem:[%s3980_s4 + $0x4] ss:$8 sm:$0x3] }
 0x30a   :  { %v2721_v15 = vsel %vm905_vm14, 1.0, %v3470_v3  ;;  %vm2800_vm15 = vmpackc.low %vm905_vm14, %vm904_vm13  ;;  %v3832_v16 = vperm.slane %v2856_v17, 0  ;;  %v3834_v18 = vperm.slane %v2856_v17, 1  ;;  %2144 = vmatpush.bf16.msra.mxu1 %v3114_v59  ;;  %v3295_v17 = vld [vmem:[#allocation5 + $0x4a4] sm:$0xf] }
 0x30b   :  { %2493 = vst [vmem:[#allocation7 + $0xd8] sm:$0xff] %v2721_v15  ;;  %2801 = vmatmul.msk.bf16.gmra.mxu2 %vm2800_vm15, %v3471_v12  ;;  %2817 = vmatmul.msk.bf16.gmra.mxu3 %vm2800_vm15, %v3471_v12  ;;  %v3293_v59 = vld [vmem:[#allocation5 + $0x494] sm:$0xf] }
 0x310   :  { %v883_v27 = vpop.xlane.xlu1 %882 }
 0x311   :  { %vm906_vm0 = vcmp.eq.s32.totalorder %v3752_v29, %v883_v27  ;;  %v3298_v27 = vld [vmem:[#allocation5 + $0x4b4] sm:$0xf0] }
 0x312   :  { %v2722_v30 = vsel %vm906_vm0, 1.0, %v3470_v3 }
 0x313   :  { %2494 = vst [vmem:[#allocation7 + $0xf0] sm:$0xff] %v2722_v30  ;;  %v3110_v30 = vor.u32 %v3298_v27, %v3109_v25  ;;  %v3029_v27 = vld [vmem:[#allocation5 + $0x410] sm:$0xf] }
 0x315   :  { %2046 = vmatpush.bf16.msrb.mxu3 %v3110_v30  ;;  %v3278_v30 = vld [vmem:[#allocation5 + $0x414] sm:$0xf0] }
 0x318   :  { %v885_v37 = vpop.xlane.xlu2 %884 }
 0x319   :  { %vm907_vm1 = vcmp.eq.s32.totalorder %v3752_v29, %v885_v37  ;;  %v3838_v37 = vpop.f32.mrf.mxu0  ;;  %2047 = vmatpush.bf16.msrb.mxu3 %v3102_v62  ;;  %v3276_v62 = vld [vmem:[#allocation5 + $0x404] sm:$0xf0] }
 0x31a   :  { %v2723_v38 = vsel %vm907_vm1, 1.0, %v3470_v3  ;;  %vm2802_vm2 = vmpackc.low %vm907_vm1, %vm906_vm0 }
 0x31b   :  { %2495 = vst [vmem:[#allocation7 + $0x108] sm:$0xff] %v2723_v38  ;;  %2803 = vmatmul.msk.bf16.gmra.mxu2 %vm2802_vm2, %v3471_v12  ;;  %2819 = vmatmul.msk.bf16.gmra.mxu3 %vm2802_vm2, %v3471_v12 }
 0x320   :  { %v887_v52 = vpop.xlane.xlu0 %886 }
 0x321   :  { %vm908_vm3 = vcmp.eq.s32.totalorder %v3752_v29, %v887_v52 }
 0x322   :  { %v2724_v53 = vsel %vm908_vm3, 1.0, %v3470_v3 }
 0x323   :  { %2496 = vst [vmem:[#allocation7 + $0x120] sm:$0xff] %v2724_v53  ;;  %v1191_v53 = vpop.f32.mrf.mxu0 }
 0x328   :  { %v889_v54 = vpop.xlane.xlu1 %888 }
 0x329   :  { %vm909_vm4 = vcmp.eq.s32.totalorder %v3752_v29, %v889_v54 }
 0x32a   :  { %v2725_v55 = vsel %vm909_vm4, 1.0, %v3470_v3  ;;  %vm2804_vm5 = vmpackc.low %vm909_vm4, %vm908_vm3 }
 0x32b   :  { %2497 = vst [vmem:[#allocation7 + $0x138] sm:$0xff] %v2725_v55  ;;  %2805 = vmatmul.msk.bf16.gmra.mxu2 %vm2804_vm5, %v3471_v12  ;;  %2821 = vmatmul.msk.bf16.gmra.mxu3 %vm2804_vm5, %v3471_v12  ;;  %v1194_v9 = vpop.f32.mrf.mxu0 }
 0x330   :  { %v891_v58 = vpop.xlane.xlu2 %890 }
 0x331   :  { %vm910_vm6 = vcmp.eq.s32.totalorder %v3752_v29, %v891_v58  ;;  %v3280_v58 = vld [vmem:[#allocation5 + $0x424] sm:$0xf0] }
 0x332   :  { %v2726_v14 = vsel %vm910_vm6, 1.0, %v3470_v3 }
 0x333   :  { %2498 = vst [vmem:[#allocation7 + $0x150] sm:$0xff] %v2726_v14 }
 0x338   :  { %v893_v22 = vpop.xlane.xlu0 %892 }
 0x339   :  { %vm911_vm7 = vcmp.eq.s32.totalorder %v3752_v29, %v893_v22 }
 0x33a   :  { %v2727_v28 = vsel %vm911_vm7, 1.0, %v3470_v3  ;;  %vm2806_vm8 = vmpackc.low %vm911_vm7, %vm910_vm6  ;;  %v1235_v3 = vpop.f32.mrf.mxu1 }
 0x33b   :  { %2499 = vst [vmem:[#allocation7 + $0x168] sm:$0xff] %v2727_v28  ;;  %2807 = vmatmul.msk.bf16.gmra.mxu2 %vm2806_vm8, %v3471_v12  ;;  %2823 = vmatmul.msk.bf16.gmra.mxu3 %vm2806_vm8, %v3471_v12 }
 0x342   :  { %v3840_v38 = vpop.f32.mrf.mxu1 }
 0x34a   :  { %v1240_v54 = vpop.f32.mrf.mxu1 }
 0x34e   :  { %v1061_v13 = vpop.f32.mrf.mxu2  ;;  %v1110_v29 = vpop.f32.mrf.mxu3 }
 0x34f   :  { %v1180_v15 = vadd.f32 %v1179_v56, %v1061_v13  ;;  %v1229_v12 = vadd.f32 %v1228_v57, %v1110_v29  ;;  %v3037_v57 = vld [vmem:[#allocation5 + $0x420] sm:$0xf]  ;;  %v3039_v13 = vld [vmem:[#allocation5 + $0x428] sm:$0xf0] }
 0x350   :  { %v3038_v14 = vor.u32 %v3280_v58, %v3037_v57 }
 0x351   :  { %v1275_v31 = vadd.f32 %v3832_v16, %v1180_v15  ;;  %v1276_v32 = vadd.f32 %v3834_v18, %v1229_v12  ;;  %v3103_v15 = vld [vmem:[#allocation5 + $0x4a8] sm:$0xf0] }
 0x352   :  { %1998 = vmatpush.bf16.msrb.mxu2 %v3038_v14 }
 0x353   :  { %v1307_v41 = vmax.f32 %v1275_v31, 0.0  ;;  %v1308_v20 = vmax.f32 %v1276_v32, 0.0  ;;  %v3030_v31 = vor.u32 %v3278_v30, %v3029_v27  ;;  %v3093_v32 = vld [vmem:[#allocation5 + $0x490] sm:$0xf] }
 0x356   :  { %v1063_v33 = vpop.f32.mrf.mxu2  ;;  %v1112_v34 = vpop.f32.mrf.mxu3  ;;  %1999 = vmatpush.bf16.msrb.mxu2 %v3030_v31 }
 0x357   :  { %v1182_v36 = vadd.f32 %v1181_v1, %v1063_v33  ;;  %v1231_v35 = vadd.f32 %v1230_v2, %v1112_v34  ;;  %v3294_v33 = vld [vmem:[#allocation5 + $0x494] sm:$0xf0]  ;;  %v1196_v34 = vpop.f32.mrf.mxu0 }
 0x359   :  { %v1277_v39 = vadd.f32 %v3832_v16, %v1182_v36  ;;  %v1278_v40 = vadd.f32 %v3834_v18, %v1231_v35  ;;  %v3094_v35 = vor.u32 %v3294_v33, %v3093_v32 }
 0x35b   :  { %v1309_v42 = vmax.f32 %v1277_v39, 0.0  ;;  %v1310_v43 = vmax.f32 %v1278_v40, 0.0  ;;  %2048 = vmatpush.bf16.msrb.mxu3 %v3094_v35  ;;  %v3274_v35 = vld [vmem:[#allocation5 + $0x3f4] sm:$0xf0] }
 0x35d   :  { %v1339_v49 = vpack.c.bf16 %v1309_v42, %v1307_v41  ;;  %v1340_v50 = vpack.c.bf16 %v1310_v43, %v1308_v20 }
 0x35e   :  { %v1066_v51 = vpop.f32.mrf.mxu2  ;;  %v1115_v52 = vpop.f32.mrf.mxu3 }
 0x35f   :  { %1562 = vmatmul.bf16.vlgmr.msra.gmra.mxu2 %v1339_v49  ;;  %1611 = vmatmul.bf16.vlgmr.msra.gmra.mxu3 %v1340_v50  ;;  %v1185_v55 = vadd.f32 %v1184_v10, %v1066_v51  ;;  %v1234_v56 = vadd.f32 %v1233_v26, %v1115_v52  ;;  %v1243_v10 = vpop.f32.mrf.mxu1  ;;  %v3279_v26 = vld [vmem:[#allocation5 + $0x424] sm:$0xf]  ;;  %v3095_v51 = vld [vmem:[#allocation5 + $0x498] sm:$0xf0] }
 0x360   :  { %1660 = vmatmul.bf16.vlgmr.msrb.gmra.mxu0 %v1339_v49  ;;  %1709 = vmatmul.bf16.vlgmr.msrb.gmra.mxu1 %v1340_v50  ;;  %v3042_v29 = vor.u32 %v3279_v26, %v3039_v13  ;;  %v3031_v49 = vld [vmem:[#allocation5 + $0x418] sm:$0xf0] }
 0x361   :  { %v1279_v63 = vadd.f32 %v3832_v16, %v1185_v55  ;;  %v1280_v61 = vadd.f32 %v3834_v18, %v1234_v56  ;;  %v3034_v50 = vor.u32 %v3277_v48, %v3031_v49  ;;  %v3098_v56 = vor.u32 %v3293_v59, %v3095_v51  ;;  %v3273_v51 = vld [vmem:[#allocation5 + $0x3f4] sm:$0xf] }
 0x362   :  { %2096 = vmatpush.bf16.msra.mxu0 %v3042_v29 }
 0x363   :  { %v1311_v5 = vmax.f32 %v1279_v63, 0.0  ;;  %v1312_v6 = vmax.f32 %v1280_v61, 0.0  ;;  %v3022_v63 = vor.u32 %v3276_v62, %v3021_v60  ;;  %v3085_v61 = vld [vmem:[#allocation5 + $0x480] sm:$0xf] }
 0x365   :  { %2000 = vmatpush.bf16.msrb.mxu2 %v3022_v63 }
 0x366   :  { %v1068_v0 = vpop.f32.mrf.mxu2  ;;  %v1117_v22 = vpop.f32.mrf.mxu3  ;;  %2097 = vmatpush.bf16.msra.mxu0 %v3034_v50 }
 0x367   :  { %v1187_v1 = vadd.f32 %v1186_v11, %v1068_v0  ;;  %v1236_v2 = vadd.f32 %v1235_v3, %v1117_v22  ;;  %v3106_v11 = vor.u32 %v3295_v17, %v3103_v15  ;;  %v1245_v36 = vpop.f32.mrf.mxu1  ;;  %v3292_v0 = vld [vmem:[#allocation5 + $0x484] sm:$0xf0]  ;;  %v3275_v15 = vld [vmem:[#allocation5 + $0x404] sm:$0xf] }
 0x368   :  { %v3086_v22 = vor.u32 %v3292_v0, %v3085_v61  ;;  %v3005_v0 = vld [vmem:[#allocation5 + $0x3e0] sm:$0xf] }
 0x369   :  { %v1281_v28 = vadd.f32 %v3832_v16, %v1187_v1  ;;  %v1282_v4 = vadd.f32 %v3834_v18, %v1236_v2  ;;  %2145 = vmatpush.bf16.msra.mxu1 %v3106_v11  ;;  %v3291_v11 = vld [vmem:[#allocation5 + $0x484] sm:$0xf] }
 0x36a   :  { %2049 = vmatpush.bf16.msrb.mxu3 %v3086_v22  ;;  %v3272_v22 = vld [vmem:[#allocation5 + $0x3e4] sm:$0xf0] }
 0x36b   :  { %v1313_v7 = vmax.f32 %v1281_v28, 0.0  ;;  %v1314_v8 = vmax.f32 %v1282_v4, 0.0 }
 0x36d   :  { %v1341_v12 = vpack.c.bf16 %v1313_v7, %v1311_v5  ;;  %v1342_v19 = vpack.c.bf16 %v1314_v8, %v1312_v6  ;;  %2146 = vmatpush.bf16.msra.mxu1 %v3098_v56  ;;  %v3289_v56 = vld [vmem:[#allocation5 + $0x474] sm:$0xf] }
 0x36e   :  { %v1071_v3 = vpop.f32.mrf.mxu2  ;;  %v1120_v21 = vpop.f32.mrf.mxu3 }
 0x36f   :  { %1567 = vmatmul.bf16.gmra.mxu2 %v1341_v12  ;;  %1616 = vmatmul.bf16.gmra.mxu3 %v1342_v19  ;;  %v1190_v24 = vadd.f32 %v3838_v37, %v1071_v3  ;;  %v1239_v25 = vadd.f32 %v3840_v38, %v1120_v21  ;;  %v1248_v58 = vpop.f32.mrf.mxu1  ;;  %v3087_v3 = vld [vmem:[#allocation5 + $0x488] sm:$0xf0] }
 0x370   :  { %1665 = vmatmul.bf16.gmra.mxu0 %v1341_v12  ;;  %1714 = vmatmul.bf16.gmra.mxu1 %v1342_v19  ;;  %v3023_v12 = vld [vmem:[#allocation5 + $0x408] sm:$0xf0] }
 0x371   :  { %v1283_v39 = vadd.f32 %v3832_v16, %v1190_v24  ;;  %v1284_v40 = vadd.f32 %v3834_v18, %v1239_v25  ;;  %v3026_v19 = vor.u32 %v3275_v15, %v3023_v12  ;;  %v3090_v25 = vor.u32 %v3291_v11, %v3087_v3  ;;  %v3271_v3 = vld [vmem:[#allocation5 + $0x3e4] sm:$0xf] }
 0x373   :  { %v1315_v44 = vmax.f32 %v1283_v39, 0.0  ;;  %v1316_v45 = vmax.f32 %v1284_v40, 0.0  ;;  %2098 = vmatpush.bf16.msra.mxu0 %v3026_v19  ;;  %2147 = vmatpush.bf16.msra.mxu1 %v3090_v25  ;;  %v3077_v40 = vld [vmem:[#allocation5 + $0x470] sm:$0xf]  ;;  %v3287_v25 = vld [vmem:[#allocation5 + $0x464] sm:$0xf] }
 0x376   :  { %v1073_v41 = vpop.f32.mrf.mxu2  ;;  %v1122_v20 = vpop.f32.mrf.mxu3 }
 0x377   :  { %v1192_v42 = vadd.f32 %v1191_v53, %v1073_v41  ;;  %v1241_v43 = vadd.f32 %v1240_v54, %v1122_v20  ;;  %v1199_v54 = vpop.f32.mrf.mxu0  ;;  %v3290_v41 = vld [vmem:[#allocation5 + $0x474] sm:$0xf0] }
 0x378   :  { %v3078_v20 = vor.u32 %v3290_v41, %v3077_v40 }
 0x379   :  { %v1285_v37 = vadd.f32 %v3832_v16, %v1192_v42  ;;  %v1286_v38 = vadd.f32 %v3834_v18, %v1241_v43 }
 0x37a   :  { %2050 = vmatpush.bf16.msrb.mxu3 %v3078_v20 }
 0x37b   :  { %v1317_v46 = vmax.f32 %v1285_v37, 0.0  ;;  %v1318_v47 = vmax.f32 %v1286_v38, 0.0 }
 0x37d   :  { %v1343_v52 = vpack.c.bf16 %v1317_v46, %v1315_v44  ;;  %v1344_v55 = vpack.c.bf16 %v1318_v47, %v1316_v45 }
 0x37e   :  { %v1076_v57 = vpop.f32.mrf.mxu2  ;;  %v1125_v53 = vpop.f32.mrf.mxu3 }
 0x37f   :  { %1572 = vmatmul.bf16.gmra.mxu2 %v1343_v52  ;;  %1621 = vmatmul.bf16.gmra.mxu3 %v1344_v55  ;;  %v1195_v14 = vadd.f32 %v1194_v9, %v1076_v57  ;;  %v1244_v23 = vadd.f32 %v1243_v10, %v1125_v53  ;;  %v1201_v9 = vpop.f32.mrf.mxu0  ;;  %v1250_v10 = vpop.f32.mrf.mxu1  ;;  %v3079_v57 = vld [vmem:[#allocation5 + $0x478] sm:$0xf0] }
 0x380   :  { %1670 = vmatmul.bf16.gmra.mxu0 %v1343_v52  ;;  %1719 = vmatmul.bf16.gmra.mxu1 %v1344_v55  ;;  %v3015_v52 = vld [vmem:[#allocation5 + $0x3f8] sm:$0xf0] }
 0x381   :  { %v1287_v1 = vadd.f32 %v3832_v16, %v1195_v14  ;;  %v1288_v2 = vadd.f32 %v3834_v18, %v1244_v23  ;;  %v3018_v55 = vor.u32 %v3273_v51, %v3015_v52  ;;  %v3082_v23 = vor.u32 %v3289_v56, %v3079_v57 }
 0x383   :  { %v1319_v26 = vmax.f32 %v1287_v1, 0.0  ;;  %v1320_v13 = vmax.f32 %v1288_v2, 0.0  ;;  %2099 = vmatpush.bf16.msra.mxu0 %v3018_v55  ;;  %2148 = vmatpush.bf16.msra.mxu1 %v3082_v23  ;;  %v3006_v1 = vor.u32 %v3272_v22, %v3005_v0  ;;  %v3069_v2 = vld [vmem:[#allocation5 + $0x460] sm:$0xf]  ;;  %v3063_v0 = vld [vmem:[#allocation5 + $0x458] sm:$0xf0] }
 0x386   :  { %v1078_v28 = vpop.f32.mrf.mxu2  ;;  %v1127_v4 = vpop.f32.mrf.mxu3 }
 0x387   :  { %v1197_v5 = vadd.f32 %v1196_v34, %v1078_v28  ;;  %v1246_v6 = vadd.f32 %v1245_v36, %v1127_v4  ;;  %v1204_v33 = vpop.f32.mrf.mxu0  ;;  %v1253_v34 = vpop.f32.mrf.mxu1  ;;  %v3013_v36 = vld [vmem:[#allocation5 + $0x3f0] sm:$0xf]  ;;  %v3288_v28 = vld [vmem:[#allocation5 + $0x464] sm:$0xf0] }
 0x388   :  { %v3014_v39 = vor.u32 %v3274_v35, %v3013_v36  ;;  %v3070_v4 = vor.u32 %v3288_v28, %v3069_v2  ;;  %v2997_v36 = vld [vmem:[#allocation5 + $0x3d0] sm:$0xf]  ;;  %v3270_v35 = vld [vmem:[#allocation5 + $0x3d4] sm:$0xf0] }
 0x389   :  { %v1289_v7 = vadd.f32 %v3832_v16, %v1197_v5  ;;  %v1290_v8 = vadd.f32 %v3834_v18, %v1246_v6  ;;  %v2998_v20 = vor.u32 %v3270_v35, %v2997_v36  ;;  %v2991_v36 = vld [vmem:[#allocation5 + $0x3c8] sm:$0xf0] }
 0x38a   :  { %2001 = vmatpush.bf16.msrb.mxu2 %v3014_v39  ;;  %2051 = vmatpush.bf16.msrb.mxu3 %v3070_v4  ;;  %v3061_v39 = vld [vmem:[#allocation5 + $0x450] sm:$0xf] }
 0x38b   :  { %v1321_v29 = vmax.f32 %v1289_v7, 0.0  ;;  %v1322_v17 = vmax.f32 %v1290_v8, 0.0 }
 0x38d   :  { %v1345_v21 = vpack.c.bf16 %v1321_v29, %v1319_v26  ;;  %v1346_v24 = vpack.c.bf16 %v1322_v17, %v1320_v13 }
 0x38e   :  { %v1081_v27 = vpop.f32.mrf.mxu2  ;;  %v1130_v30 = vpop.f32.mrf.mxu3  ;;  %2002 = vmatpush.bf16.msrb.mxu2 %v3006_v1 }
 0x38f   :  { %1577 = vmatmul.bf16.gmra.mxu2 %v1345_v21  ;;  %1626 = vmatmul.bf16.gmra.mxu3 %v1346_v24  ;;  %v1200_v31 = vadd.f32 %v1199_v54, %v1081_v27  ;;  %v1249_v32 = vadd.f32 %v1248_v58, %v1130_v30  ;;  %v1206_v53 = vpop.f32.mrf.mxu0  ;;  %v1255_v14 = vpop.f32.mrf.mxu1  ;;  %v3071_v27 = vld [vmem:[#allocation5 + $0x468] sm:$0xf0] }
 0x390   :  { %1675 = vmatmul.bf16.gmra.mxu0 %v1345_v21  ;;  %1724 = vmatmul.bf16.gmra.mxu1 %v1346_v24  ;;  %v3007_v21 = vld [vmem:[#allocation5 + $0x3e8] sm:$0xf0] }
 0x391   :  { %v1291_v42 = vadd.f32 %v3832_v16, %v1200_v31  ;;  %v1292_v43 = vadd.f32 %v3834_v18, %v1249_v32  ;;  %v3010_v24 = vor.u32 %v3271_v3, %v3007_v21  ;;  %v3074_v32 = vor.u32 %v3287_v25, %v3071_v27  ;;  %v3055_v21 = vld [vmem:[#allocation5 + $0x448] sm:$0xf0] }
 0x392   :  { %2003 = vmatpush.bf16.msrb.mxu2 %v2998_v20 }
 0x393   :  { %v1323_v48 = vmax.f32 %v1291_v42, 0.0  ;;  %v1324_v49 = vmax.f32 %v1292_v43, 0.0  ;;  %2100 = vmatpush.bf16.msra.mxu0 %v3010_v24  ;;  %2149 = vmatpush.bf16.msra.mxu1 %v3074_v32  ;;  %v3286_v42 = vld [vmem:[#allocation5 + $0x454] sm:$0xf0]  ;;  %v3269_v43 = vld [vmem:[#allocation5 + $0x3d4] sm:$0xf] }
 0x396   :  { %v1083_v37 = vpop.f32.mrf.mxu2  ;;  %v1132_v38 = vpop.f32.mrf.mxu3 }
 0x397   :  { %v1202_v44 = vadd.f32 %v1201_v9, %v1083_v37  ;;  %v1251_v45 = vadd.f32 %v1250_v10, %v1132_v38  ;;  %v1209_v26 = vpop.f32.mrf.mxu0  ;;  %v1258_v13 = vpop.f32.mrf.mxu1  ;;  %v2999_v37 = vld [vmem:[#allocation5 + $0x3d8] sm:$0xf0]  ;;  %v3062_v38 = vor.u32 %v3286_v42, %v3061_v39 }
 0x399   :  { %v1293_v46 = vadd.f32 %v3832_v16, %v1202_v44  ;;  %v1294_v47 = vadd.f32 %v3834_v18, %v1251_v45  ;;  %v3002_v44 = vor.u32 %v3269_v43, %v2999_v37  ;;  %2052 = vmatpush.bf16.msrb.mxu3 %v3062_v38 }
 0x39b   :  { %v1325_v50 = vmax.f32 %v1293_v46, 0.0  ;;  %v1326_v59 = vmax.f32 %v1294_v47, 0.0  ;;  %2101 = vmatpush.bf16.msra.mxu0 %v3002_v44 }
 0x39d   :  { %v1347_v54 = vpack.c.bf16 %v1325_v50, %v1323_v48  ;;  %v1348_v58 = vpack.c.bf16 %v1326_v59, %v1324_v49 }
 0x39e   :  { %v1086_v60 = vpop.f32.mrf.mxu2  ;;  %v1135_v62 = vpop.f32.mrf.mxu3 }
 0x39f   :  { %1582 = vmatmul.bf16.gmra.mxu2 %v1347_v54  ;;  %1631 = vmatmul.bf16.gmra.mxu3 %v1348_v58  ;;  %v1205_v63 = vadd.f32 %v1204_v33, %v1086_v60  ;;  %v1254_v61 = vadd.f32 %v1253_v34, %v1135_v62  ;;  %v1211_v40 = vpop.f32.mrf.mxu0  ;;  %v1260_v41 = vpop.f32.mrf.mxu1 }
 0x3a0   :  { %1680 = vmatmul.bf16.gmra.mxu0 %v1347_v54  ;;  %1729 = vmatmul.bf16.gmra.mxu1 %v1348_v58 }
 0x3a1   :  { %v1295_v5 = vadd.f32 %v3832_v16, %v1205_v63  ;;  %v1296_v6 = vadd.f32 %v3834_v18, %v1254_v61  ;;  %v3285_v61 = vld [vmem:[#allocation5 + $0x454] sm:$0xf] }
 0x3a2   :  { %v3066_v2 = vor.u32 %v3285_v61, %v3063_v0 }
 0x3a3   :  { %v1327_v15 = vmax.f32 %v1295_v5, 0.0  ;;  %v1328_v12 = vmax.f32 %v1296_v6, 0.0 }
 0x3a4   :  { %2150 = vmatpush.bf16.msra.mxu1 %v3066_v2 }
 0x3a6   :  { %v1088_v7 = vpop.f32.mrf.mxu2  ;;  %v1137_v8 = vpop.f32.mrf.mxu3 }
 0x3a7   :  { %v1207_v9 = vadd.f32 %v1206_v53, %v1088_v7  ;;  %v1256_v10 = vadd.f32 %v1255_v14, %v1137_v8  ;;  %v1214_v58 = vpop.f32.mrf.mxu0  ;;  %v1263_v14 = vpop.f32.mrf.mxu1 }
 0x3a9   :  { %v1297_v29 = vadd.f32 %v3832_v16, %v1207_v9  ;;  %v1298_v17 = vadd.f32 %v3834_v18, %v1256_v10 }
 0x3ab   :  { %v1329_v19 = vmax.f32 %v1297_v29, 0.0  ;;  %v1330_v11 = vmax.f32 %v1298_v17, 0.0  ;;  %v3053_v17 = vld [vmem:[#allocation5 + $0x440] sm:$0xf] }
 0x3ad   :  { %v1349_v30 = vpack.c.bf16 %v1329_v19, %v1327_v15  ;;  %v1350_v31 = vpack.c.bf16 %v1330_v11, %v1328_v12  ;;  %v3284_v15 = vld [vmem:[#allocation5 + $0x444] sm:$0xf0]  ;;  %v3283_v12 = vld [vmem:[#allocation5 + $0x444] sm:$0xf] }
 0x3ae   :  { %v1091_v33 = vpop.f32.mrf.mxu2  ;;  %v1140_v34 = vpop.f32.mrf.mxu3  ;;  %v3054_v3 = vor.u32 %v3284_v15, %v3053_v17  ;;  %v3058_v24 = vor.u32 %v3283_v12, %v3055_v21  ;;  %v3305_v17 = vld [vmem:[#allocation5 + $0x524] sm:$0xf0] }
 0x3af   :  { %1587 = vmatmul.bf16.gmra.mxu2 %v1349_v30  ;;  %1636 = vmatmul.bf16.gmra.mxu3 %v1350_v31  ;;  %v1210_v45 = vadd.f32 %v1209_v26, %v1091_v33  ;;  %v1259_v46 = vadd.f32 %v1258_v13, %v1140_v34  ;;  %v1216_v28 = vpop.f32.mrf.mxu0  ;;  %v1265_v4 = vpop.f32.mrf.mxu1  ;;  %v2989_v26 = vld [vmem:[#allocation5 + $0x3c0] sm:$0xf]  ;;  %v3268_v13 = vld [vmem:[#allocation5 + $0x3c4] sm:$0xf0]  ;;  %v3267_v34 = vld [vmem:[#allocation5 + $0x3c4] sm:$0xf] }
 0x3b0   :  { %1685 = vmatmul.bf16.gmra.mxu0 %v1349_v30  ;;  %1734 = vmatmul.bf16.gmra.mxu1 %v1350_v31  ;;  %v2990_v29 = vor.u32 %v3268_v13, %v2989_v26  ;;  %v2994_v35 = vor.u32 %v3267_v34, %v2991_v36 }
 0x3b1   :  { %v1299_v49 = vadd.f32 %v3832_v16, %v1210_v45  ;;  %v1300_v50 = vadd.f32 %v3834_v18, %v1259_v46  ;;  %2053 = vmatpush.bf16.msrb.mxu3 %v3054_v3  ;;  %2151 = vmatpush.bf16.msra.mxu1 %v3058_v24  ;;  %v3313_v3 = vld [vmem:[#allocation5 + $0x5a4] sm:$0xf0] }
 0x3b2   :  { %2004 = vmatpush.bf16.msrb.mxu2 %v2990_v29  ;;  %2102 = vmatpush.bf16.msra.mxu0 %v2994_v35  ;;  %v3141_v29 = vld [vmem:[#allocation5 + $0x520] sm:$0xf] }
 0x3b3   :  { %v1331_v56 = vmax.f32 %v1299_v49, 0.0  ;;  %v1332_v57 = vmax.f32 %v1300_v50, 0.0 }
 0x3b6   :  { %v1093_v47 = vpop.f32.mrf.mxu2  ;;  %v1142_v48 = vpop.f32.mrf.mxu3 }
 0x3b7   :  { %v1212_v59 = vadd.f32 %v1211_v40, %v1093_v47  ;;  %v1261_v51 = vadd.f32 %v1260_v41, %v1142_v48 }
 0x3b9   :  { %v1301_v52 = vadd.f32 %v3832_v16, %v1212_v59  ;;  %v1302_v55 = vadd.f32 %v3834_v18, %v1261_v51  ;;  %v3145_v51 = vld [vmem:[#allocation5 + $0x530] sm:$0xf] }
 0x3bb   :  { %v1333_v53 = vmax.f32 %v1301_v52, 0.0  ;;  %v1334_v54 = vmax.f32 %v1302_v55, 0.0  ;;  %v3306_v52 = vld [vmem:[#allocation5 + $0x534] sm:$0xf0] }
 0x3bd   :  { %v1351_v23 = vpack.c.bf16 %v1333_v53, %v1331_v56  ;;  %v1352_v60 = vpack.c.bf16 %v1334_v54, %v1332_v57  ;;  %v3146_v57 = vor.u32 %v3306_v52, %v3145_v51  ;;  %v3177_v53 = vld [vmem:[#allocation5 + $0x5b0] sm:$0xf]  ;;  %v3314_v54 = vld [vmem:[#allocation5 + $0x5b4] sm:$0xf0] }
 0x3be   :  { %v1096_v62 = vpop.f32.mrf.mxu2  ;;  %v1145_v63 = vpop.f32.mrf.mxu3 }
 0x3bf   :  { %1592 = vmatmul.bf16.gmra.mxu2 %v1351_v23  ;;  %1641 = vmatmul.bf16.gmra.mxu3 %v1352_v60  ;;  %v1215_v22 = vadd.f32 %v1214_v58, %v1096_v62  ;;  %v1264_v1 = vadd.f32 %v1263_v14, %v1145_v63  ;;  %v3178_v14 = vor.u32 %v3314_v54, %v3177_v53 }
 0x3c0   :  { %1690 = vmatmul.bf16.gmra.mxu0 %v1351_v23  ;;  %1739 = vmatmul.bf16.gmra.mxu1 %v1352_v60 }
 0x3c1   :  { %v1303_v7 = vadd.f32 %v3832_v16, %v1215_v22  ;;  %v1304_v8 = vadd.f32 %v3834_v18, %v1264_v1  ;;  %2370 = vmatpush.bf16.msra.mxu2 %v3146_v57  ;;  %2419 = vmatpush.bf16.msra.mxu3 %v3178_v14  ;;  %v3312_v57 = vld [vmem:[#allocation5 + $0x594] sm:$0xf0] }
 0x3c3   :  { %v1335_v25 = vmax.f32 %v1303_v7, 0.0  ;;  %v1336_v27 = vmax.f32 %v1304_v8, 0.0 }
 0x3c6   :  { %v1098_v5 = vpop.f32.mrf.mxu2  ;;  %v1147_v6 = vpop.f32.mrf.mxu3 }
 0x3c7   :  { %v1217_v9 = vadd.f32 %v1216_v28, %v1098_v5  ;;  %v1266_v10 = vadd.f32 %v1265_v4, %v1147_v6 }
 0x3c9   :  { %v1305_v19 = vadd.f32 %v3832_v16, %v1217_v9  ;;  %v1306_v11 = vadd.f32 %v3834_v18, %v1266_v10  ;;  %v2857_v16 = vld [vmem:[%s3980_s4 + $0x5] ss:$8 sm:$0x3] }
 0x3ca   :  { %v3877_v40 = vperm.slane %v2857_v16, 1  ;;  %v3880_v43 = vperm.slane %v2857_v16, 0 }
 0x3cb   :  { %v1337_v30 = vmax.f32 %v1305_v19, 0.0  ;;  %v1338_v31 = vmax.f32 %v1306_v11, 0.0  ;;  %v3142_v19 = vor.u32 %v3305_v17, %v3141_v29  ;;  %v3173_v11 = vld [vmem:[#allocation5 + $0x5a0] sm:$0xf] }
 0x3cc   :  { %v3174_v24 = vor.u32 %v3313_v3, %v3173_v11 }
 0x3cd   :  { %v1353_v32 = vpack.c.bf16 %v1337_v30, %v1335_v25  ;;  %v1354_v33 = vpack.c.bf16 %v1338_v31, %v1336_v27  ;;  %2371 = vmatpush.bf16.msra.mxu2 %v3142_v19  ;;  %v3311_v19 = vld [vmem:[#allocation5 + $0x584] sm:$0xf0] }
 0x3ce   :  { %2420 = vmatpush.bf16.msra.mxu3 %v3174_v24 }
 0x3cf   :  { %1597 = vmatmul.bf16.gmra.mxu2 %v1353_v32  ;;  %1646 = vmatmul.bf16.gmra.mxu3 %v1354_v33 }
 0x3d0   :  { %1695 = vmatmul.bf16.gmra.mxu0 %v1353_v32  ;;  %1744 = vmatmul.bf16.gmra.mxu1 %v1354_v33 }
 0x3dd   :  { %v1661_v18 = vpop.f32.mrf.mxu0  ;;  %v1710_v39 = vpop.f32.mrf.mxu1 }
 0x3de   :  { %v1662_v41 = vadd.f32 %v1661_v18, %v3877_v40 }
 0x3e0   :  { %v1711_v44 = vadd.f32 %v1710_v39, %v1662_v41 }
 0x3e2   :  { %v1563_v20 = vpop.f32.mrf.mxu2  ;;  %v1612_v42 = vpop.f32.mrf.mxu3  ;;  %v1751_v48 = vmax.f32 %v1711_v44, 0.0 }
 0x3e3   :  { %v1564_v46 = vadd.f32 %v1563_v20, %v3880_v43 }
 0x3e5   :  { %v1663_v37 = vpop.f32.mrf.mxu0  ;;  %v1712_v38 = vpop.f32.mrf.mxu1  ;;  %v1613_v55 = vadd.f32 %v1612_v42, %v1564_v46 }
 0x3e6   :  { %v1664_v45 = vadd.f32 %v1663_v37, %v3877_v40 }
 0x3e7   :  { %v1750_v63 = vmax.f32 %v1613_v55, 0.0 }
 0x3e8   :  { %v1713_v47 = vadd.f32 %v1712_v38, %v1664_v45 }
 0x3ea   :  { %v1753_v49 = vmax.f32 %v1713_v47, 0.0  ;;  %v1565_v50 = vpop.f32.mrf.mxu2  ;;  %v1614_v59 = vpop.f32.mrf.mxu3 }
 0x3eb   :  { %v1566_v56 = vadd.f32 %v1565_v50, %v3880_v43  ;;  %v3304_v50 = vld [vmem:[#allocation5 + $0x514] sm:$0xf0] }
 0x3ec   :  { %v1783_v58 = vpack.c.bf16 %v1753_v49, %v1751_v48  ;;  %v3137_v49 = vld [vmem:[#allocation5 + $0x510] sm:$0xf] }
 0x3ed   :  { %v1615_v23 = vadd.f32 %v1614_v59, %v1566_v56  ;;  %v1666_v60 = vpop.f32.mrf.mxu0  ;;  %v1715_v62 = vpop.f32.mrf.mxu1  ;;  %v3169_v59 = vld [vmem:[#allocation5 + $0x590] sm:$0xf]  ;;  %v3138_v56 = vor.u32 %v3304_v50, %v3137_v49  ;;  %v3310_v50 = vld [vmem:[#allocation5 + $0x574] sm:$0xf0] }
 0x3ee   :  { %2054 = vmatmul.bf16.vlgmr.msrb.gmra.mxu3 %v1783_v58  ;;  %2152 = vmatmul.bf16.vlgmr.msra.gmra.mxu1 %v1783_v58  ;;  %v1667_v22 = vadd.f32 %v1666_v60, %v3877_v40  ;;  %v3170_v53 = vor.u32 %v3312_v57, %v3169_v59 }
 0x3ef   :  { %v1752_v61 = vmax.f32 %v1615_v23, 0.0  ;;  %2372 = vmatpush.bf16.msra.mxu2 %v3138_v56 }
 0x3f0   :  { %v1716_v5 = vadd.f32 %v1715_v62, %v1667_v22  ;;  %2421 = vmatpush.bf16.msra.mxu3 %v3170_v53 }
 0x3f1   :  { %v1782_v0 = vpack.c.bf16 %v1752_v61, %v1750_v63 }
 0x3f2   :  { %v1568_v1 = vpop.f32.mrf.mxu2  ;;  %v1617_v2 = vpop.f32.mrf.mxu3  ;;  %v1755_v9 = vmax.f32 %v1716_v5, 0.0 }
 0x3f3   :  { %2005 = vmatmul.bf16.vlgmr.msrb.gmra.mxu2 %v1782_v0  ;;  %2103 = vmatmul.bf16.vlgmr.msra.gmra.mxu0 %v1782_v0  ;;  %v1569_v7 = vadd.f32 %v1568_v1, %v3880_v43 }
 0x3f5   :  { %v1668_v28 = vpop.f32.mrf.mxu0  ;;  %v1717_v4 = vpop.f32.mrf.mxu1  ;;  %v1618_v15 = vadd.f32 %v1617_v2, %v1569_v7 }
 0x3f6   :  { %v1669_v6 = vadd.f32 %v1668_v28, %v3877_v40 }
 0x3f7   :  { %v1754_v31 = vmax.f32 %v1618_v15, 0.0 }
 0x3f8   :  { %v1718_v8 = vadd.f32 %v1717_v4, %v1669_v6 }
 0x3fa   :  { %v1757_v10 = vmax.f32 %v1718_v8, 0.0  ;;  %v1570_v26 = vpop.f32.mrf.mxu2  ;;  %v1619_v13 = vpop.f32.mrf.mxu3 }
 0x3fb   :  { %v1571_v12 = vadd.f32 %v1570_v26, %v3880_v43  ;;  %v3303_v26 = vld [vmem:[#allocation5 + $0x504] sm:$0xf0] }
 0x3fc   :  { %v1785_v21 = vpack.c.bf16 %v1757_v10, %v1755_v9  ;;  %v3133_v10 = vld [vmem:[#allocation5 + $0x500] sm:$0xf] }
 0x3fd   :  { %v1620_v25 = vadd.f32 %v1619_v13, %v1571_v12  ;;  %v1671_v27 = vpop.f32.mrf.mxu0  ;;  %v1720_v30 = vpop.f32.mrf.mxu1  ;;  %v3165_v13 = vld [vmem:[#allocation5 + $0x580] sm:$0xf]  ;;  %v3134_v12 = vor.u32 %v3303_v26, %v3133_v10  ;;  %v3309_v26 = vld [vmem:[#allocation5 + $0x564] sm:$0xf0] }
 0x3fe   :  { %2059 = vmatmul.bf16.gmra.mxu3 %v1785_v21  ;;  %2157 = vmatmul.bf16.gmra.mxu1 %v1785_v21  ;;  %v1672_v34 = vadd.f32 %v1671_v27, %v3877_v40  ;;  %v3166_v11 = vor.u32 %v3311_v19, %v3165_v13 }
 0x3ff   :  { %v1756_v32 = vmax.f32 %v1620_v25, 0.0  ;;  %2373 = vmatpush.bf16.msra.mxu2 %v3134_v12 }
 0x400   :  { %v1721_v39 = vadd.f32 %v1720_v30, %v1672_v34  ;;  %2422 = vmatpush.bf16.msra.mxu3 %v3166_v11 }
 0x401   :  { %v1784_v33 = vpack.c.bf16 %v1756_v32, %v1754_v31 }
 0x402   :  { %v1573_v36 = vpop.f32.mrf.mxu2  ;;  %v1622_v35 = vpop.f32.mrf.mxu3  ;;  %v1759_v37 = vmax.f32 %v1721_v39, 0.0 }
 0x403   :  { %2010 = vmatmul.bf16.gmra.mxu2 %v1784_v33  ;;  %2108 = vmatmul.bf16.gmra.mxu0 %v1784_v33  ;;  %v1574_v20 = vadd.f32 %v1573_v36, %v3880_v43 }
 0x405   :  { %v1673_v16 = vpop.f32.mrf.mxu0  ;;  %v1722_v18 = vpop.f32.mrf.mxu1  ;;  %v1623_v46 = vadd.f32 %v1622_v35, %v1574_v20 }
 0x406   :  { %v1674_v41 = vadd.f32 %v1673_v16, %v3877_v40 }
 0x407   :  { %v1758_v54 = vmax.f32 %v1623_v46, 0.0 }
 0x408   :  { %v1723_v42 = vadd.f32 %v1722_v18, %v1674_v41 }
 0x40a   :  { %v1761_v38 = vmax.f32 %v1723_v42, 0.0  ;;  %v1575_v44 = vpop.f32.mrf.mxu2  ;;  %v1624_v45 = vpop.f32.mrf.mxu3 }
 0x40b   :  { %v1576_v47 = vadd.f32 %v1575_v44, %v3880_v43  ;;  %v3302_v44 = vld [vmem:[#allocation5 + $0x4f4] sm:$0xf0] }
 0x40c   :  { %v1787_v48 = vpack.c.bf16 %v1761_v38, %v1759_v37  ;;  %v3129_v38 = vld [vmem:[#allocation5 + $0x4f0] sm:$0xf] }
 0x40d   :  { %v1625_v51 = vadd.f32 %v1624_v45, %v1576_v47  ;;  %v1676_v52 = vpop.f32.mrf.mxu0  ;;  %v1725_v55 = vpop.f32.mrf.mxu1  ;;  %v3161_v45 = vld [vmem:[#allocation5 + $0x570] sm:$0xf]  ;;  %v3130_v49 = vor.u32 %v3302_v44, %v3129_v38 }
 0x40e   :  { %2064 = vmatmul.bf16.gmra.mxu3 %v1787_v48  ;;  %2162 = vmatmul.bf16.gmra.mxu1 %v1787_v48  ;;  %v1677_v23 = vadd.f32 %v1676_v52, %v3877_v40  ;;  %v3162_v59 = vor.u32 %v3310_v50, %v3161_v45 }
 0x40f   :  { %v1760_v58 = vmax.f32 %v1625_v51, 0.0  ;;  %2374 = vmatpush.bf16.msra.mxu2 %v3130_v49 }
 0x410   :  { %v1726_v0 = vadd.f32 %v1725_v55, %v1677_v23  ;;  %2423 = vmatpush.bf16.msra.mxu3 %v3162_v59 }
 0x411   :  { %v1786_v14 = vpack.c.bf16 %v1760_v58, %v1758_v54 }
 0x412   :  { %v1578_v60 = vpop.f32.mrf.mxu2  ;;  %v1627_v62 = vpop.f32.mrf.mxu3  ;;  %v1763_v28 = vmax.f32 %v1726_v0, 0.0 }
 0x413   :  { %2015 = vmatmul.bf16.gmra.mxu2 %v1786_v14  ;;  %2113 = vmatmul.bf16.gmra.mxu0 %v1786_v14  ;;  %v1579_v1 = vadd.f32 %v1578_v60, %v3880_v43 }
 0x415   :  { %v1678_v63 = vpop.f32.mrf.mxu0  ;;  %v1727_v61 = vpop.f32.mrf.mxu1  ;;  %v1628_v7 = vadd.f32 %v1627_v62, %v1579_v1 }
 0x416   :  { %v1679_v22 = vadd.f32 %v1678_v63, %v3877_v40 }
 0x417   :  { %v1762_v3 = vmax.f32 %v1628_v7, 0.0 }
 0x418   :  { %v1728_v2 = vadd.f32 %v1727_v61, %v1679_v22 }
 0x41a   :  { %v1765_v4 = vmax.f32 %v1728_v2, 0.0  ;;  %v1580_v5 = vpop.f32.mrf.mxu2  ;;  %v1629_v6 = vpop.f32.mrf.mxu3 }
 0x41b   :  { %v1581_v8 = vadd.f32 %v1580_v5, %v3880_v43  ;;  %v3301_v5 = vld [vmem:[#allocation5 + $0x4e4] sm:$0xf0] }
 0x41c   :  { %v1789_v9 = vpack.c.bf16 %v1765_v4, %v1763_v28  ;;  %v3125_v4 = vld [vmem:[#allocation5 + $0x4e0] sm:$0xf] }
 0x41d   :  { %v1630_v29 = vadd.f32 %v1629_v6, %v1581_v8  ;;  %v1681_v17 = vpop.f32.mrf.mxu0  ;;  %v1730_v15 = vpop.f32.mrf.mxu1  ;;  %v3157_v6 = vld [vmem:[#allocation5 + $0x560] sm:$0xf]  ;;  %v3126_v10 = vor.u32 %v3301_v5, %v3125_v4 }
 0x41e   :  { %2069 = vmatmul.bf16.gmra.mxu3 %v1789_v9  ;;  %2167 = vmatmul.bf16.gmra.mxu1 %v1789_v9  ;;  %v1682_v25 = vadd.f32 %v1681_v17, %v3877_v40  ;;  %v3158_v13 = vor.u32 %v3309_v26, %v3157_v6 }
 0x41f   :  { %v1764_v21 = vmax.f32 %v1630_v29, 0.0  ;;  %2375 = vmatpush.bf16.msra.mxu2 %v3126_v10 }
 0x420   :  { %v1731_v33 = vadd.f32 %v1730_v15, %v1682_v25  ;;  %2424 = vmatpush.bf16.msra.mxu3 %v3158_v13 }
 0x421   :  { %v1788_v24 = vpack.c.bf16 %v1764_v21, %v1762_v3  ;;  %v3121_v3 = vld [vmem:[#allocation5 + $0x4d0] sm:$0xf]  ;;  %v3300_v21 = vld [vmem:[#allocation5 + $0x4d4] sm:$0xf0] }
 0x422   :  { %v1583_v27 = vpop.f32.mrf.mxu2  ;;  %v1632_v30 = vpop.f32.mrf.mxu3  ;;  %v1767_v16 = vmax.f32 %v1731_v33, 0.0  ;;  %v3122_v25 = vor.u32 %v3300_v21, %v3121_v3 }
 0x423   :  { %2020 = vmatmul.bf16.gmra.mxu2 %v1788_v24  ;;  %2118 = vmatmul.bf16.gmra.mxu0 %v1788_v24  ;;  %v1584_v36 = vadd.f32 %v1583_v27, %v3880_v43  ;;  %v3153_v24 = vld [vmem:[#allocation5 + $0x550] sm:$0xf]  ;;  %v3308_v27 = vld [vmem:[#allocation5 + $0x554] sm:$0xf0] }
 0x424   :  { %2376 = vmatpush.bf16.msra.mxu2 %v3122_v25 }
 0x425   :  { %v1683_v31 = vpop.f32.mrf.mxu0  ;;  %v1732_v32 = vpop.f32.mrf.mxu1  ;;  %v1633_v20 = vadd.f32 %v1632_v30, %v1584_v36 }
 0x426   :  { %v1684_v34 = vadd.f32 %v1683_v31, %v3877_v40 }
 0x427   :  { %v1766_v51 = vmax.f32 %v1633_v20, 0.0 }
 0x428   :  { %v1733_v35 = vadd.f32 %v1732_v32, %v1684_v34  ;;  %v3154_v32 = vor.u32 %v3308_v27, %v3153_v24 }
 0x42a   :  { %v1769_v18 = vmax.f32 %v1733_v35, 0.0  ;;  %v1585_v39 = vpop.f32.mrf.mxu2  ;;  %v1634_v41 = vpop.f32.mrf.mxu3  ;;  %2425 = vmatpush.bf16.msra.mxu3 %v3154_v32 }
 0x42b   :  { %v1586_v42 = vadd.f32 %v1585_v39, %v3880_v43 }
 0x42c   :  { %v1791_v37 = vpack.c.bf16 %v1769_v18, %v1767_v16 }
 0x42d   :  { %v1635_v46 = vadd.f32 %v1634_v41, %v1586_v42  ;;  %v1686_v47 = vpop.f32.mrf.mxu0  ;;  %v1735_v48 = vpop.f32.mrf.mxu1 }
 0x42e   :  { %2074 = vmatmul.bf16.gmra.mxu3 %v1791_v37  ;;  %2172 = vmatmul.bf16.gmra.mxu1 %v1791_v37  ;;  %v1687_v56 = vadd.f32 %v1686_v47, %v3877_v40 }
 0x42f   :  { %v1768_v52 = vmax.f32 %v1635_v46, 0.0 }
 0x430   :  { %v1736_v14 = vadd.f32 %v1735_v48, %v1687_v56 }
 0x431   :  { %v1790_v55 = vpack.c.bf16 %v1768_v52, %v1766_v51 }
 0x432   :  { %v1588_v57 = vpop.f32.mrf.mxu2  ;;  %v1637_v53 = vpop.f32.mrf.mxu3  ;;  %v1771_v63 = vmax.f32 %v1736_v14, 0.0 }
 0x433   :  { %2025 = vmatmul.bf16.gmra.mxu2 %v1790_v55  ;;  %2123 = vmatmul.bf16.gmra.mxu0 %v1790_v55  ;;  %v1589_v60 = vadd.f32 %v1588_v57, %v3880_v43 }
 0x435   :  { %v1688_v54 = vpop.f32.mrf.mxu0  ;;  %v1737_v58 = vpop.f32.mrf.mxu1  ;;  %v1638_v1 = vadd.f32 %v1637_v53, %v1589_v60 }
 0x436   :  { %v1689_v23 = vadd.f32 %v1688_v54, %v3877_v40 }
 0x437   :  { %v1770_v29 = vmax.f32 %v1638_v1, 0.0  ;;  %v3149_v1 = vld [vmem:[#allocation5 + $0x540] sm:$0xf] }
 0x438   :  { %v1738_v62 = vadd.f32 %v1737_v58, %v1689_v23 }
 0x43a   :  { %v1773_v61 = vmax.f32 %v1738_v62, 0.0  ;;  %v1590_v0 = vpop.f32.mrf.mxu2  ;;  %v1639_v22 = vpop.f32.mrf.mxu3  ;;  %v3117_v62 = vld [vmem:[#allocation5 + $0x4c0] sm:$0xf] }
 0x43b   :  { %v1591_v2 = vadd.f32 %v1590_v0, %v3880_v43 }
 0x43c   :  { %v1793_v28 = vpack.c.bf16 %v1773_v61, %v1771_v63  ;;  %v3299_v63 = vld [vmem:[#allocation5 + $0x4c4] sm:$0xf0] }
 0x43d   :  { %v1640_v7 = vadd.f32 %v1639_v22, %v1591_v2  ;;  %v1691_v8 = vpop.f32.mrf.mxu0  ;;  %v1740_v9 = vpop.f32.mrf.mxu1  ;;  %v3118_v22 = vor.u32 %v3299_v63, %v3117_v62  ;;  %v3307_v2 = vld [vmem:[#allocation5 + $0x544] sm:$0xf0] }
 0x43e   :  { %2079 = vmatmul.bf16.gmra.mxu3 %v1793_v28  ;;  %2177 = vmatmul.bf16.gmra.mxu1 %v1793_v28  ;;  %v1692_v12 = vadd.f32 %v1691_v8, %v3877_v40  ;;  %v3150_v4 = vor.u32 %v3307_v2, %v3149_v1 }
 0x43f   :  { %v1772_v17 = vmax.f32 %v1640_v7, 0.0  ;;  %2377 = vmatpush.bf16.msra.mxu2 %v3118_v22 }
 0x440   :  { %v1741_v33 = vadd.f32 %v1740_v9, %v1692_v12  ;;  %2426 = vmatpush.bf16.msra.mxu3 %v3150_v4 }
 0x441   :  { %v1792_v15 = vpack.c.bf16 %v1772_v17, %v1770_v29 }
 0x442   :  { %v1593_v19 = vpop.f32.mrf.mxu2  ;;  %v1642_v11 = vpop.f32.mrf.mxu3  ;;  %v1775_v16 = vmax.f32 %v1741_v33, 0.0 }
 0x443   :  { %2030 = vmatmul.bf16.gmra.mxu2 %v1792_v15  ;;  %2128 = vmatmul.bf16.gmra.mxu0 %v1792_v15  ;;  %v1594_v36 = vadd.f32 %v1593_v19, %v3880_v43 }
 0x445   :  { %v1693_v30 = vpop.f32.mrf.mxu0  ;;  %v1742_v31 = vpop.f32.mrf.mxu1  ;;  %v1643_v20 = vadd.f32 %v1642_v11, %v1594_v36 }
 0x446   :  { %v1694_v34 = vadd.f32 %v1693_v30, %v3877_v40 }
 0x447   :  { %v1774_v46 = vmax.f32 %v1643_v20, 0.0 }
 0x448   :  { %v1743_v35 = vadd.f32 %v1742_v31, %v1694_v34 }
 0x44a   :  { %v1777_v18 = vmax.f32 %v1743_v35, 0.0  ;;  %v1595_v39 = vpop.f32.mrf.mxu2  ;;  %v1644_v41 = vpop.f32.mrf.mxu3 }
 0x44b   :  { %v1596_v42 = vadd.f32 %v1595_v39, %v3880_v43 }
 0x44c   :  { %v1795_v37 = vpack.c.bf16 %v1777_v18, %v1775_v16 }
 0x44d   :  { %v1645_v38 = vadd.f32 %v1644_v41, %v1596_v42  ;;  %v1696_v44 = vpop.f32.mrf.mxu0  ;;  %v1745_v45 = vpop.f32.mrf.mxu1 }
 0x44e   :  { %2084 = vmatmul.bf16.gmra.mxu3 %v1795_v37  ;;  %2182 = vmatmul.bf16.gmra.mxu1 %v1795_v37  ;;  %v1697_v49 = vadd.f32 %v1696_v44, %v3877_v40 }
 0x44f   :  { %v1776_v47 = vmax.f32 %v1645_v38, 0.0 }
 0x450   :  { %v1746_v52 = vadd.f32 %v1745_v45, %v1697_v49 }
 0x451   :  { %v1794_v48 = vpack.c.bf16 %v1776_v47, %v1774_v46 }
 0x452   :  { %v1598_v50 = vpop.f32.mrf.mxu2  ;;  %v1647_v59 = vpop.f32.mrf.mxu3  ;;  %v1779_v54 = vmax.f32 %v1746_v52, 0.0 }
 0x453   :  { %2035 = vmatmul.bf16.gmra.mxu2 %v1794_v48  ;;  %2133 = vmatmul.bf16.gmra.mxu0 %v1794_v48  ;;  %v1599_v56 = vadd.f32 %v1598_v50, %v3880_v43 }
 0x455   :  { %v1698_v51 = vpop.f32.mrf.mxu0  ;;  %v1747_v57 = vpop.f32.mrf.mxu1  ;;  %v1648_v23 = vadd.f32 %v1647_v59, %v1599_v56 }
 0x456   :  { %v1699_v55 = vadd.f32 %v1698_v51, %v3877_v40 }
 0x457   :  { %v1778_v40 = vmax.f32 %v1648_v23, 0.0 }
 0x458   :  { %v1748_v53 = vadd.f32 %v1747_v57, %v1699_v55 }
 0x45a   :  { %v1781_v58 = vmax.f32 %v1748_v53, 0.0  ;;  %v1600_v14 = vpop.f32.mrf.mxu2  ;;  %v1649_v0 = vpop.f32.mrf.mxu3 }
 0x45b   :  { %v1601_v60 = vadd.f32 %v1600_v14, %v3880_v43  ;;  %v2986_v43 = vld [vmem:[%s3980_s4 + $0x6] ss:$8 sm:$0x3] }
 0x45c   :  { %v1797_v61 = vpack.c.bf16 %v1781_v58, %v1779_v54  ;;  %v3916_v10 = vperm.slane %v2986_v43, 1  ;;  %v3919_v17 = vperm.slane %v2986_v43, 0 }
 0x45d   :  { %v1650_v28 = vadd.f32 %v1649_v0, %v1601_v60 }
 0x45e   :  { %2089 = vmatmul.bf16.gmra.mxu3 %v1797_v61  ;;  %2187 = vmatmul.bf16.gmra.mxu1 %v1797_v61 }
 0x45f   :  { %v1780_v5 = vmax.f32 %v1650_v28, 0.0 }
 0x461   :  { %v1796_v6 = vpack.c.bf16 %v1780_v5, %v1778_v40 }
 0x463   :  { %2040 = vmatmul.bf16.gmra.mxu2 %v1796_v6  ;;  %2138 = vmatmul.bf16.gmra.mxu0 %v1796_v6 }
 0x46b   :  { %v2153_v7 = vpop.f32.mrf.mxu1 }
 0x470   :  { %v2104_v8 = vpop.f32.mrf.mxu0 }
 0x471   :  { %v2055_v9 = vpop.f32.mrf.mxu3  ;;  %v2105_v13 = vadd.f32 %v2104_v8, %v3916_v10 }
 0x473   :  { %v2155_v26 = vpop.f32.mrf.mxu1  ;;  %v2154_v12 = vadd.f32 %v2153_v7, %v2105_v13 }
 0x475   :  { %v2194_v25 = vmax.f32 %v2154_v12, 0.0 }
 0x476   :  { %v2006_v29 = vpop.f32.mrf.mxu2 }
 0x477   :  { %v2007_v3 = vadd.f32 %v2006_v29, %v3919_v17 }
 0x478   :  { %v2106_v15 = vpop.f32.mrf.mxu0 }
 0x479   :  { %v2057_v19 = vpop.f32.mrf.mxu3  ;;  %v2107_v11 = vadd.f32 %v2106_v15, %v3916_v10  ;;  %v2056_v31 = vadd.f32 %v2055_v9, %v2007_v3 }
 0x47b   :  { %v2156_v21 = vadd.f32 %v2155_v26, %v2107_v11  ;;  %v2158_v24 = vpop.f32.mrf.mxu1  ;;  %v2193_v16 = vmax.f32 %v2056_v31, 0.0 }
 0x47d   :  { %v2196_v27 = vmax.f32 %v2156_v21, 0.0 }
 0x47e   :  { %v2008_v30 = vpop.f32.mrf.mxu2 }
 0x47f   :  { %v2226_v32 = vpack.c.bf16 %v2196_v27, %v2194_v25  ;;  %v2009_v33 = vadd.f32 %v2008_v30, %v3919_v17 }
 0x480   :  { %v2109_v34 = vpop.f32.mrf.mxu0 }
 0x481   :  { %v2058_v36 = vadd.f32 %v2057_v19, %v2009_v33  ;;  %v2060_v35 = vpop.f32.mrf.mxu3  ;;  %2427 = vmatmul.bf16.vlgmr.msra.gmra.mxu3 %v2226_v32  ;;  %v2110_v20 = vadd.f32 %v2109_v34, %v3916_v10 }
 0x483   :  { %v2195_v18 = vmax.f32 %v2058_v36, 0.0  ;;  %v2160_v39 = vpop.f32.mrf.mxu1  ;;  %v2159_v38 = vadd.f32 %v2158_v24, %v2110_v20 }
 0x485   :  { %v2225_v41 = vpack.c.bf16 %v2195_v18, %v2193_v16  ;;  %v2198_v49 = vmax.f32 %v2159_v38, 0.0 }
 0x486   :  { %v2011_v42 = vpop.f32.mrf.mxu2 }
 0x487   :  { %2378 = vmatmul.bf16.vlgmr.msra.gmra.mxu2 %v2225_v41  ;;  %v2012_v46 = vadd.f32 %v2011_v42, %v3919_v17 }
 0x488   :  { %v2111_v37 = vpop.f32.mrf.mxu0 }
 0x489   :  { %v2062_v44 = vpop.f32.mrf.mxu3  ;;  %v2112_v45 = vadd.f32 %v2111_v37, %v3916_v10  ;;  %v2061_v51 = vadd.f32 %v2060_v35, %v2012_v46 }
 0x48b   :  { %v2161_v47 = vadd.f32 %v2160_v39, %v2112_v45  ;;  %v2163_v48 = vpop.f32.mrf.mxu1  ;;  %v2197_v54 = vmax.f32 %v2061_v51, 0.0 }
 0x48d   :  { %v2200_v50 = vmax.f32 %v2161_v47, 0.0 }
 0x48e   :  { %v2013_v59 = vpop.f32.mrf.mxu2 }
 0x48f   :  { %v2014_v52 = vadd.f32 %v2013_v59, %v3919_v17  ;;  %v2228_v55 = vpack.c.bf16 %v2200_v50, %v2198_v49 }
 0x490   :  { %v2114_v56 = vpop.f32.mrf.mxu0 }
 0x491   :  { %v2063_v57 = vadd.f32 %v2062_v44, %v2014_v52  ;;  %v2065_v53 = vpop.f32.mrf.mxu3  ;;  %2432 = vmatmul.bf16.gmra.mxu3 %v2228_v55  ;;  %v2115_v23 = vadd.f32 %v2114_v56, %v3916_v10 }
 0x493   :  { %v2199_v58 = vmax.f32 %v2063_v57, 0.0  ;;  %v2165_v14 = vpop.f32.mrf.mxu1  ;;  %v2164_v61 = vadd.f32 %v2163_v48, %v2115_v23 }
 0x495   :  { %v2227_v60 = vpack.c.bf16 %v2199_v58, %v2197_v54  ;;  %v2202_v4 = vmax.f32 %v2164_v61, 0.0 }
 0x496   :  { %v2016_v62 = vpop.f32.mrf.mxu2 }
 0x497   :  { %2383 = vmatmul.bf16.gmra.mxu2 %v2227_v60  ;;  %v2017_v1 = vadd.f32 %v2016_v62, %v3919_v17 }
 0x498   :  { %v2116_v63 = vpop.f32.mrf.mxu0 }
 0x499   :  { %v2067_v0 = vpop.f32.mrf.mxu3  ;;  %v2117_v22 = vadd.f32 %v2116_v63, %v3916_v10  ;;  %v2066_v6 = vadd.f32 %v2065_v53, %v2017_v1 }
 0x49b   :  { %v2166_v2 = vadd.f32 %v2165_v14, %v2117_v22  ;;  %v2168_v28 = vpop.f32.mrf.mxu1  ;;  %v2201_v13 = vmax.f32 %v2066_v6, 0.0 }
 0x49d   :  { %v2204_v40 = vmax.f32 %v2166_v2, 0.0 }
 0x49e   :  { %v2018_v5 = vpop.f32.mrf.mxu2 }
 0x49f   :  { %v2019_v7 = vadd.f32 %v2018_v5, %v3919_v17  ;;  %v2230_v43 = vpack.c.bf16 %v2204_v40, %v2202_v4 }
 0x4a0   :  { %v2119_v8 = vpop.f32.mrf.mxu0 }
 0x4a1   :  { %v2068_v9 = vadd.f32 %v2067_v0, %v2019_v7  ;;  %v2070_v26 = vpop.f32.mrf.mxu3  ;;  %2437 = vmatmul.bf16.gmra.mxu3 %v2230_v43  ;;  %v2120_v12 = vadd.f32 %v2119_v8, %v3916_v10 }
 0x4a3   :  { %v2203_v29 = vmax.f32 %v2068_v9, 0.0  ;;  %v2170_v15 = vpop.f32.mrf.mxu1  ;;  %v2169_v21 = vadd.f32 %v2168_v28, %v2120_v12 }
 0x4a5   :  { %v2229_v19 = vpack.c.bf16 %v2203_v29, %v2201_v13  ;;  %v2206_v32 = vmax.f32 %v2169_v21, 0.0 }
 0x4a6   :  { %v2021_v11 = vpop.f32.mrf.mxu2 }
 0x4a7   :  { %2388 = vmatmul.bf16.gmra.mxu2 %v2229_v19  ;;  %v2022_v27 = vadd.f32 %v2021_v11, %v3919_v17 }
 0x4a8   :  { %v2121_v3 = vpop.f32.mrf.mxu0 }
 0x4a9   :  { %v2072_v24 = vpop.f32.mrf.mxu3  ;;  %v2122_v25 = vadd.f32 %v2121_v3, %v3916_v10  ;;  %v2071_v36 = vadd.f32 %v2070_v26, %v2022_v27 }
 0x4ab   :  { %v2171_v30 = vadd.f32 %v2170_v15, %v2122_v25  ;;  %v2173_v31 = vpop.f32.mrf.mxu1  ;;  %v2205_v20 = vmax.f32 %v2071_v36, 0.0 }
 0x4ad   :  { %v2208_v33 = vmax.f32 %v2171_v30, 0.0 }
 0x4ae   :  { %v2023_v34 = vpop.f32.mrf.mxu2 }
 0x4af   :  { %v2024_v35 = vadd.f32 %v2023_v34, %v3919_v17  ;;  %v2232_v16 = vpack.c.bf16 %v2208_v33, %v2206_v32 }
 0x4b0   :  { %v2124_v18 = vpop.f32.mrf.mxu0 }
 0x4b1   :  { %v2073_v39 = vadd.f32 %v2072_v24, %v2024_v35  ;;  %v2075_v41 = vpop.f32.mrf.mxu3  ;;  %2442 = vmatmul.bf16.gmra.mxu3 %v2232_v16  ;;  %v2125_v38 = vadd.f32 %v2124_v18, %v3916_v10 }
 0x4b3   :  { %v2207_v42 = vmax.f32 %v2073_v39, 0.0  ;;  %v2175_v37 = vpop.f32.mrf.mxu1  ;;  %v2174_v47 = vadd.f32 %v2173_v31, %v2125_v38 }
 0x4b5   :  { %v2231_v44 = vpack.c.bf16 %v2207_v42, %v2205_v20  ;;  %v2210_v52 = vmax.f32 %v2174_v47, 0.0 }
 0x4b6   :  { %v2026_v45 = vpop.f32.mrf.mxu2 }
 0x4b7   :  { %2393 = vmatmul.bf16.gmra.mxu2 %v2231_v44  ;;  %v2027_v50 = vadd.f32 %v2026_v45, %v3919_v17 }
 0x4b8   :  { %v2126_v46 = vpop.f32.mrf.mxu0 }
 0x4b9   :  { %v2077_v48 = vpop.f32.mrf.mxu3  ;;  %v2127_v49 = vadd.f32 %v2126_v46, %v3916_v10  ;;  %v2076_v57 = vadd.f32 %v2075_v41, %v2027_v50 }
 0x4bb   :  { %v2176_v59 = vadd.f32 %v2175_v37, %v2127_v49  ;;  %v2178_v51 = vpop.f32.mrf.mxu1  ;;  %v2209_v60 = vmax.f32 %v2076_v57, 0.0 }
 0x4bd   :  { %v2212_v55 = vmax.f32 %v2176_v59, 0.0 }
 0x4be   :  { %v2028_v56 = vpop.f32.mrf.mxu2 }
 0x4bf   :  { %v2029_v53 = vadd.f32 %v2028_v56, %v3919_v17  ;;  %v2234_v54 = vpack.c.bf16 %v2212_v55, %v2210_v52 }
 0x4c0   :  { %v2129_v58 = vpop.f32.mrf.mxu0 }
 0x4c1   :  { %v2078_v14 = vadd.f32 %v2077_v48, %v2029_v53  ;;  %v2080_v23 = vpop.f32.mrf.mxu3  ;;  %2447 = vmatmul.bf16.gmra.mxu3 %v2234_v54  ;;  %v2130_v61 = vadd.f32 %v2129_v58, %v3916_v10 }
 0x4c3   :  { %v2211_v62 = vmax.f32 %v2078_v14, 0.0  ;;  %v2180_v63 = vpop.f32.mrf.mxu1  ;;  %v2179_v2 = vadd.f32 %v2178_v51, %v2130_v61 }
 0x4c5   :  { %v2233_v0 = vpack.c.bf16 %v2211_v62, %v2209_v60  ;;  %v2214_v7 = vmax.f32 %v2179_v2, 0.0 }
 0x4c6   :  { %v2031_v22 = vpop.f32.mrf.mxu2 }
 0x4c7   :  { %2398 = vmatmul.bf16.gmra.mxu2 %v2233_v0  ;;  %v2032_v40 = vadd.f32 %v2031_v22, %v3919_v17 }
 0x4c8   :  { %v2131_v1 = vpop.f32.mrf.mxu0 }
 0x4c9   :  { %v2082_v28 = vpop.f32.mrf.mxu3  ;;  %v2132_v4 = vadd.f32 %v2131_v1, %v3916_v10  ;;  %v2081_v9 = vadd.f32 %v2080_v23, %v2032_v40 }
 0x4cb   :  { %v2181_v5 = vadd.f32 %v2180_v63, %v2132_v4  ;;  %v2183_v6 = vpop.f32.mrf.mxu1  ;;  %v2213_v19 = vmax.f32 %v2081_v9, 0.0 }
 0x4cd   :  { %v2216_v43 = vmax.f32 %v2181_v5, 0.0 }
 0x4ce   :  { %v2033_v8 = vpop.f32.mrf.mxu2 }
 0x4cf   :  { %v2034_v26 = vadd.f32 %v2033_v8, %v3919_v17  ;;  %v2236_v13 = vpack.c.bf16 %v2216_v43, %v2214_v7 }
 0x4d0   :  { %v2134_v29 = vpop.f32.mrf.mxu0 }
 0x4d1   :  { %v2083_v15 = vadd.f32 %v2082_v28, %v2034_v26  ;;  %2452 = vmatmul.bf16.gmra.mxu3 %v2236_v13  ;;  %v2085_v12 = vpop.f32.mrf.mxu3  ;;  %v2135_v3 = vadd.f32 %v2134_v29, %v3916_v10 }
 0x4d3   :  { %v2215_v11 = vmax.f32 %v2083_v15, 0.0  ;;  %v2185_v24 = vpop.f32.mrf.mxu1  ;;  %v2184_v30 = vadd.f32 %v2183_v6, %v2135_v3 }
 0x4d5   :  { %v2235_v21 = vpack.c.bf16 %v2215_v11, %v2213_v19  ;;  %v2218_v36 = vmax.f32 %v2184_v30, 0.0 }
 0x4d6   :  { %v2036_v25 = vpop.f32.mrf.mxu2 }
 0x4d7   :  { %2403 = vmatmul.bf16.gmra.mxu2 %v2235_v21  ;;  %v2037_v32 = vadd.f32 %v2036_v25, %v3919_v17 }
 0x4d8   :  { %v2136_v27 = vpop.f32.mrf.mxu0 }
 0x4d9   :  { %v2137_v31 = vadd.f32 %v2136_v27, %v3916_v10  ;;  %v2087_v34 = vpop.f32.mrf.mxu3  ;;  %v2086_v18 = vadd.f32 %v2085_v12, %v2037_v32 }
 0x4db   :  { %v2186_v33 = vadd.f32 %v2185_v24, %v2137_v31  ;;  %v2188_v20 = vpop.f32.mrf.mxu1  ;;  %v2217_v38 = vmax.f32 %v2086_v18, 0.0 }
 0x4dd   :  { %v2220_v35 = vmax.f32 %v2186_v33, 0.0 }
 0x4de   :  { %v2038_v16 = vpop.f32.mrf.mxu2 }
 0x4df   :  { %v2039_v39 = vadd.f32 %v2038_v16, %v3919_v17  ;;  %v2238_v41 = vpack.c.bf16 %v2220_v35, %v2218_v36 }
 0x4e0   :  { %v2139_v42 = vpop.f32.mrf.mxu0 }
 0x4e1   :  { %v2088_v37 = vadd.f32 %v2087_v34, %v2039_v39  ;;  %2457 = vmatmul.bf16.gmra.mxu3 %v2238_v41  ;;  %v2140_v45 = vadd.f32 %v2139_v42, %v3916_v10  ;;  %v2090_v47 = vpop.f32.mrf.mxu3 }
 0x4e3   :  { %v2219_v44 = vmax.f32 %v2088_v37, 0.0  ;;  %v2189_v50 = vadd.f32 %v2188_v20, %v2140_v45  ;;  %v2190_v51 = vpop.f32.mrf.mxu1 }
 0x4e5   :  { %v2237_v46 = vpack.c.bf16 %v2219_v44, %v2217_v38  ;;  %v2222_v56 = vmax.f32 %v2189_v50, 0.0 }
 0x4e6   :  { %v2041_v48 = vpop.f32.mrf.mxu2 }
 0x4e7   :  { %2408 = vmatmul.bf16.gmra.mxu2 %v2237_v46  ;;  %v2042_v52 = vadd.f32 %v2041_v48, %v3919_v17 }
 0x4e8   :  { %v2141_v49 = vpop.f32.mrf.mxu0 }
 0x4e9   :  { %v2142_v59 = vadd.f32 %v2141_v49, %v3916_v10  ;;  %v2091_v54 = vadd.f32 %v2090_v47, %v2042_v52  ;;  %v2092_v23 = vpop.f32.mrf.mxu3  ;;  %v3955_v10 = vld [vmem:[%s3980_s4 + $0x7] ss:$0 sm:$0xff]  ;;  %s3472_s4 = smov [#allocation7]  }
 0x4ea   :  { %s2536_s26 = sshll.u32 %s3472_s4, 4  ;;  %s2537_s26 = int_to_ptr.vmem [resolvable:$true] %s2536_s26 }
 0x4eb   :  { %v2191_v55 = vadd.f32 %v2190_v51, %v2142_v59  ;;  %v2221_v62 = vmax.f32 %v2091_v54, 0.0 }
 0x4ed   :  { %v2224_v57 = vmax.f32 %v2191_v55, 0.0 }
 0x4ee   :  { %v2043_v53 = vpop.f32.mrf.mxu2 }
 0x4ef   :  { %v2044_v58 = vadd.f32 %v2043_v53, %v3919_v17  ;;  %v2240_v14 = vpack.c.bf16 %v2224_v57, %v2222_v56 }
 0x4f1   :  { %v2093_v60 = vadd.f32 %v2092_v23, %v2044_v58  ;;  %2462 = vmatmul.bf16.gmra.mxu3 %v2240_v14 }
 0x4f3   :  { %v2223_v63 = vmax.f32 %v2093_v60, 0.0 }
 0x4f5   :  { %v2239_v61 = vpack.c.bf16 %v2223_v63, %v2221_v62 }
 0x4f7   :  { %2413 = vmatmul.bf16.gmra.mxu2 %v2239_v61 }
 0x504   :  { %v2428_v0 = vpop.f32.mrf.mxu3 }
 0x50a   :  { %v2379_v22 = vpop.f32.mrf.mxu2 }
 0x50b   :  { %v2380_v1 = vadd.f32 %v2379_v22, %v3955_v10 }
 0x50c   :  { %v2430_v2 = vpop.f32.mrf.mxu3 }
 0x50d   :  { %v2429_v28 = vadd.f32 %v2428_v0, %v2380_v1 }
 0x50f   :  { %3356 = vtanh.f32 %v2429_v28 }
 0x512   :  { %v2381_v17 = vpop.f32.mrf.mxu2 }
 0x513   :  { %v2382_v4 = vadd.f32 %v2381_v17, %v3955_v10 }
 0x514   :  { %v2433_v40 = vpop.f32.mrf.mxu3 }
 0x515   :  { %v3357_v5 = vpop.eup %3356  ;;  %v2431_v6 = vadd.f32 %v2430_v2, %v2382_v4 }
 0x516   :  { %2500 = vst [vmem:[#allocation7 + $0x8] sm:$0xff] %v3357_v5 }
 0x517   :  { %3358 = vtanh.f32 %v2431_v6 }
 0x51a   :  { %v2384_v7 = vpop.f32.mrf.mxu2 }
 0x51b   :  { %v2385_v43 = vadd.f32 %v2384_v7, %v3955_v10 }
 0x51c   :  { %v2435_v8 = vpop.f32.mrf.mxu3 }
 0x51d   :  { %v3359_v9 = vpop.eup %3358  ;;  %v2434_v26 = vadd.f32 %v2433_v40, %v2385_v43 }
 0x51e   :  { %2501 = vst [vmem:[#allocation7 + $0x20] sm:$0xff] %v3359_v9 }
 0x51f   :  { %3360 = vtanh.f32 %v2434_v26 }
 0x522   :  { %v2386_v13 = vpop.f32.mrf.mxu2 }
 0x523   :  { %v2387_v29 = vadd.f32 %v2386_v13, %v3955_v10 }
 0x524   :  { %v2438_v15 = vpop.f32.mrf.mxu3 }
 0x525   :  { %v3361_v12 = vpop.eup %3360  ;;  %v2436_v19 = vadd.f32 %v2435_v8, %v2387_v29 }
 0x526   :  { %2502 = vst [vmem:[#allocation7 + $0x38] sm:$0xff] %v3361_v12 }
 0x527   :  { %3362 = vtanh.f32 %v2436_v19 }
 0x52a   :  { %v2389_v11 = vpop.f32.mrf.mxu2 }
 0x52b   :  { %v2390_v3 = vadd.f32 %v2389_v11, %v3955_v10 }
 0x52c   :  { %v2440_v21 = vpop.f32.mrf.mxu3 }
 0x52d   :  { %v3363_v24 = vpop.eup %3362  ;;  %v2439_v25 = vadd.f32 %v2438_v15, %v2390_v3 }
 0x52e   :  { %2503 = vst [vmem:[#allocation7 + $0x50] sm:$0xff] %v3363_v24 }
 0x52f   :  { %3364 = vtanh.f32 %v2439_v25 }
 0x532   :  { %v2391_v27 = vpop.f32.mrf.mxu2 }
 0x533   :  { %v2392_v30 = vadd.f32 %v2391_v27, %v3955_v10 }
 0x534   :  { %v2443_v31 = vpop.f32.mrf.mxu3 }
 0x535   :  { %v3365_v32 = vpop.eup %3364  ;;  %v2441_v33 = vadd.f32 %v2440_v21, %v2392_v30 }
 0x536   :  { %2504 = vst [vmem:[#allocation7 + $0x68] sm:$0xff] %v3365_v32 }
 0x537   :  { %3366 = vtanh.f32 %v2441_v33 }
 0x53a   :  { %v2394_v34 = vpop.f32.mrf.mxu2 }
 0x53b   :  { %v2395_v36 = vadd.f32 %v2394_v34, %v3955_v10 }
 0x53c   :  { %v2445_v35 = vpop.f32.mrf.mxu3 }
 0x53d   :  { %v3367_v16 = vpop.eup %3366  ;;  %v2444_v18 = vadd.f32 %v2443_v31, %v2395_v36 }
 0x53e   :  { %2505 = vst [vmem:[#allocation7 + $0x80] sm:$0xff] %v3367_v16 }
 0x53f   :  { %3368 = vtanh.f32 %v2444_v18 }
 0x542   :  { %v2396_v39 = vpop.f32.mrf.mxu2 }
 0x543   :  { %v2397_v41 = vadd.f32 %v2396_v39, %v3955_v10 }
 0x544   :  { %v2448_v20 = vpop.f32.mrf.mxu3 }
 0x545   :  { %v3369_v42 = vpop.eup %3368  ;;  %v2446_v37 = vadd.f32 %v2445_v35, %v2397_v41 }
 0x546   :  { %2506 = vst [vmem:[#allocation7 + $0x98] sm:$0xff] %v3369_v42 }
 0x547   :  { %3370 = vtanh.f32 %v2446_v37 }
 0x54a   :  { %v2399_v38 = vpop.f32.mrf.mxu2 }
 0x54b   :  { %v2400_v44 = vadd.f32 %v2399_v38, %v3955_v10 }
 0x54c   :  { %v2450_v45 = vpop.f32.mrf.mxu3 }
 0x54d   :  { %v3371_v46 = vpop.eup %3370  ;;  %v2449_v47 = vadd.f32 %v2448_v20, %v2400_v44 }
 0x54e   :  { %2507 = vst [vmem:[#allocation7 + $0xb0] sm:$0xff] %v3371_v46 }
 0x54f   :  { %3372 = vtanh.f32 %v2449_v47 }
 0x552   :  { %v2401_v48 = vpop.f32.mrf.mxu2 }
 0x553   :  { %v2402_v49 = vadd.f32 %v2401_v48, %v3955_v10 }
 0x554   :  { %v2453_v50 = vpop.f32.mrf.mxu3 }
 0x555   :  { %v3373_v59 = vpop.eup %3372  ;;  %v2451_v51 = vadd.f32 %v2450_v45, %v2402_v49 }
 0x556   :  { %2508 = vst [vmem:[#allocation7 + $0xc8] sm:$0xff] %v3373_v59 }
 0x557   :  { %3374 = vtanh.f32 %v2451_v51 }
 0x55a   :  { %v2404_v52 = vpop.f32.mrf.mxu2 }
 0x55b   :  { %v2405_v55 = vadd.f32 %v2404_v52, %v3955_v10 }
 0x55c   :  { %v2455_v56 = vpop.f32.mrf.mxu3 }
 0x55d   :  { %v3375_v57 = vpop.eup %3374  ;;  %v2454_v53 = vadd.f32 %v2453_v50, %v2405_v55 }
 0x55e   :  { %2509 = vst [vmem:[#allocation7 + $0xe0] sm:$0xff] %v3375_v57 }
 0x55f   :  { %3376 = vtanh.f32 %v2454_v53 }
 0x562   :  { %v2406_v54 = vpop.f32.mrf.mxu2 }
 0x563   :  { %v2407_v58 = vadd.f32 %v2406_v54, %v3955_v10 }
 0x564   :  { %v2458_v60 = vpop.f32.mrf.mxu3 }
 0x565   :  { %v3377_v14 = vpop.eup %3376  ;;  %v2456_v23 = vadd.f32 %v2455_v56, %v2407_v58 }
 0x566   :  { %2510 = vst [vmem:[#allocation7 + $0xf8] sm:$0xff] %v3377_v14 }
 0x567   :  { %3378 = vtanh.f32 %v2456_v23 }
 0x56a   :  { %v2409_v62 = vpop.f32.mrf.mxu2 }
 0x56b   :  { %v2410_v63 = vadd.f32 %v2409_v62, %v3955_v10 }
 0x56c   :  { %v2460_v22 = vpop.f32.mrf.mxu3 }
 0x56d   :  { %v3379_v61 = vpop.eup %3378  ;;  %v2459_v0 = vadd.f32 %v2458_v60, %v2410_v63 }
 0x56e   :  { %2511 = vst [vmem:[#allocation7 + $0x110] sm:$0xff] %v3379_v61 }
 0x56f   :  { %3380 = vtanh.f32 %v2459_v0 }
 0x572   :  { %v2411_v1 = vpop.f32.mrf.mxu2 }
 0x573   :  { %v2412_v2 = vadd.f32 %v2411_v1, %v3955_v10 }
 0x574   :  { %v2463_v4 = vpop.f32.mrf.mxu3 }
 0x575   :  { %v3381_v28 = vpop.eup %3380  ;;  %v2461_v17 = vadd.f32 %v2460_v22, %v2412_v2 }
 0x576   :  { %2512 = vst [vmem:[#allocation7 + $0x128] sm:$0xff] %v3381_v28 }
 0x577   :  { %3382 = vtanh.f32 %v2461_v17 }
 0x57a   :  { %v2414_v40 = vpop.f32.mrf.mxu2 }
 0x57b   :  { %v2415_v5 = vadd.f32 %v2414_v40, %v3955_v10 }
 0x57c   :  { %v2465_v9 = vpop.f32.mrf.mxu3 }
 0x57d   :  { %v3383_v6 = vpop.eup %3382  ;;  %v2464_v7 = vadd.f32 %v2463_v4, %v2415_v5 }
 0x57e   :  { %2513 = vst [vmem:[#allocation7 + $0x140] sm:$0xff] %v3383_v6 }
 0x57f   :  { %3384 = vtanh.f32 %v2464_v7 }
 0x582   :  { %v2416_v43 = vpop.f32.mrf.mxu2 }
 0x583   :  { %v2417_v8 = vadd.f32 %v2416_v43, %v3955_v10 }
 0x585   :  { %v3385_v26 = vpop.eup %3384  ;;  %v2466_v13 = vadd.f32 %v2465_v9, %v2417_v8 }
 0x586   :  { %2514 = vst [vmem:[#allocation7 + $0x158] sm:$0xff] %v3385_v26 }
 0x587   :  { %3386 = vtanh.f32 %v2466_v13 }
 0x58d   :  { %v3387_v29 = vpop.eup %3386 }
 0x58e   :  { %2515 = vst [vmem:[#allocation7 + $0x170] sm:$0xff] %v3387_v29 }
 0x58f   :  { %2544 = dma.vmem_to_hbm [thread:$0]  %s2537_s26, 6144, %s2539_s29, [#allocation4], %s3473_s2, %s3473_s2, %s3474_s3  }
 0x590   :  { %3464 = dma.done.wait [#allocation4], 6144  }
 0x591   :  { %3465 = vsyncadd [#allocation4], 4294961152 }
 0x592   :  { %2549 = vsyncpa [#allocation3], 1 }
 0x593   :  { %2550 = vsyncpa [#allocation6], 1 }
 0x594   :  { %2551 = vsyncpa [#allocation4], 1 }

</bundles_post_ra>
